<compile_context>
chip_gen: v5e
topology: v5e:2x2
jax: 0.10.0
libtpu: 0.0.40
codegen_flags: <defaults>
</compile_context>

<pallas_src>
import functools

import jax
import jax.numpy as jnp
import numpy as np
from jax.experimental import pallas as pl
from jax.experimental.pallas import tpu as pltpu


# ----------------------------------------------------------------------------
# Pallas kernel: whole IDEANet forward for one batch tile (batch on lanes).
# ----------------------------------------------------------------------------
def _ideanet_kernel(
    x_ref,       # (LB, bb)    f32   x[:, :, 0]^T
    hfeat_ref,   # (L,  bb)    f32   h[:, :, 0]^T
    hol_w_ref,   # (L,  L)     f32   holiday weight (used as W @ x^T)
    hol_b_ref,   # (L,  1)     f32
    w_hh_ref,    # (3H, H)     bf16  GRU recurrent weight, gates r,z,n fused
    gvec_ref,    # (3H, 3)     f32   columns: [w_ih, b_ih, b_hh]
    out_w_ref,   # (LA, H+LB)  f32   [lin_w, ar_w]
    out_b_ref,   # (LA, 1)     f32   lin_b + ar_b
    out_ref,     # (LA, bb)    f32
    *,
    lookback: int,
    hid_dim: int,
):
  f32 = jnp.float32
  LB, H = lookback, hid_dim

  x = x_ref[...]                    # (LB, bb)
  hfeat = hfeat_ref[...]            # (L,  bb)

  # holiday^T = W_hol @ h[:, :, 0]^T + b_hol
  holiday = (
      jnp.dot(hol_w_ref[...], hfeat, preferred_element_type=f32)
      + hol_b_ref[...]
  )                                 # (L, bb)

  # x_regular^T = x^T - holiday^T[:lookback]
  x_reg = x - holiday[:LB, :]       # (LB, bb)

  w_hh = w_hh_ref[...]              # (3H, H) bf16
  gvec = gvec_ref[...]              # (3H, 3)
  w_ih = gvec[:, 0:1]               # (3H, 1)
  b_ih = gvec[:, 1:2]               # (3H, 1)
  b_hh = gvec[:, 2:3]               # (3H, 1)

  # ---- GRU recurrence over the lookback sequence (input_dim == 1) ----------
  # lookback is small & static: unroll in Python (static sublane slices).
  h_state = jnp.zeros((H, x.shape[-1]), f32)
  for t in range(LB):
    # Input-gate term: broadcast FMA, independent of h_state -> overlaps with
    # the serial recurrent matmul below (no big hoisted intermediates).
    pre_i = w_ih * x_reg[t:t + 1, :] + b_ih                       # (3H, bb)
    # One fused bf16 MXU matmul per step for all three gates (f32 accum).
    pre_h = (
        jnp.dot(w_hh, h_state.astype(jnp.bfloat16),
                preferred_element_type=f32)
        + b_hh
    )                                                             # (3H, bb)
    r = jax.nn.sigmoid(pre_i[:H] + pre_h[:H])
    z = jax.nn.sigmoid(pre_i[H:2 * H] + pre_h[H:2 * H])
    n = jnp.tanh(pre_i[2 * H:] + r * pre_h[2 * H:])
    h_state = (1.0 - z) * n + z * h_state

  # ---- Fused epilogue: [lin_w, ar_w] @ [h_state; x_reg] + bias + holiday ----
  comb = jnp.concatenate([h_state, x_reg], axis=0)                # (H+LB, bb)
  rnn_out = (
      jnp.dot(out_w_ref[...], comb, preferred_element_type=f32)
      + out_b_ref[...]
  )                                                               # (LA, bb)
  out_ref[...] = (rnn_out + holiday[LB:, :]).astype(out_ref.dtype)


# ----------------------------------------------------------------------------
# One-time parameter preparation (keeps the jitted forward graph to just the
# pallas_call + transpose/pad).
# ----------------------------------------------------------------------------
def prepare_params(params, *, lookback, lookahead, hid_dim):
  """Convert PyTorch-layout params into kernel-ready operands (do this once)."""
  del lookback, lookahead  # implied by array shapes
  H = hid_dim
  f32 = jnp.float32
  col = lambda v: jnp.asarray(v, f32).reshape(-1, 1)

  hol_w = jnp.asarray(params["hol_w"], f32)                  # (L, L): W @ x^T form
  hol_b = col(params["hol_b"])                               # (L, 1)

  # GRU recurrent weight for all gates (r,z,n) fused; bf16 for the serial MXU path.
  w_hh = jnp.asarray(params["w_hh"], jnp.bfloat16)           # (3H, H)
  # Input weight (input_dim == 1) and both bias vectors packed into one ref.
  gvec = jnp.concatenate(
      [jnp.asarray(params["w_ih"], f32).reshape(3 * H, 1),
       col(params["b_ih"]),
       col(params["b_hh"])], axis=1)                         # (3H, 3)

  # Fused output projection: [lin_w, ar_w] @ [h_state; x_reg] + (lin_b + ar_b)
  out_w = jnp.concatenate(
      [jnp.asarray(params["lin_w"], f32),                    # (LA, H)
       jnp.asarray(params["ar_w"], f32)], axis=1)            # (LA, H+LB)
  out_b = col(params["lin_b"]) + col(params["ar_b"])         # (LA, 1)

  return (hol_w, hol_b, w_hh, gvec, out_w, out_b)


# ----------------------------------------------------------------------------
# Wrapper: transpose to batch-on-lanes, pad/tile batch, pallas_call.
# ----------------------------------------------------------------------------
def ideanet_forward(x, h, prep, *, lookback, lookahead, hid_dim, block_b=512):
  """x: (B, lookback, 1), h: (B, lookback+lookahead, h_dim) -> (B, lookahead)."""
  B = x.shape[0]
  L = lookback + lookahead

  # Batch on the LANE axis.
  xT = x[:, :, 0].astype(jnp.float32).T      # (LB, B)
  hT = h[:, :, 0].astype(jnp.float32).T      # (L,  B)

  # Pad batch (lane axis) to a multiple of 128: lane-dense vregs, unmasked
  # output stores, and 128-divisible lane blocks when tiling.
  b_pad = ((B + 127) // 128) * 128
  n_lane_blocks = b_pad // 128
  if n_lane_blocks > 1:
    # >= 2 grid steps so dimension_semantics=("parallel",) can shard batch
    # tiles across both v7x TensorCores; on single-TC v5e/v6e the extra grid
    # step only costs ~0.35 us.
    bb = min(block_b, 128 * ((n_lane_blocks + 1) // 2))
  else:
    bb = b_pad
  b_pad = ((b_pad + bb - 1) // bb) * bb
  if b_pad != B:
    xT = jnp.pad(xT, ((0, 0), (0, b_pad - B)))
    hT = jnp.pad(hT, ((0, 0), (0, b_pad - B)))

  def batch_spec(rows):
    return pl.BlockSpec((rows, bb), lambda i: (0, i))

  def const_spec(arr):  # all constants are 2-D, replicated across the grid
    return pl.BlockSpec(arr.shape, lambda i: (0, 0))

  kernel = functools.partial(_ideanet_kernel, lookback=lookback, hid_dim=hid_dim)
  outT = pl.pallas_call(
      kernel,
      out_shape=jax.ShapeDtypeStruct((lookahead, b_pad), jnp.float32),
      grid=(b_pad // bb,),
      in_specs=[batch_spec(lookback), batch_spec(L)]
               + [const_spec(w) for w in prep],
      out_specs=batch_spec(lookahead),
      compiler_params=pltpu.CompilerParams(dimension_semantics=("parallel",)),
  )(xT, hT, *prep)
  return outT[:, :B].T


# ----------------------------------------------------------------------------
# Pure-JAX reference (mirrors the PyTorch forward) for correctness checking.
# ----------------------------------------------------------------------------
def ideanet_reference(x, h, params, *, lookback, lookahead, hid_dim):
  del lookahead
  LB, H = lookback, hid_dim
  x2 = x[:, :, 0]
  hfeat = h[:, :, 0]
  holiday = hfeat @ params["hol_w"].T + params["hol_b"]
  x_reg = x2 - holiday[:, :LB]

  h_state = jnp.zeros((x.shape[0], H), jnp.float32)
  for t in range(LB):
    x_t = x_reg[:, t:t + 1]
    gi = x_t @ params["w_ih"].T + params["b_ih"]
    gh = h_state @ params["w_hh"].T + params["b_hh"]
    r = jax.nn.sigmoid(gi[:, :H] + gh[:, :H])
    z = jax.nn.sigmoid(gi[:, H:2 * H] + gh[:, H:2 * H])
    n = jnp.tanh(gi[:, 2 * H:] + r * gh[:, 2 * H:])
    h_state = (1.0 - z) * n + z * h_state

  out = h_state @ params["lin_w"].T + params["lin_b"]
  ar_out = x_reg @ params["ar_w"].T + params["ar_b"]
  return out + ar_out + holiday[:, LB:]


# ----------------------------------------------------------------------------
# Deterministic parameter init (PyTorch-style uniform ranges), small demo run.
# ----------------------------------------------------------------------------
def init_params(key, *, lookback, lookahead, hid_dim):
  L = lookback + lookahead
  H = hid_dim
  ks = jax.random.split(key, 12)
  u = lambda k, shape, bound: jax.random.uniform(
      k, shape, jnp.float32, -bound, bound)
  k_hol = 1.0 / np.sqrt(L)
  k_gru = 1.0 / np.sqrt(H)
  k_lin = 1.0 / np.sqrt(H)
  k_ar = 1.0 / np.sqrt(lookback)
  return {
      "hol_w": u(ks[0], (L, L), k_hol),
      "hol_b": u(ks[1], (L,), k_hol),
      "w_ih": u(ks[2], (3 * H, 1), k_gru),     # gate order: r, z, n
      "w_hh": u(ks[3], (3 * H, H), k_gru),
      "b_ih": u(ks[4], (3 * H,), k_gru),
      "b_hh": u(ks[5], (3 * H,), k_gru),
      "lin_w": u(ks[6], (lookahead, H), k_lin),
      "lin_b": u(ks[7], (lookahead,), k_lin),
      "ar_w": u(ks[8], (lookahead, lookback), k_ar),
      "ar_b": u(ks[9], (lookahead,), k_ar),
  }


if __name__ == "__main__":
  # Small shapes consistent with the module's forward.
  B = 8          # batch
  lookback = 8   # input sequence length
  lookahead = 4  # prediction horizon (output dim)
  h_dim = 3      # holiday feature dim (only feature 0 is used)
  hid_dim = 32   # GRU hidden size

  key = jax.random.PRNGKey(0)
  k_p, k_x, k_h = jax.random.split(key, 3)
  params = init_params(k_p, lookback=lookback, lookahead=lookahead,
                       hid_dim=hid_dim)
  prep = prepare_params(params, lookback=lookback, lookahead=lookahead,
                        hid_dim=hid_dim)

  x = jax.random.normal(k_x, (B, lookback, 1), jnp.float32)
  h = jax.random.normal(k_h, (B, lookback + lookahead, h_dim), jnp.float32)

  fwd = jax.jit(functools.partial(ideanet_forward, lookback=lookback,
                                  lookahead=lookahead, hid_dim=hid_dim))
  out = jax.block_until_ready(fwd(x, h, prep))
  ref = jax.block_until_ready(
      ideanet_reference(x, h, params, lookback=lookback, lookahead=lookahead,
                        hid_dim=hid_dim))

  assert out.shape == (B, lookahead)
  # bf16 MXU operands on the recurrent path -> loosened tolerance vs the f32
  # reference (review-sanctioned); a structural bug would show up as O(1) error.
  np.testing.assert_allclose(np.asarray(out), np.asarray(ref),
                             rtol=5e-2, atol=5e-2)

  # Also exercise the multi-tile ("parallel" grid) path used for larger batches.
  B2 = 160
  x2 = jax.random.normal(jax.random.PRNGKey(1), (B2, lookback, 1), jnp.float32)
  h2 = jax.random.normal(jax.random.PRNGKey(2),
                         (B2, lookback + lookahead, h_dim), jnp.float32)
  out2 = jax.block_until_ready(fwd(x2, h2, prep))
  ref2 = ideanet_reference(x2, h2, params, lookback=lookback,
                           lookahead=lookahead, hid_dim=hid_dim)
  np.testing.assert_allclose(np.asarray(out2), np.asarray(ref2),
                             rtol=5e-2, atol=5e-2)

  print("KERNEL_OK")
</pallas_src>

<mosaic_0001>
module attributes {stable_mosaic.version = 11 : i64} {
  func.func @_ideanet_kernel(%arg0: i32, %arg1: memref<8x128xf32, #tpu.memory_space<vmem>>, %arg2: memref<12x128xf32, #tpu.memory_space<vmem>>, %arg3: memref<12x12xf32, #tpu.memory_space<vmem>>, %arg4: memref<12x1xf32, #tpu.memory_space<vmem>>, %arg5: memref<96x32xbf16, #tpu.memory_space<vmem>>, %arg6: memref<96x3xf32, #tpu.memory_space<vmem>>, %arg7: memref<4x40xf32, #tpu.memory_space<vmem>>, %arg8: memref<4x1xf32, #tpu.memory_space<vmem>>, %arg9: memref<4x128xf32, #tpu.memory_space<vmem>>) attributes {dimension_semantics = [#tpu.dimension_semantics<parallel>], iteration_bounds = array<i64: 1>, scalar_prefetch = 0 : i64, scratch_operands = 0 : i64, tpu.core_type = #tpu.core_type<tc>, window_params = [{transform_indices = @transform_0, window_bounds = array<i64: 8, 128>}, {transform_indices = @transform_1, window_bounds = array<i64: 12, 128>}, {pipeline_mode = #tpu.pipeline_mode<synchronous>, transform_indices = @transform_2, window_bounds = array<i64: 12, 12>}, {pipeline_mode = #tpu.pipeline_mode<synchronous>, transform_indices = @transform_3, window_bounds = array<i64: 12, 1>}, {pipeline_mode = #tpu.pipeline_mode<synchronous>, transform_indices = @transform_4, window_bounds = array<i64: 96, 32>}, {pipeline_mode = #tpu.pipeline_mode<synchronous>, transform_indices = @transform_5, window_bounds = array<i64: 96, 3>}, {pipeline_mode = #tpu.pipeline_mode<synchronous>, transform_indices = @transform_6, window_bounds = array<i64: 4, 40>}, {pipeline_mode = #tpu.pipeline_mode<synchronous>, transform_indices = @transform_7, window_bounds = array<i64: 4, 1>}, {transform_indices = @transform_8, window_bounds = array<i64: 4, 128>}]} {
    %c0 = arith.constant 0 : index
    %c0_0 = arith.constant 0 : index
    %0 = vector.load %arg1[%c0, %c0_0] : memref<8x128xf32, #tpu.memory_space<vmem>>, vector<8x128xf32>
    %c0_1 = arith.constant 0 : index
    %c0_2 = arith.constant 0 : index
    %1 = vector.load %arg2[%c0_1, %c0_2] : memref<12x128xf32, #tpu.memory_space<vmem>>, vector<12x128xf32>
    %c0_3 = arith.constant 0 : index
    %c0_4 = arith.constant 0 : index
    %2 = vector.load %arg3[%c0_3, %c0_4] : memref<12x12xf32, #tpu.memory_space<vmem>>, vector<12x12xf32>
    %cst = arith.constant dense<0.000000e+00> : vector<12x128xf32>
    %3 = tpu.matmul %2, %1, %cst {dimension_numbers = #tpu.dot_dimension_numbers<[1], [0], [0], [1], [0, 0, 1, 1], [], []>} : vector<12x12xf32>, vector<12x128xf32>, vector<12x128xf32> -> vector<12x128xf32>
    %c0_5 = arith.constant 0 : index
    %c0_6 = arith.constant 0 : index
    %4 = vector.load %arg4[%c0_5, %c0_6] : memref<12x1xf32, #tpu.memory_space<vmem>>, vector<12x1xf32>
    %5 = vector.broadcast %4 : vector<12x1xf32> to vector<12x128xf32>
    %6 = arith.addf %3, %5 : vector<12x128xf32>
    %7 = vector.extract_strided_slice %6 {offsets = [0, 0], sizes = [8, 128], strides = [1, 1]} : vector<12x128xf32> to vector<8x128xf32>
    %8 = arith.subf %0, %7 : vector<8x128xf32>
    %c0_7 = arith.constant 0 : index
    %c0_8 = arith.constant 0 : index
    %9 = vector.load %arg5[%c0_7, %c0_8] : memref<96x32xbf16, #tpu.memory_space<vmem>>, vector<96x32xbf16>
    %c0_9 = arith.constant 0 : index
    %c0_10 = arith.constant 0 : index
    %10 = vector.load %arg6[%c0_9, %c0_10] : memref<96x3xf32, #tpu.memory_space<vmem>>, vector<96x3xf32>
    %11 = vector.extract_strided_slice %10 {offsets = [0, 0], sizes = [96, 1], strides = [1, 1]} : vector<96x3xf32> to vector<96x1xf32>
    %12 = vector.extract_strided_slice %10 {offsets = [0, 1], sizes = [96, 1], strides = [1, 1]} : vector<96x3xf32> to vector<96x1xf32>
    %13 = vector.extract_strided_slice %10 {offsets = [0, 2], sizes = [96, 1], strides = [1, 1]} : vector<96x3xf32> to vector<96x1xf32>
    %cst_11 = arith.constant 0.000000e+00 : f32
    %14 = vector.broadcast %cst_11 : f32 to vector<32x128xf32>
    %15 = vector.extract_strided_slice %8 {offsets = [0, 0], sizes = [1, 128], strides = [1, 1]} : vector<8x128xf32> to vector<1x128xf32>
    %16 = vector.broadcast %11 : vector<96x1xf32> to vector<96x128xf32>
    %17 = vector.broadcast %15 : vector<1x128xf32> to vector<96x128xf32>
    %18 = arith.mulf %16, %17 : vector<96x128xf32>
    %19 = vector.broadcast %12 : vector<96x1xf32> to vector<96x128xf32>
    %20 = arith.addf %18, %19 : vector<96x128xf32>
    %21 = arith.truncf %14 : vector<32x128xf32> to vector<32x128xbf16>
    %cst_12 = arith.constant dense<0.000000e+00> : vector<96x128xf32>
    %22 = tpu.matmul %9, %21, %cst_12 {dimension_numbers = #tpu.dot_dimension_numbers<[1], [0], [0], [1], [0, 0, 1, 1], [], []>} : vector<96x32xbf16>, vector<32x128xbf16>, vector<96x128xf32> -> vector<96x128xf32>
    %23 = vector.broadcast %13 : vector<96x1xf32> to vector<96x128xf32>
    %24 = arith.addf %22, %23 : vector<96x128xf32>
    %25 = vector.extract_strided_slice %20 {offsets = [0, 0], sizes = [32, 128], strides = [1, 1]} : vector<96x128xf32> to vector<32x128xf32>
    %26 = vector.extract_strided_slice %24 {offsets = [0, 0], sizes = [32, 128], strides = [1, 1]} : vector<96x128xf32> to vector<32x128xf32>
    %27 = arith.addf %25, %26 : vector<32x128xf32>
    %28 = arith.negf %27 : vector<32x128xf32>
    %29 = math.exp %28 : vector<32x128xf32>
    %cst_13 = arith.constant 1.000000e+00 : f32
    %30 = vector.broadcast %cst_13 : f32 to vector<32x128xf32>
    %31 = arith.addf %30, %29 : vector<32x128xf32>
    %32 = arith.divf %30, %31 : vector<32x128xf32>
    %33 = vector.extract_strided_slice %20 {offsets = [32, 0], sizes = [32, 128], strides = [1, 1]} : vector<96x128xf32> to vector<32x128xf32>
    %34 = vector.extract_strided_slice %24 {offsets = [32, 0], sizes = [32, 128], strides = [1, 1]} : vector<96x128xf32> to vector<32x128xf32>
    %35 = arith.addf %33, %34 : vector<32x128xf32>
    %36 = arith.negf %35 : vector<32x128xf32>
    %37 = math.exp %36 : vector<32x128xf32>
    %cst_14 = arith.constant 1.000000e+00 : f32
    %38 = vector.broadcast %cst_14 : f32 to vector<32x128xf32>
    %39 = arith.addf %38, %37 : vector<32x128xf32>
    %40 = arith.divf %38, %39 : vector<32x128xf32>
    %41 = vector.extract_strided_slice %20 {offsets = [64, 0], sizes = [32, 128], strides = [1, 1]} : vector<96x128xf32> to vector<32x128xf32>
    %42 = vector.extract_strided_slice %24 {offsets = [64, 0], sizes = [32, 128], strides = [1, 1]} : vector<96x128xf32> to vector<32x128xf32>
    %43 = arith.mulf %32, %42 : vector<32x128xf32>
    %44 = arith.addf %41, %43 : vector<32x128xf32>
    %45 = math.tanh %44 : vector<32x128xf32>
    %cst_15 = arith.constant 1.000000e+00 : f32
    %46 = vector.broadcast %cst_15 : f32 to vector<32x128xf32>
    %47 = arith.subf %46, %40 : vector<32x128xf32>
    %48 = arith.mulf %47, %45 : vector<32x128xf32>
    %49 = arith.mulf %40, %14 : vector<32x128xf32>
    %50 = arith.addf %48, %49 : vector<32x128xf32>
    %51 = vector.extract_strided_slice %8 {offsets = [1, 0], sizes = [1, 128], strides = [1, 1]} : vector<8x128xf32> to vector<1x128xf32>
    %52 = vector.broadcast %11 : vector<96x1xf32> to vector<96x128xf32>
    %53 = vector.broadcast %51 : vector<1x128xf32> to vector<96x128xf32>
    %54 = arith.mulf %52, %53 : vector<96x128xf32>
    %55 = vector.broadcast %12 : vector<96x1xf32> to vector<96x128xf32>
    %56 = arith.addf %54, %55 : vector<96x128xf32>
    %57 = arith.truncf %50 : vector<32x128xf32> to vector<32x128xbf16>
    %cst_16 = arith.constant dense<0.000000e+00> : vector<96x128xf32>
    %58 = tpu.matmul %9, %57, %cst_16 {dimension_numbers = #tpu.dot_dimension_numbers<[1], [0], [0], [1], [0, 0, 1, 1], [], []>} : vector<96x32xbf16>, vector<32x128xbf16>, vector<96x128xf32> -> vector<96x128xf32>
    %59 = vector.broadcast %13 : vector<96x1xf32> to vector<96x128xf32>
    %60 = arith.addf %58, %59 : vector<96x128xf32>
    %61 = vector.extract_strided_slice %56 {offsets = [0, 0], sizes = [32, 128], strides = [1, 1]} : vector<96x128xf32> to vector<32x128xf32>
    %62 = vector.extract_strided_slice %60 {offsets = [0, 0], sizes = [32, 128], strides = [1, 1]} : vector<96x128xf32> to vector<32x128xf32>
    %63 = arith.addf %61, %62 : vector<32x128xf32>
    %64 = arith.negf %63 : vector<32x128xf32>
    %65 = math.exp %64 : vector<32x128xf32>
    %cst_17 = arith.constant 1.000000e+00 : f32
    %66 = vector.broadcast %cst_17 : f32 to vector<32x128xf32>
    %67 = arith.addf %66, %65 : vector<32x128xf32>
    %68 = arith.divf %66, %67 : vector<32x128xf32>
    %69 = vector.extract_strided_slice %56 {offsets = [32, 0], sizes = [32, 128], strides = [1, 1]} : vector<96x128xf32> to vector<32x128xf32>
    %70 = vector.extract_strided_slice %60 {offsets = [32, 0], sizes = [32, 128], strides = [1, 1]} : vector<96x128xf32> to vector<32x128xf32>
    %71 = arith.addf %69, %70 : vector<32x128xf32>
    %72 = arith.negf %71 : vector<32x128xf32>
    %73 = math.exp %72 : vector<32x128xf32>
    %cst_18 = arith.constant 1.000000e+00 : f32
    %74 = vector.broadcast %cst_18 : f32 to vector<32x128xf32>
    %75 = arith.addf %74, %73 : vector<32x128xf32>
    %76 = arith.divf %74, %75 : vector<32x128xf32>
    %77 = vector.extract_strided_slice %56 {offsets = [64, 0], sizes = [32, 128], strides = [1, 1]} : vector<96x128xf32> to vector<32x128xf32>
    %78 = vector.extract_strided_slice %60 {offsets = [64, 0], sizes = [32, 128], strides = [1, 1]} : vector<96x128xf32> to vector<32x128xf32>
    %79 = arith.mulf %68, %78 : vector<32x128xf32>
    %80 = arith.addf %77, %79 : vector<32x128xf32>
    %81 = math.tanh %80 : vector<32x128xf32>
    %cst_19 = arith.constant 1.000000e+00 : f32
    %82 = vector.broadcast %cst_19 : f32 to vector<32x128xf32>
    %83 = arith.subf %82, %76 : vector<32x128xf32>
    %84 = arith.mulf %83, %81 : vector<32x128xf32>
    %85 = arith.mulf %76, %50 : vector<32x128xf32>
    %86 = arith.addf %84, %85 : vector<32x128xf32>
    %87 = vector.extract_strided_slice %8 {offsets = [2, 0], sizes = [1, 128], strides = [1, 1]} : vector<8x128xf32> to vector<1x128xf32>
    %88 = vector.broadcast %11 : vector<96x1xf32> to vector<96x128xf32>
    %89 = vector.broadcast %87 : vector<1x128xf32> to vector<96x128xf32>
    %90 = arith.mulf %88, %89 : vector<96x128xf32>
    %91 = vector.broadcast %12 : vector<96x1xf32> to vector<96x128xf32>
    %92 = arith.addf %90, %91 : vector<96x128xf32>
    %93 = arith.truncf %86 : vector<32x128xf32> to vector<32x128xbf16>
    %cst_20 = arith.constant dense<0.000000e+00> : vector<96x128xf32>
    %94 = tpu.matmul %9, %93, %cst_20 {dimension_numbers = #tpu.dot_dimension_numbers<[1], [0], [0], [1], [0, 0, 1, 1], [], []>} : vector<96x32xbf16>, vector<32x128xbf16>, vector<96x128xf32> -> vector<96x128xf32>
    %95 = vector.broadcast %13 : vector<96x1xf32> to vector<96x128xf32>
    %96 = arith.addf %94, %95 : vector<96x128xf32>
    %97 = vector.extract_strided_slice %92 {offsets = [0, 0], sizes = [32, 128], strides = [1, 1]} : vector<96x128xf32> to vector<32x128xf32>
    %98 = vector.extract_strided_slice %96 {offsets = [0, 0], sizes = [32, 128], strides = [1, 1]} : vector<96x128xf32> to vector<32x128xf32>
    %99 = arith.addf %97, %98 : vector<32x128xf32>
    %100 = arith.negf %99 : vector<32x128xf32>
    %101 = math.exp %100 : vector<32x128xf32>
    %cst_21 = arith.constant 1.000000e+00 : f32
    %102 = vector.broadcast %cst_21 : f32 to vector<32x128xf32>
    %103 = arith.addf %102, %101 : vector<32x128xf32>
    %104 = arith.divf %102, %103 : vector<32x128xf32>
    %105 = vector.extract_strided_slice %92 {offsets = [32, 0], sizes = [32, 128], strides = [1, 1]} : vector<96x128xf32> to vector<32x128xf32>
    %106 = vector.extract_strided_slice %96 {offsets = [32, 0], sizes = [32, 128], strides = [1, 1]} : vector<96x128xf32> to vector<32x128xf32>
    %107 = arith.addf %105, %106 : vector<32x128xf32>
    %108 = arith.negf %107 : vector<32x128xf32>
    %109 = math.exp %108 : vector<32x128xf32>
    %cst_22 = arith.constant 1.000000e+00 : f32
    %110 = vector.broadcast %cst_22 : f32 to vector<32x128xf32>
    %111 = arith.addf %110, %109 : vector<32x128xf32>
    %112 = arith.divf %110, %111 : vector<32x128xf32>
    %113 = vector.extract_strided_slice %92 {offsets = [64, 0], sizes = [32, 128], strides = [1, 1]} : vector<96x128xf32> to vector<32x128xf32>
    %114 = vector.extract_strided_slice %96 {offsets = [64, 0], sizes = [32, 128], strides = [1, 1]} : vector<96x128xf32> to vector<32x128xf32>
    %115 = arith.mulf %104, %114 : vector<32x128xf32>
    %116 = arith.addf %113, %115 : vector<32x128xf32>
    %117 = math.tanh %116 : vector<32x128xf32>
    %cst_23 = arith.constant 1.000000e+00 : f32
    %118 = vector.broadcast %cst_23 : f32 to vector<32x128xf32>
    %119 = arith.subf %118, %112 : vector<32x128xf32>
    %120 = arith.mulf %119, %117 : vector<32x128xf32>
    %121 = arith.mulf %112, %86 : vector<32x128xf32>
    %122 = arith.addf %120, %121 : vector<32x128xf32>
    %123 = vector.extract_strided_slice %8 {offsets = [3, 0], sizes = [1, 128], strides = [1, 1]} : vector<8x128xf32> to vector<1x128xf32>
    %124 = vector.broadcast %11 : vector<96x1xf32> to vector<96x128xf32>
    %125 = vector.broadcast %123 : vector<1x128xf32> to vector<96x128xf32>
    %126 = arith.mulf %124, %125 : vector<96x128xf32>
    %127 = vector.broadcast %12 : vector<96x1xf32> to vector<96x128xf32>
    %128 = arith.addf %126, %127 : vector<96x128xf32>
    %129 = arith.truncf %122 : vector<32x128xf32> to vector<32x128xbf16>
    %cst_24 = arith.constant dense<0.000000e+00> : vector<96x128xf32>
    %130 = tpu.matmul %9, %129, %cst_24 {dimension_numbers = #tpu.dot_dimension_numbers<[1], [0], [0], [1], [0, 0, 1, 1], [], []>} : vector<96x32xbf16>, vector<32x128xbf16>, vector<96x128xf32> -> vector<96x128xf32>
    %131 = vector.broadcast %13 : vector<96x1xf32> to vector<96x128xf32>
    %132 = arith.addf %130, %131 : vector<96x128xf32>
    %133 = vector.extract_strided_slice %128 {offsets = [0, 0], sizes = [32, 128], strides = [1, 1]} : vector<96x128xf32> to vector<32x128xf32>
    %134 = vector.extract_strided_slice %132 {offsets = [0, 0], sizes = [32, 128], strides = [1, 1]} : vector<96x128xf32> to vector<32x128xf32>
    %135 = arith.addf %133, %134 : vector<32x128xf32>
    %136 = arith.negf %135 : vector<32x128xf32>
    %137 = math.exp %136 : vector<32x128xf32>
    %cst_25 = arith.constant 1.000000e+00 : f32
    %138 = vector.broadcast %cst_25 : f32 to vector<32x128xf32>
    %139 = arith.addf %138, %137 : vector<32x128xf32>
    %140 = arith.divf %138, %139 : vector<32x128xf32>
    %141 = vector.extract_strided_slice %128 {offsets = [32, 0], sizes = [32, 128], strides = [1, 1]} : vector<96x128xf32> to vector<32x128xf32>
    %142 = vector.extract_strided_slice %132 {offsets = [32, 0], sizes = [32, 128], strides = [1, 1]} : vector<96x128xf32> to vector<32x128xf32>
    %143 = arith.addf %141, %142 : vector<32x128xf32>
    %144 = arith.negf %143 : vector<32x128xf32>
    %145 = math.exp %144 : vector<32x128xf32>
    %cst_26 = arith.constant 1.000000e+00 : f32
    %146 = vector.broadcast %cst_26 : f32 to vector<32x128xf32>
    %147 = arith.addf %146, %145 : vector<32x128xf32>
    %148 = arith.divf %146, %147 : vector<32x128xf32>
    %149 = vector.extract_strided_slice %128 {offsets = [64, 0], sizes = [32, 128], strides = [1, 1]} : vector<96x128xf32> to vector<32x128xf32>
    %150 = vector.extract_strided_slice %132 {offsets = [64, 0], sizes = [32, 128], strides = [1, 1]} : vector<96x128xf32> to vector<32x128xf32>
    %151 = arith.mulf %140, %150 : vector<32x128xf32>
    %152 = arith.addf %149, %151 : vector<32x128xf32>
    %153 = math.tanh %152 : vector<32x128xf32>
    %cst_27 = arith.constant 1.000000e+00 : f32
    %154 = vector.broadcast %cst_27 : f32 to vector<32x128xf32>
    %155 = arith.subf %154, %148 : vector<32x128xf32>
    %156 = arith.mulf %155, %153 : vector<32x128xf32>
    %157 = arith.mulf %148, %122 : vector<32x128xf32>
    %158 = arith.addf %156, %157 : vector<32x128xf32>
    %159 = vector.extract_strided_slice %8 {offsets = [4, 0], sizes = [1, 128], strides = [1, 1]} : vector<8x128xf32> to vector<1x128xf32>
    %160 = vector.broadcast %11 : vector<96x1xf32> to vector<96x128xf32>
    %161 = vector.broadcast %159 : vector<1x128xf32> to vector<96x128xf32>
    %162 = arith.mulf %160, %161 : vector<96x128xf32>
    %163 = vector.broadcast %12 : vector<96x1xf32> to vector<96x128xf32>
    %164 = arith.addf %162, %163 : vector<96x128xf32>
    %165 = arith.truncf %158 : vector<32x128xf32> to vector<32x128xbf16>
    %cst_28 = arith.constant dense<0.000000e+00> : vector<96x128xf32>
    %166 = tpu.matmul %9, %165, %cst_28 {dimension_numbers = #tpu.dot_dimension_numbers<[1], [0], [0], [1], [0, 0, 1, 1], [], []>} : vector<96x32xbf16>, vector<32x128xbf16>, vector<96x128xf32> -> vector<96x128xf32>
    %167 = vector.broadcast %13 : vector<96x1xf32> to vector<96x128xf32>
    %168 = arith.addf %166, %167 : vector<96x128xf32>
    %169 = vector.extract_strided_slice %164 {offsets = [0, 0], sizes = [32, 128], strides = [1, 1]} : vector<96x128xf32> to vector<32x128xf32>
    %170 = vector.extract_strided_slice %168 {offsets = [0, 0], sizes = [32, 128], strides = [1, 1]} : vector<96x128xf32> to vector<32x128xf32>
    %171 = arith.addf %169, %170 : vector<32x128xf32>
    %172 = arith.negf %171 : vector<32x128xf32>
    %173 = math.exp %172 : vector<32x128xf32>
    %cst_29 = arith.constant 1.000000e+00 : f32
    %174 = vector.broadcast %cst_29 : f32 to vector<32x128xf32>
    %175 = arith.addf %174, %173 : vector<32x128xf32>
    %176 = arith.divf %174, %175 : vector<32x128xf32>
    %177 = vector.extract_strided_slice %164 {offsets = [32, 0], sizes = [32, 128], strides = [1, 1]} : vector<96x128xf32> to vector<32x128xf32>
    %178 = vector.extract_strided_slice %168 {offsets = [32, 0], sizes = [32, 128], strides = [1, 1]} : vector<96x128xf32> to vector<32x128xf32>
    %179 = arith.addf %177, %178 : vector<32x128xf32>
    %180 = arith.negf %179 : vector<32x128xf32>
    %181 = math.exp %180 : vector<32x128xf32>
    %cst_30 = arith.constant 1.000000e+00 : f32
    %182 = vector.broadcast %cst_30 : f32 to vector<32x128xf32>
    %183 = arith.addf %182, %181 : vector<32x128xf32>
    %184 = arith.divf %182, %183 : vector<32x128xf32>
    %185 = vector.extract_strided_slice %164 {offsets = [64, 0], sizes = [32, 128], strides = [1, 1]} : vector<96x128xf32> to vector<32x128xf32>
    %186 = vector.extract_strided_slice %168 {offsets = [64, 0], sizes = [32, 128], strides = [1, 1]} : vector<96x128xf32> to vector<32x128xf32>
    %187 = arith.mulf %176, %186 : vector<32x128xf32>
    %188 = arith.addf %185, %187 : vector<32x128xf32>
    %189 = math.tanh %188 : vector<32x128xf32>
    %cst_31 = arith.constant 1.000000e+00 : f32
    %190 = vector.broadcast %cst_31 : f32 to vector<32x128xf32>
    %191 = arith.subf %190, %184 : vector<32x128xf32>
    %192 = arith.mulf %191, %189 : vector<32x128xf32>
    %193 = arith.mulf %184, %158 : vector<32x128xf32>
    %194 = arith.addf %192, %193 : vector<32x128xf32>
    %195 = vector.extract_strided_slice %8 {offsets = [5, 0], sizes = [1, 128], strides = [1, 1]} : vector<8x128xf32> to vector<1x128xf32>
    %196 = vector.broadcast %11 : vector<96x1xf32> to vector<96x128xf32>
    %197 = vector.broadcast %195 : vector<1x128xf32> to vector<96x128xf32>
    %198 = arith.mulf %196, %197 : vector<96x128xf32>
    %199 = vector.broadcast %12 : vector<96x1xf32> to vector<96x128xf32>
    %200 = arith.addf %198, %199 : vector<96x128xf32>
    %201 = arith.truncf %194 : vector<32x128xf32> to vector<32x128xbf16>
    %cst_32 = arith.constant dense<0.000000e+00> : vector<96x128xf32>
    %202 = tpu.matmul %9, %201, %cst_32 {dimension_numbers = #tpu.dot_dimension_numbers<[1], [0], [0], [1], [0, 0, 1, 1], [], []>} : vector<96x32xbf16>, vector<32x128xbf16>, vector<96x128xf32> -> vector<96x128xf32>
    %203 = vector.broadcast %13 : vector<96x1xf32> to vector<96x128xf32>
    %204 = arith.addf %202, %203 : vector<96x128xf32>
    %205 = vector.extract_strided_slice %200 {offsets = [0, 0], sizes = [32, 128], strides = [1, 1]} : vector<96x128xf32> to vector<32x128xf32>
    %206 = vector.extract_strided_slice %204 {offsets = [0, 0], sizes = [32, 128], strides = [1, 1]} : vector<96x128xf32> to vector<32x128xf32>
    %207 = arith.addf %205, %206 : vector<32x128xf32>
    %208 = arith.negf %207 : vector<32x128xf32>
    %209 = math.exp %208 : vector<32x128xf32>
    %cst_33 = arith.constant 1.000000e+00 : f32
    %210 = vector.broadcast %cst_33 : f32 to vector<32x128xf32>
    %211 = arith.addf %210, %209 : vector<32x128xf32>
    %212 = arith.divf %210, %211 : vector<32x128xf32>
    %213 = vector.extract_strided_slice %200 {offsets = [32, 0], sizes = [32, 128], strides = [1, 1]} : vector<96x128xf32> to vector<32x128xf32>
    %214 = vector.extract_strided_slice %204 {offsets = [32, 0], sizes = [32, 128], strides = [1, 1]} : vector<96x128xf32> to vector<32x128xf32>
    %215 = arith.addf %213, %214 : vector<32x128xf32>
    %216 = arith.negf %215 : vector<32x128xf32>
    %217 = math.exp %216 : vector<32x128xf32>
    %cst_34 = arith.constant 1.000000e+00 : f32
    %218 = vector.broadcast %cst_34 : f32 to vector<32x128xf32>
    %219 = arith.addf %218, %217 : vector<32x128xf32>
    %220 = arith.divf %218, %219 : vector<32x128xf32>
    %221 = vector.extract_strided_slice %200 {offsets = [64, 0], sizes = [32, 128], strides = [1, 1]} : vector<96x128xf32> to vector<32x128xf32>
    %222 = vector.extract_strided_slice %204 {offsets = [64, 0], sizes = [32, 128], strides = [1, 1]} : vector<96x128xf32> to vector<32x128xf32>
    %223 = arith.mulf %212, %222 : vector<32x128xf32>
    %224 = arith.addf %221, %223 : vector<32x128xf32>
    %225 = math.tanh %224 : vector<32x128xf32>
    %cst_35 = arith.constant 1.000000e+00 : f32
    %226 = vector.broadcast %cst_35 : f32 to vector<32x128xf32>
    %227 = arith.subf %226, %220 : vector<32x128xf32>
    %228 = arith.mulf %227, %225 : vector<32x128xf32>
    %229 = arith.mulf %220, %194 : vector<32x128xf32>
    %230 = arith.addf %228, %229 : vector<32x128xf32>
    %231 = vector.extract_strided_slice %8 {offsets = [6, 0], sizes = [1, 128], strides = [1, 1]} : vector<8x128xf32> to vector<1x128xf32>
    %232 = vector.broadcast %11 : vector<96x1xf32> to vector<96x128xf32>
    %233 = vector.broadcast %231 : vector<1x128xf32> to vector<96x128xf32>
    %234 = arith.mulf %232, %233 : vector<96x128xf32>
    %235 = vector.broadcast %12 : vector<96x1xf32> to vector<96x128xf32>
    %236 = arith.addf %234, %235 : vector<96x128xf32>
    %237 = arith.truncf %230 : vector<32x128xf32> to vector<32x128xbf16>
    %cst_36 = arith.constant dense<0.000000e+00> : vector<96x128xf32>
    %238 = tpu.matmul %9, %237, %cst_36 {dimension_numbers = #tpu.dot_dimension_numbers<[1], [0], [0], [1], [0, 0, 1, 1], [], []>} : vector<96x32xbf16>, vector<32x128xbf16>, vector<96x128xf32> -> vector<96x128xf32>
    %239 = vector.broadcast %13 : vector<96x1xf32> to vector<96x128xf32>
    %240 = arith.addf %238, %239 : vector<96x128xf32>
    %241 = vector.extract_strided_slice %236 {offsets = [0, 0], sizes = [32, 128], strides = [1, 1]} : vector<96x128xf32> to vector<32x128xf32>
    %242 = vector.extract_strided_slice %240 {offsets = [0, 0], sizes = [32, 128], strides = [1, 1]} : vector<96x128xf32> to vector<32x128xf32>
    %243 = arith.addf %241, %242 : vector<32x128xf32>
    %244 = arith.negf %243 : vector<32x128xf32>
    %245 = math.exp %244 : vector<32x128xf32>
    %cst_37 = arith.constant 1.000000e+00 : f32
    %246 = vector.broadcast %cst_37 : f32 to vector<32x128xf32>
    %247 = arith.addf %246, %245 : vector<32x128xf32>
    %248 = arith.divf %246, %247 : vector<32x128xf32>
    %249 = vector.extract_strided_slice %236 {offsets = [32, 0], sizes = [32, 128], strides = [1, 1]} : vector<96x128xf32> to vector<32x128xf32>
    %250 = vector.extract_strided_slice %240 {offsets = [32, 0], sizes = [32, 128], strides = [1, 1]} : vector<96x128xf32> to vector<32x128xf32>
    %251 = arith.addf %249, %250 : vector<32x128xf32>
    %252 = arith.negf %251 : vector<32x128xf32>
    %253 = math.exp %252 : vector<32x128xf32>
    %cst_38 = arith.constant 1.000000e+00 : f32
    %254 = vector.broadcast %cst_38 : f32 to vector<32x128xf32>
    %255 = arith.addf %254, %253 : vector<32x128xf32>
    %256 = arith.divf %254, %255 : vector<32x128xf32>
    %257 = vector.extract_strided_slice %236 {offsets = [64, 0], sizes = [32, 128], strides = [1, 1]} : vector<96x128xf32> to vector<32x128xf32>
    %258 = vector.extract_strided_slice %240 {offsets = [64, 0], sizes = [32, 128], strides = [1, 1]} : vector<96x128xf32> to vector<32x128xf32>
    %259 = arith.mulf %248, %258 : vector<32x128xf32>
    %260 = arith.addf %257, %259 : vector<32x128xf32>
    %261 = math.tanh %260 : vector<32x128xf32>
    %cst_39 = arith.constant 1.000000e+00 : f32
    %262 = vector.broadcast %cst_39 : f32 to vector<32x128xf32>
    %263 = arith.subf %262, %256 : vector<32x128xf32>
    %264 = arith.mulf %263, %261 : vector<32x128xf32>
    %265 = arith.mulf %256, %230 : vector<32x128xf32>
    %266 = arith.addf %264, %265 : vector<32x128xf32>
    %267 = vector.extract_strided_slice %8 {offsets = [7, 0], sizes = [1, 128], strides = [1, 1]} : vector<8x128xf32> to vector<1x128xf32>
    %268 = vector.broadcast %11 : vector<96x1xf32> to vector<96x128xf32>
    %269 = vector.broadcast %267 : vector<1x128xf32> to vector<96x128xf32>
    %270 = arith.mulf %268, %269 : vector<96x128xf32>
    %271 = vector.broadcast %12 : vector<96x1xf32> to vector<96x128xf32>
    %272 = arith.addf %270, %271 : vector<96x128xf32>
    %273 = arith.truncf %266 : vector<32x128xf32> to vector<32x128xbf16>
    %cst_40 = arith.constant dense<0.000000e+00> : vector<96x128xf32>
    %274 = tpu.matmul %9, %273, %cst_40 {dimension_numbers = #tpu.dot_dimension_numbers<[1], [0], [0], [1], [0, 0, 1, 1], [], []>} : vector<96x32xbf16>, vector<32x128xbf16>, vector<96x128xf32> -> vector<96x128xf32>
    %275 = vector.broadcast %13 : vector<96x1xf32> to vector<96x128xf32>
    %276 = arith.addf %274, %275 : vector<96x128xf32>
    %277 = vector.extract_strided_slice %272 {offsets = [0, 0], sizes = [32, 128], strides = [1, 1]} : vector<96x128xf32> to vector<32x128xf32>
    %278 = vector.extract_strided_slice %276 {offsets = [0, 0], sizes = [32, 128], strides = [1, 1]} : vector<96x128xf32> to vector<32x128xf32>
    %279 = arith.addf %277, %278 : vector<32x128xf32>
    %280 = arith.negf %279 : vector<32x128xf32>
    %281 = math.exp %280 : vector<32x128xf32>
    %cst_41 = arith.constant 1.000000e+00 : f32
    %282 = vector.broadcast %cst_41 : f32 to vector<32x128xf32>
    %283 = arith.addf %282, %281 : vector<32x128xf32>
    %284 = arith.divf %282, %283 : vector<32x128xf32>
    %285 = vector.extract_strided_slice %272 {offsets = [32, 0], sizes = [32, 128], strides = [1, 1]} : vector<96x128xf32> to vector<32x128xf32>
    %286 = vector.extract_strided_slice %276 {offsets = [32, 0], sizes = [32, 128], strides = [1, 1]} : vector<96x128xf32> to vector<32x128xf32>
    %287 = arith.addf %285, %286 : vector<32x128xf32>
    %288 = arith.negf %287 : vector<32x128xf32>
    %289 = math.exp %288 : vector<32x128xf32>
    %cst_42 = arith.constant 1.000000e+00 : f32
    %290 = vector.broadcast %cst_42 : f32 to vector<32x128xf32>
    %291 = arith.addf %290, %289 : vector<32x128xf32>
    %292 = arith.divf %290, %291 : vector<32x128xf32>
    %293 = vector.extract_strided_slice %272 {offsets = [64, 0], sizes = [32, 128], strides = [1, 1]} : vector<96x128xf32> to vector<32x128xf32>
    %294 = vector.extract_strided_slice %276 {offsets = [64, 0], sizes = [32, 128], strides = [1, 1]} : vector<96x128xf32> to vector<32x128xf32>
    %295 = arith.mulf %284, %294 : vector<32x128xf32>
    %296 = arith.addf %293, %295 : vector<32x128xf32>
    %297 = math.tanh %296 : vector<32x128xf32>
    %cst_43 = arith.constant 1.000000e+00 : f32
    %298 = vector.broadcast %cst_43 : f32 to vector<32x128xf32>
    %299 = arith.subf %298, %292 : vector<32x128xf32>
    %300 = arith.mulf %299, %297 : vector<32x128xf32>
    %301 = arith.mulf %292, %266 : vector<32x128xf32>
    %302 = arith.addf %300, %301 : vector<32x128xf32>
    %303 = tpu.concatenate %302, %8 in 0 : vector<32x128xf32>, vector<8x128xf32> -> vector<40x128xf32>
    %c0_44 = arith.constant 0 : index
    %c0_45 = arith.constant 0 : index
    %304 = vector.load %arg7[%c0_44, %c0_45] : memref<4x40xf32, #tpu.memory_space<vmem>>, vector<4x40xf32>
    %cst_46 = arith.constant dense<0.000000e+00> : vector<4x128xf32>
    %305 = tpu.matmul %304, %303, %cst_46 {dimension_numbers = #tpu.dot_dimension_numbers<[1], [0], [0], [1], [0, 0, 1, 1], [], []>} : vector<4x40xf32>, vector<40x128xf32>, vector<4x128xf32> -> vector<4x128xf32>
    %c0_47 = arith.constant 0 : index
    %c0_48 = arith.constant 0 : index
    %306 = vector.load %arg8[%c0_47, %c0_48] : memref<4x1xf32, #tpu.memory_space<vmem>>, vector<4x1xf32>
    %307 = vector.broadcast %306 : vector<4x1xf32> to vector<4x128xf32>
    %308 = arith.addf %305, %307 : vector<4x128xf32>
    %309 = vector.extract_strided_slice %6 {offsets = [8, 0], sizes = [4, 128], strides = [1, 1]} : vector<12x128xf32> to vector<4x128xf32>
    %310 = arith.addf %308, %309 : vector<4x128xf32>
    %c0_49 = arith.constant 0 : index
    %c0_50 = arith.constant 0 : index
    %311 = vector.load %arg9[%c0_49, %c0_50] : memref<4x128xf32, #tpu.memory_space<vmem>>, vector<4x128xf32>
    tpu.vector_store %arg9[%c0_49, %c0_50], %310 {strides = array<i32>} : memref<4x128xf32, #tpu.memory_space<vmem>>, vector<4x128xf32>,
    return
  }
  func.func @transform_0(%arg0: i32) -> (i32, i32) {
    %c0_i32 = arith.constant 0 : i32
    %c0_i32_0 = arith.constant 0 : i32
    return %c0_i32, %arg0 : i32, i32
  }
  func.func @transform_1(%arg0: i32) -> (i32, i32) {
    %c0_i32 = arith.constant 0 : i32
    %c0_i32_0 = arith.constant 0 : i32
    return %c0_i32, %arg0 : i32, i32
  }
  func.func @transform_2(%arg0: i32) -> (i32, i32) {
    %c0_i32 = arith.constant 0 : i32
    %c0_i32_0 = arith.constant 0 : i32
    %c0_i32_1 = arith.constant 0 : i32
    return %c0_i32, %c0_i32_0 : i32, i32
  }
  func.func @transform_3(%arg0: i32) -> (i32, i32) {
    %c0_i32 = arith.constant 0 : i32
    %c0_i32_0 = arith.constant 0 : i32
    %c0_i32_1 = arith.constant 0 : i32
    return %c0_i32, %c0_i32_0 : i32, i32
  }
  func.func @transform_4(%arg0: i32) -> (i32, i32) {
    %c0_i32 = arith.constant 0 : i32
    %c0_i32_0 = arith.constant 0 : i32
    %c0_i32_1 = arith.constant 0 : i32
    return %c0_i32, %c0_i32_0 : i32, i32
  }
  func.func @transform_5(%arg0: i32) -> (i32, i32) {
    %c0_i32 = arith.constant 0 : i32
    %c0_i32_0 = arith.constant 0 : i32
    %c0_i32_1 = arith.constant 0 : i32
    return %c0_i32, %c0_i32_0 : i32, i32
  }
  func.func @transform_6(%arg0: i32) -> (i32, i32) {
    %c0_i32 = arith.constant 0 : i32
    %c0_i32_0 = arith.constant 0 : i32
    %c0_i32_1 = arith.constant 0 : i32
    return %c0_i32, %c0_i32_0 : i32, i32
  }
  func.func @transform_7(%arg0: i32) -> (i32, i32) {
    %c0_i32 = arith.constant 0 : i32
    %c0_i32_0 = arith.constant 0 : i32
    %c0_i32_1 = arith.constant 0 : i32
    return %c0_i32, %c0_i32_0 : i32, i32
  }
  func.func @transform_8(%arg0: i32) -> (i32, i32) {
    %c0_i32 = arith.constant 0 : i32
    %c0_i32_0 = arith.constant 0 : i32
    return %c0_i32, %arg0 : i32, i32
  }
}

</mosaic_0001>

<bundles_post_ra>
// kernel: ideanet_forward.1
= control target key start
LH: loop header
LB: loop body
LE: loop exit
PB: predicated region body
PF: predicated region fallthrough
CT: control target
= control target key end

     0   :  { %v2895_v0 = vmov 2   ;;  %v2896_v1 = vmov 1   ;;  %vm54_vm0 = vcmask 1043456   ;;  %v2897_v5 = vmov 0   ;;  %s5147_s5 = inlined_call_operand.vmem [shape: f32[96,3], index: 5, kind: input, shape index: {}]   ;;  %s5148_s4 = inlined_call_operand.vmem [shape: bf16[96,32], index: 4, kind: input, shape index: {}]   ;;  %s5149_s1 = inlined_call_operand.vmem [shape: f32[12,128], index: 1, kind: input, shape index: {}]   ;;  %s5150_s2 = inlined_call_operand.vmem [shape: f32[12,12], index: 2, kind: input, shape index: {}]   ;;  %s5151_s3 = inlined_call_operand.vmem [shape: f32[12,1], index: 3, kind: input, shape index: {}]   ;;  %s5152_s0 = inlined_call_operand.vmem [shape: f32[8,128], index: 0, kind: input, shape index: {}]   ;;  %s5153_s7 = inlined_call_operand.vmem [shape: f32[4,1], index: 7, kind: input, shape index: {}]   ;;  %s5154_s6 = inlined_call_operand.vmem [shape: f32[4,40], index: 6, kind: input, shape index: {}]   ;;  %s5155_s8 = inlined_call_operand.vmem [shape: f32[4,128], index: 8, kind: output, shape index: {}]  }
   0x1   :  { %2533 = vset.pattern.permute.xlu0 %v2895_v0  ;;  %2531 = vset.pattern.permute.xlu2 %v2896_v1  ;;  %v97_v2 = vld [vmem:[%s5147_s5 + $0x18] sm:$0xff]  ;;  %v2951_v3 = vld [vmem:[%s5148_s4] sm:$0xff]  ;;  %v32_v4 = vld [vmem:[%s5149_s1 + $0x8] sm:$0xf]  ;;  %vm317_vm1 = vcmask 261120   ;;  %vm47_vm2 = vcmask 97280  }
   0x2   :  { %2529 = vset.pattern.permute.xlu1 %v2897_v5  ;;  %343 = vmatpush.bf16.msra.mxu1 %v2897_v5  ;;  %v31_v6 = vld [vmem:[%s5149_s1] sm:$0xff]  ;;  %v96_v9 = vld [vmem:[%s5147_s5 + $0x10] sm:$0xff]  ;;  %v95_v11 = vld [vmem:[%s5147_s5 + $0x8] sm:$0xff] }
   0x3   :  { %252 = vperm.xlu0 %2533, %v97_v2   ;;  %192 = vperm.xlu2 %2531, %v97_v2   ;;  %v33_v7 = vld [vmem:[%s5150_s2] sm:$0xff]  ;;  %v2984_v12 = vld [vmem:[%s5148_s4 + $0x8] sm:$0xff]  ;;  %v101_v13 = vld [vmem:[%s5147_s5 + $0x38] sm:$0xff] }
   0x4   :  { %123 = vperm.xlu1 %2529, %v97_v2   ;;  %2378 = vmatpush.msk.msra.mxu0 %vm54_vm0, %v32_v4  ;;  %v94_v8 = vld [vmem:[%s5147_s5] sm:$0xff]  ;;  %v2999_v14 = vld [vmem:[%s5148_s4 + $0x10] sm:$0xff]  ;;  %v3016_v17 = vld [vmem:[%s5148_s4 + $0x18] sm:$0xff] }
   0x5   :  { %2405 = vmatmul.msk.bf16.vlgmr.msra.gmra.mxu1 %vm317_vm1, %v2951_v3  ;;  %2524 = vmatpush.msk.msra.mxu2 %vm54_vm0, %v32_v4  ;;  %v35_v10 = vld [vmem:[%s5151_s3] sm:$0xff]  ;;  %v100_v15 = vld [vmem:[%s5147_s5 + $0x30] sm:$0xff]  ;;  %v99_v18 = vld [vmem:[%s5147_s5 + $0x28] sm:$0xff] }
   0x6   :  { %73 = vmatpush.msra.mxu0 %v31_v6  ;;  %v98_v16 = vld [vmem:[%s5147_s5 + $0x20] sm:$0xff]  ;;  %v104_v19 = vld [vmem:[%s5147_s5 + $0x50] sm:$0xff]  ;;  %v103_v21 = vld [vmem:[%s5147_s5 + $0x48] sm:$0xff] }
   0x7   :  { %2379 = vmatmul.msk.f32.vlgmr.msra.gmra.mxu0 %vm47_vm2, %v33_v7  ;;  %2525 = vmatpush.msra.mxu2 %v31_v6  ;;  %v3035_v20 = vld [vmem:[%s5148_s4 + $0x20] sm:$0xff]  ;;  %v34_v22 = vld [vmem:[%s5150_s2 + $0x8] sm:$0xf]  ;;  %v105_v23 = vld [vmem:[%s5147_s5 + $0x58] sm:$0xff] }
   0x8   :  { %2380 = vmatmul.msk.f32.vlgmr.msra.gmra.mxu2 %vm47_vm2, %v34_v22  ;;  %v3055_v24 = vld [vmem:[%s5148_s4 + $0x28] sm:$0xff]  ;;  %v102_v27 = vld [vmem:[%s5147_s5 + $0x40] sm:$0xff] }
   0x9   :  { %v36_v25 = vld [vmem:[%s5151_s3 + $0x8] sm:$0xf]  ;;  %v30_v39 = vld [vmem:[%s5152_s0] sm:$0xff] }
   0xb   :  { %2532 = vset.pattern.permute.xlu2 %v2895_v0  ;;  %240 = vperm.xlu0 %2533, %v94_v8  }
   0xc   :  { %2530 = vset.pattern.permute.xlu1 %v2896_v1  ;;  %248 = vperm.xlu2 %2532, %v96_v9  }
   0xd   :  { %188 = vperm.xlu1 %2530, %v96_v9  }
  0x13   :  { %2538 = vset.pattern.permute.xlu0 %v2897_v5 }
  0x14   :  { %2535 = vset.pattern.permute.xlu2 %v2897_v5  ;;  %39 = vperm.xlu0 %2538, %v35_v10  }
  0x15   :  { %2534 = vset.pattern.permute.xlu1 %v2897_v5  ;;  %113 = vperm.xlu2 %2535, %v95_v11  }
  0x16   :  { %108 = vperm.xlu1 %2534, %v94_v8   ;;  %2406 = vmatmul.msk.bf16.gmra.mxu1 %vm317_vm1, %v2984_v12 }
  0x1c   :  { %118 = vperm.xlu0 %2538, %v96_v9  }
  0x1d   :  { %2537 = vset.pattern.permute.xlu2 %v2896_v1 }
  0x1e   :  { %2536 = vset.pattern.permute.xlu1 %v2896_v1  ;;  %184 = vperm.xlu2 %2537, %v95_v11  }
  0x1f   :  { %180 = vperm.xlu1 %2536, %v94_v8  }
  0x24   :  { %143 = vperm.xlu0 %2538, %v101_v13  }
  0x26   :  { %2407 = vmatmul.msk.bf16.gmra.mxu1 %vm317_vm1, %v2999_v14  ;;  %2540 = vset.pattern.permute.xlu2 %v2897_v5 }
  0x27   :  { %2539 = vset.pattern.permute.xlu1 %v2895_v0  ;;  %138 = vperm.xlu2 %2540, %v100_v15  }
  0x28   :  { %244 = vperm.xlu1 %2539, %v95_v11  }
  0x2c   :  { %128 = vperm.xlu0 %2538, %v98_v16  }
  0x2f   :  { %2542 = vset.pattern.permute.xlu2 %v2896_v1 }
  0x30   :  { %2541 = vset.pattern.permute.xlu1 %v2896_v1  ;;  %208 = vperm.xlu2 %2542, %v101_v13  }
  0x31   :  { %204 = vperm.xlu1 %2541, %v100_v15  }
  0x34   :  { %2547 = vset.pattern.permute.xlu0 %v2896_v1 }
  0x35   :  { %200 = vperm.xlu0 %2547, %v99_v18  }
  0x36   :  { %2408 = vmatmul.msk.bf16.gmra.mxu1 %vm317_vm1, %v3016_v17 }
  0x38   :  { %2544 = vset.pattern.permute.xlu2 %v2895_v0 }
  0x39   :  { %2543 = vset.pattern.permute.xlu1 %v2895_v0  ;;  %268 = vperm.xlu2 %2544, %v101_v13  }
  0x3a   :  { %264 = vperm.xlu1 %2543, %v100_v15  }
  0x3d   :  { %2552 = vset.pattern.permute.xlu0 %v2895_v0 }
  0x3e   :  { %280 = vperm.xlu0 %2552, %v104_v19  }
  0x41   :  { %2546 = vset.pattern.permute.xlu2 %v2896_v1 }
  0x42   :  { %2545 = vset.pattern.permute.xlu1 %v2897_v5  ;;  %196 = vperm.xlu2 %2546, %v98_v16  }
  0x43   :  { %133 = vperm.xlu1 %2545, %v99_v18  }
  0x46   :  { %2409 = vmatmul.msk.bf16.gmra.mxu1 %vm317_vm1, %v3035_v20  ;;  %2557 = vset.pattern.permute.xlu0 %v2897_v5 }
  0x47   :  { %153 = vperm.xlu0 %2557, %v103_v21  }
  0x4a   :  { %2549 = vset.pattern.permute.xlu2 %v2895_v0 }
  0x4b   :  { %2548 = vset.pattern.permute.xlu1 %v2895_v0  ;;  %260 = vperm.xlu2 %2549, %v99_v18  }
  0x4c   :  { %256 = vperm.xlu1 %2548, %v98_v16  }
  0x4f   :  { %44 = vperm.xlu0 %2557, %v36_v25  }
  0x53   :  { %2551 = vset.pattern.permute.xlu2 %v2897_v5 }
  0x54   :  { %2550 = vset.pattern.permute.xlu1 %v2897_v5  ;;  %163 = vperm.xlu2 %2551, %v105_v23  }
  0x55   :  { %158 = vperm.xlu1 %2550, %v104_v19  }
  0x56   :  { %2410 = vmatmul.msk.bf16.gmra.mxu1 %vm317_vm1, %v3055_v24 }
  0x5c   :  { %2554 = vset.pattern.permute.xlu2 %v2896_v1 }
  0x5d   :  { %2553 = vset.pattern.permute.xlu1 %v2895_v0  ;;  %220 = vperm.xlu2 %2554, %v104_v19   ;;  %v3066_v26 = vpop.permute.xlu2 %192 }
  0x5e   :  { %5206 = vst [vmem:[#allocation2_spill] sm:$0xff] %v3066_v26  ;;  %284 = vperm.xlu1 %2553, %v105_v23  }
  0x65   :  { %2556 = vset.pattern.permute.xlu2 %v2897_v5 }
  0x66   :  { %2555 = vset.pattern.permute.xlu1 %v2896_v1  ;;  %148 = vperm.xlu2 %2556, %v102_v27   ;;  %v3073_v28 = vpop.permute.xlu2 %248 }
  0x67   :  { %5207 = vst [vmem:[#allocation3_spill] sm:$0xff] %v3073_v28  ;;  %224 = vperm.xlu1 %2555, %v105_v23  }
  0x6e   :  { %2559 = vset.pattern.permute.xlu2 %v2895_v0 }
  0x6f   :  { %2558 = vset.pattern.permute.xlu1 %v2895_v0  ;;  %276 = vperm.xlu2 %2559, %v103_v21   ;;  %v3077_v29 = vpop.permute.xlu2 %113 }
  0x70   :  { %272 = vperm.xlu1 %2558, %v102_v27  }
  0x75   :  { %v3079_v30 = vpop.permute.xlu0 %252 }
  0x76   :  { %5208 = vst [vmem:[#allocation4_spill] sm:$0xff] %v3079_v30  ;;  %v3081_v31 = vpop.permute.xlu1 %123 }
  0x77   :  { %5209 = vst [vmem:[#allocation5_spill] sm:$0xff] %v3081_v31  ;;  %2561 = vset.pattern.permute.xlu2 %v2896_v1 }
  0x78   :  { %2560 = vset.pattern.permute.xlu1 %v2896_v1  ;;  %216 = vperm.xlu2 %2561, %v103_v21   ;;  %v3085_v32 = vpop.permute.xlu2 %184 }
  0x79   :  { %5210 = vst [vmem:[#allocation6_spill] sm:$0xff] %v3085_v32  ;;  %212 = vperm.xlu1 %2560, %v102_v27  }
  0x7d   :  { %v3087_v33 = vpop.permute.xlu0 %240 }
  0x7f   :  { %v3089_v34 = vpop.permute.xlu1 %188 }
  0x81   :  { %v3091_v35 = vpop.permute.xlu2 %138  ;;  %2562 = vset.pattern.permute.xlu1 %v2897_v5 }
  0x82   :  { %5211 = vst [vmem:[#allocation7_spill] sm:$0xff] %v3091_v35  ;;  %v345_v36 = vpop.f32.mrf.mxu1 }
  0x83   :  { %v346_v23 = vadd.f32 %v345_v36, %v3087_v33 }
  0x84   :  { %v75_v37 = vpop.f32.mrf.mxu0 }
  0x86   :  { %v40_v38 = vpop.permute.xlu0 %39 }
  0x87   :  { %v76_v40 = vadd.f32 %v75_v37, %v40_v38 }
  0x88   :  { %v3097_v41 = vpop.permute.xlu1 %108 }
  0x89   :  { %v3099_v42 = vsub.f32 %v30_v39, %v76_v40 }
  0x8a   :  { %v347_v43 = vpop.f32.mrf.mxu1  ;;  %v3101_v44 = vpop.permute.xlu2 %208 }
  0x8b   :  { %5212 = vst [vmem:[#allocation8_spill] sm:$0xff] %v3099_v42  ;;  %v3104_v45 = vperm.slane %v3099_v42, 1  ;;  %v3107_v46 = vperm.slane %v3099_v42, 2  ;;  %v3112_v48 = vperm.slane %v3099_v42, 3  ;;  %v3128_v55 = vperm.slane %v3099_v42, 4 }
  0x8c   :  { %5213 = vst [vmem:[#allocation9_spill] sm:$0xff] %v3101_v44  ;;  %v3154_v2 = vperm.slane %v3099_v42, 5  ;;  %v3160_v5 = vperm.slane %v3099_v42, 0 }
  0x8d   :  { %5214 = vst [vmem:[#allocation10_spill] sm:$0xff] %v3104_v45  ;;  %v564_v50 = vmul.f32 %v3104_v45, %v3097_v41  ;;  %v818_v51 = vmul.f32 %v3107_v46, %v3097_v41  ;;  %v1072_v61 = vmul.f32 %v3112_v48, %v3097_v41  ;;  %v1326_v1 = vmul.f32 %v3128_v55, %v3097_v41 }
  0x8e   :  { %v3109_v47 = vpop.permute.xlu0 %118  ;;  %5215 = vst [vmem:[#allocation11_spill] sm:$0xff] %v3112_v48  ;;  %v1580_v13 = vmul.f32 %v3154_v2, %v3097_v41  ;;  %v167_v15 = vmul.f32 %v3160_v5, %v3097_v41  ;;  %v170_v22 = vmul.f32 %v3160_v5, %v3081_v31  ;;  %v168_v36 = vmul.f32 %v3160_v5, %v3077_v29 }
  0x8f   :  { %v566_v49 = vmul.f32 %v3104_v45, %v3109_v47  ;;  %v820_v54 = vmul.f32 %v3107_v46, %v3109_v47  ;;  %5217 = vst [vmem:[#allocation13_spill] sm:$0xff] %v3128_v55  ;;  %v1074_v62 = vmul.f32 %v3112_v48, %v3109_v47  ;;  %v1328_v7 = vmul.f32 %v3128_v55, %v3109_v47 }
  0x90   :  { %5223 = vst [vmem:[#allocation19_spill] sm:$0xff] %v3154_v2  ;;  %v169_v8 = vmul.f32 %v3160_v5, %v3109_v47  ;;  %v230_v39 = vadd.f32 %v3066_v26, %v170_v22 }
  0x91   :  { %v3120_v52 = vpop.permute.xlu1 %180  ;;  %v3123_v53 = vadd.f32 %v566_v49, %v3089_v34  ;;  %v3139_v60 = vadd.f32 %v820_v54, %v3089_v34  ;;  %v3149_v0 = vadd.f32 %v1074_v62, %v3089_v34  ;;  %v3171_v11 = vadd.f32 %v1328_v7, %v3089_v34 }
  0x92   :  { %v3131_v56 = vadd.f32 %v564_v50, %v3120_v52  ;;  %v3134_v57 = vadd.f32 %v818_v51, %v3120_v52  ;;  %v3146_v63 = vadd.f32 %v1072_v61, %v3120_v52  ;;  %v3157_v4 = vadd.f32 %v1326_v1, %v3120_v52 }
  0x93   :  { %5216 = vst [vmem:[#allocation12_spill] sm:$0xff] %v3123_v53  ;;  %v350_v58 = vpop.f32.mrf.mxu1  ;;  %v3136_v59 = vpop.permute.xlu2 %268  ;;  %v3179_v18 = vadd.f32 %v1580_v13, %v3120_v52  ;;  %v227_v19 = vadd.f32 %v3120_v52, %v167_v15  ;;  %v229_v21 = vadd.f32 %v3089_v34, %v169_v8  ;;  %v1582_v50 = vmul.f32 %v3154_v2, %v3109_v47 }
  0x94   :  { %5218 = vst [vmem:[#allocation14_spill] sm:$0xff] %v3134_v57  ;;  %v351_v16 = vadd.f32 %v350_v58, %v3073_v28  ;;  %v228_v8 = vadd.f32 %v3085_v32, %v168_v36  ;;  %v3206_v13 = vperm.slane %v3099_v42, 6 }
  0x95   :  { %5219 = vst [vmem:[#allocation15_spill] sm:$0xff] %v3136_v59  ;;  %v375_v38 = vadd.f32 %v346_v23, %v227_v19  ;;  %v3201_v62 = vadd.f32 %v1582_v50, %v3089_v34 }
  0x96   :  { %5220 = vst [vmem:[#allocation16_spill] sm:$0xff] %v3139_v60  ;;  %v377_v25 = vadd.f32 %v351_v16, %v229_v21  ;;  %v3187_v37 = vpop.permute.xlu0 %143 }
  0x97   :  { %5221 = vst [vmem:[#allocation17_spill] sm:$0xff] %v3146_v63  ;;  %v2411_v61 = vmul.f32 -1.442695, %v375_v38 }
  0x98   :  { %5222 = vst [vmem:[#allocation18_spill] sm:$0xff] %v3149_v0  ;;  %v2413_v51 = vmul.f32 -1.442695, %v377_v25  ;;  %v1834_v25 = vmul.f32 %v3206_v13, %v3097_v41 }
  0x99   :  { %5224 = vst [vmem:[#allocation20_spill] sm:$0xff] %v3157_v4 }
  0x9a   :  { %v3162_v6 = vpop.permute.xlu1 %244  ;;  %5227 = vst [vmem:[#allocation23_spill] sm:$0xff] %v3171_v11  ;;  %2563 = vpow2.f32 %v2413_v51  ;;  %v3223_v50 = vadd.f32 %v1834_v25, %v3120_v52 }
  0x9b   :  { %5225 = vst [vmem:[#allocation21_spill] sm:$0xff] %v3162_v6  ;;  %v352_v9 = vpop.f32.mrf.mxu1  ;;  %v348_v1 = vadd.f32 %v347_v43, %v3162_v6  ;;  %2565 = vpow2.f32 %v2411_v61  ;;  %v1836_v43 = vmul.f32 %v3206_v13, %v3109_v47 }
  0x9c   :  { %v3168_v10 = vpop.permute.xlu2 %196  ;;  %5228 = vst [vmem:[#allocation24_spill] sm:$0xff] %v3179_v18  ;;  %v353_v27 = vadd.f32 %v352_v9, %v3079_v30 }
  0x9d   :  { %5226 = vst [vmem:[#allocation22_spill] sm:$0xff] %v3168_v10  ;;  %v376_v16 = vadd.f32 %v348_v1, %v228_v8  ;;  %v3226_v36 = vadd.f32 %v1836_v43, %v3089_v34  ;;  %v3233_v8 = vperm.slane %v3099_v42, 7 }
  0x9e   :  { %5229 = vst [vmem:[#allocation25_spill] sm:$0xff] %v3187_v37  ;;  %v378_v54 = vadd.f32 %v353_v27, %v230_v39  ;;  %v3210_v19 = vpop.permute.xlu0 %128  ;;  %v173_v39 = vmul.f32 %v3160_v5, %v3091_v35 }
  0x9f   :  { %5232 = vst [vmem:[#allocation28_spill] sm:$0xff] %v3201_v62  ;;  %v2412_v23 = vmul.f32 -1.442695, %v376_v16 }
  0xa0   :  { %v2414_v7 = vmul.f32 -1.442695, %v378_v54  ;;  %5233 = vst [vmem:[#allocation29_spill] sm:$0xff] %v3206_v13  ;;  %v2564_v22 = vpop.eup %2563 }
  0xa1   :  { %5235 = vst [vmem:[#allocation31_spill] sm:$0xff] %v3210_v19  ;;  %v2566_v27 = vpop.eup %2565  ;;  %v3218_v38 = vadd.f32 1.0, %v2564_v22 }
  0xa2   :  { %2567 = vpow2.f32 %v2414_v7  ;;  %5236 = vst [vmem:[#allocation32_spill] sm:$0xff] %v3223_v50  ;;  %v3228_v61 = vadd.f32 1.0, %v2566_v27  ;;  %v174_v50 = vmul.f32 %v3160_v5, %v3187_v37 }
  0xa3   :  { %v3190_v40 = vpop.permute.xlu1 %204  ;;  %v3192_v49 = vpop.f32.mrf.mxu1  ;;  %5237 = vst [vmem:[#allocation33_spill] sm:$0xff] %v3226_v36  ;;  %2569 = vpow2.f32 %v2412_v23  ;;  %vm430_vm3 = vweird.f32 %v3218_v38 }
  0xa4   :  { %5230 = vst [vmem:[#allocation26_spill] sm:$0xff] %v3190_v40  ;;  %v233_v1 = vadd.f32 %v3190_v40, %v173_v39  ;;  %2571 = vrcp.f32 %v3218_v38  ;;  %vm400_vm15 = vweird.f32 %v3228_v61 }
  0xa5   :  { %v3196_v58 = vpop.permute.xlu2 %260  ;;  %5238 = vst [vmem:[#allocation34_spill] sm:$0xff] %v3233_v8  ;;  %2573 = vrcp.f32 %v3228_v61 }
  0xa6   :  { %5231 = vst [vmem:[#allocation27_spill] sm:$0xff] %v3196_v58 }
  0xa7   :  { %v3242_v27 = vpop.permute.xlu0 %200 }
  0xa8   :  { %v2568_v51 = vpop.eup %2567 }
  0xa9   :  { %v3238_v22 = vadd.f32 1.0, %v2568_v51  ;;  %v2570_v42 = vpop.eup %2569 }
  0xaa   :  { %v3274_v0 = vpop.eup %2571  ;;  %v3278_v63 = vadd.f32 1.0, %v2570_v42 }
  0xab   :  { %v357_v9 = vpop.f32.mrf.mxu1  ;;  %v426_v42 = vmul.f32 %v3274_v0, %v3218_v38  ;;  %vm431_vm4 = vweird.f32 %v3274_v0  ;;  %vm445_vm6 = vweird.f32 %v3238_v22 }
  0xac   :  { %v3208_v15 = vpop.permute.xlu1 %264  ;;  %vm3383_vm7 = vmor %vm430_vm3, %vm431_vm4  ;;  %vm415_vm11 = vweird.f32 %v3278_v63 }
  0xad   :  { %5234 = vst [vmem:[#allocation30_spill] sm:$0xff] %v3208_v15 }
  0xae   :  { %v3212_v21 = vpop.permute.xlu2 %163 }
  0xb3   :  { %v360_v54 = vpop.f32.mrf.mxu1 }
  0xb4   :  { %v361_v7 = vadd.f32 %v360_v54, %v3208_v15 }
  0xb5   :  { %v3235_v16 = vpop.permute.xlu1 %133 }
  0xb6   :  { %v457_v25 = vadd.f32 %v361_v7, %v233_v1  ;;  %v172_v43 = vmul.f32 %v3160_v5, %v3235_v16  ;;  %v569_v23 = vmul.f32 %v3104_v45, %v3235_v16  ;;  %v823_v39 = vmul.f32 %v3107_v46, %v3235_v16 }
  0xb7   :  { %v3244_v36 = vpop.permute.xlu2 %220  ;;  %v1077_v54 = vmul.f32 %v3112_v48, %v3235_v16  ;;  %v1331_v51 = vmul.f32 %v3128_v55, %v3235_v16 }
  0xb8   :  { %v2417_v1 = vmul.f32 -1.442695, %v457_v25  ;;  %v232_v7 = vadd.f32 %v3242_v27, %v172_v43  ;;  %v3259_v62 = vadd.f32 %v569_v23, %v3242_v27  ;;  %v3262_v18 = vadd.f32 %v823_v39, %v3242_v27 }
  0xb9   :  { %v3265_v11 = vadd.f32 %v1077_v54, %v3242_v27  ;;  %v3268_v4 = vadd.f32 %v1331_v51, %v3242_v27  ;;  %v171_v25 = vmul.f32 %v3160_v5, %v3210_v19  ;;  %v358_v43 = vadd.f32 %v357_v9, %v3196_v58 }
  0xba   :  { %5239 = vst [vmem:[#allocation35_spill] sm:$0xff] %v3259_v62  ;;  %2575 = vpow2.f32 %v2417_v1  ;;  %v234_v39 = vadd.f32 %v3101_v44, %v174_v50  ;;  %v1585_v51 = vmul.f32 %v3154_v2, %v3235_v16  ;;  %v2088_v1 = vmul.f32 %v3233_v8, %v3097_v41 }
  0xbb   :  { %5240 = vst [vmem:[#allocation36_spill] sm:$0xff] %v3262_v18  ;;  %2577 = vrcp.f32 %v3238_v22  ;;  %v362_v23 = vpop.f32.mrf.mxu1  ;;  %v231_v9 = vadd.f32 %v3168_v10, %v171_v25 }
  0xbc   :  { %5241 = vst [vmem:[#allocation37_spill] sm:$0xff] %v3265_v11  ;;  %v363_v54 = vadd.f32 %v362_v23, %v3136_v59  ;;  %v456_v11 = vadd.f32 %v358_v43, %v232_v7  ;;  %v3294_v7 = vadd.f32 %v1585_v51, %v3242_v27  ;;  %v3297_v43 = vadd.f32 %v2088_v1, %v3120_v52 }
  0xbd   :  { %5242 = vst [vmem:[#allocation38_spill] sm:$0xff] %v3268_v4  ;;  %v3284_v4 = vpop.eup %2573  ;;  %2579 = vrcp.f32 %v3278_v63  ;;  %v2090_v52 = vmul.f32 %v3233_v8, %v3109_v47  ;;  %v434_v59 = vand.u32 2147483647, %v3218_v38 }
  0xbe   :  { %v458_v18 = vadd.f32 %v363_v54, %v234_v39  ;;  %v3287_v60 = vpop.permute.xlu1 %256  ;;  %5244 = vst [vmem:[#allocation40_spill] sm:$0xff] %v3294_v7  ;;  %v2416_v54 = vmul.f32 -1.442695, %v456_v11  ;;  %v396_v51 = vmul.f32 %v3284_v4, %v3228_v61  ;;  %v1839_v11 = vmul.f32 %v3206_v13, %v3235_v16 }
  0xbf   :  { %5243 = vst [vmem:[#allocation39_spill] sm:$0xff] %v3287_v60  ;;  %v356_v50 = vadd.f32 %v3192_v49, %v3287_v60  ;;  %v3323_v47 = vadd.f32 %v2090_v52, %v3089_v34  ;;  %vm3361_vm5 = vcmp.eq.f32.partialorder %v434_v59, 8.507059e+37  ;;  %vm401_vm13 = vweird.f32 %v3284_v4 }
  0xc0   :  { %5245 = vst [vmem:[#allocation41_spill] sm:$0xff] %v3297_v43  ;;  %v2576_v41 = vpop.eup %2575  ;;  %v2418_v23 = vmul.f32 -1.442695, %v458_v18  ;;  %v3301_v39 = vpop.permute.xlu2 %148  ;;  %v427_v18 = vsub.f32 1.0, %v426_v42 }
  0xc1   :  { %v3299_v57 = vpop.eup %2577  ;;  %v455_v25 = vadd.f32 %v356_v50, %v231_v9  ;;  %v3304_v49 = vadd.f32 1.0, %v2576_v41  ;;  %v3312_v43 = vpop.permute.xlu0 %280  ;;  %v397_v41 = vsub.f32 1.0, %v396_v51  ;;  %5247 = vst [vmem:[#allocation43_spill] sm:$0xff] %v3323_v47  ;;  %v436_v51 = vand.u32 2147483648, %v3218_v38 }
  0xc2   :  { %2581 = vpow2.f32 %v2418_v23  ;;  %v441_v50 = vmul.f32 %v3299_v57, %v3238_v22  ;;  %v3320_v23 = vadd.f32 %v1839_v11, %v3242_v27  ;;  %v3401_v38 = vmul.f32 %v3160_v5, %v3212_v21 }
  0xc3   :  { %v3310_v1 = vpop.f32.mrf.mxu1  ;;  %v2415_v9 = vmul.f32 -1.442695, %v455_v25  ;;  %2583 = vpow2.f32 %v2416_v54  ;;  %v3325_v42 = vpop.eup %2579  ;;  %v428_v25 = vmul.f32 %v3274_v0, %v427_v18  ;;  %vm446_vm9 = vweird.f32 %v3299_v57 }
  0xc4   :  { %2585 = vrcp.f32 %v3304_v49  ;;  %5246 = vst [vmem:[#allocation42_spill] sm:$0xff] %v3320_v23  ;;  %v442_v11 = vsub.f32 1.0, %v441_v50  ;;  %v398_v50 = vmul.f32 %v3284_v4, %v397_v41  ;;  %v411_v40 = vmul.f32 %v3325_v42, %v3278_v63  ;;  %vm3444_vm10 = vmor %vm445_vm6, %vm446_vm9 }
  0xc5   :  { %2587 = vpow2.f32 %v2415_v9  ;;  %v451_v9 = vand.u32 2147483648, %v3238_v22  ;;  %v429_v10 = vadd.f32 %v3274_v0, %v428_v25  ;;  %v437_v41 = vor.u32 1.1754944e-38, %v436_v51 }
  0xc6   :  { %vm416_vm12 = vweird.f32 %v3325_v42  ;;  %vm510_vm14 = vweird.f32 %v3304_v49 }
  0xc7   :  { %v3327_v7 = vpop.permute.xlu1 %158  ;;  %vm3541_vm4 = vmor %vm415_vm11, %vm416_vm12 }
  0xc8   :  { %v2582_v37 = vpop.eup %2581  ;;  %v574_v34 = vmul.f32 %v3104_v45, %v3327_v7  ;;  %v828_v18 = vmul.f32 %v3107_v46, %v3327_v7  ;;  %v1082_v44 = vmul.f32 %v3112_v48, %v3327_v7  ;;  %v1336_v54 = vmul.f32 %v3128_v55, %v3327_v7 }
  0xc9   :  { %v3336_v52 = vadd.f32 1.0, %v2582_v37  ;;  %v3338_v47 = vpop.permute.xlu2 %276  ;;  %v2584_v23 = vpop.eup %2583  ;;  %v177_v60 = vmul.f32 %v3160_v5, %v3327_v7 }
  0xca   :  { %5248 = vst [vmem:[#allocation44_spill] sm:$0xff] %v3338_v47  ;;  %v3350_v37 = vadd.f32 %v574_v34, %v3244_v36  ;;  %v3359_v35 = vpop.eup %2585  ;;  %v449_v34 = vand.u32 2147483647, %v3238_v22  ;;  %v3369_v19 = vadd.f32 %v828_v18, %v3244_v36  ;;  %v3372_v25 = vadd.f32 %v1082_v44, %v3244_v36  ;;  %v3377_v58 = vpop.permute.xlu0 %153 }
  0xcb   :  { %2589 = vrcp.f32 %v3336_v52  ;;  %v3353_v15 = vpop.f32.mrf.mxu1  ;;  %v3375_v62 = vadd.f32 %v1336_v54, %v3244_v36  ;;  %v2588_v59 = vpop.eup %2587  ;;  %v452_v18 = vor.u32 1.1754944e-38, %v451_v9  ;;  %v3388_v44 = vadd.f32 %v3284_v4, %v398_v50 }
  0xcc   :  { %5249 = vst [vmem:[#allocation45_spill] sm:$0xff] %v3350_v37  ;;  %v443_v37 = vmul.f32 %v3299_v57, %v442_v11  ;;  %v433_v54 = vsel %vm3383_vm7, %v3274_v0, %v429_v10  ;;  %v506_v51 = vmul.f32 %v3359_v35, %v3304_v49  ;;  %vm3403_vm8 = vcmp.eq.f32.partialorder %v449_v34, 8.507059e+37 }
  0xcd   :  { %5252 = vst [vmem:[#allocation46_spill] sm:$0xff] %v3369_v19  ;;  %v829_v0 = vmul.f32 %v3107_v46, %v3212_v21  ;;  %v1590_v10 = vmul.f32 %v3154_v2, %v3327_v7  ;;  %v573_v34 = vmul.f32 %v3104_v45, %v3377_v58  ;;  %v1083_v11 = vmul.f32 %v3112_v48, %v3212_v21 }
  0xce   :  { %5253 = vst [vmem:[#allocation47_spill] sm:$0xff] %v3372_v25  ;;  %v412_v25 = vsub.f32 1.0, %v411_v40  ;;  %v575_v40 = vmul.f32 %v3104_v45, %v3212_v21  ;;  %v444_v50 = vadd.f32 %v3299_v57, %v443_v37  ;;  %v438_v30 = vsel %vm3361_vm5, %v437_v41, %v433_v54 }
  0xcf   :  { %5254 = vst [vmem:[#allocation48_spill] sm:$0xff] %v3375_v62  ;;  %v3395_v62 = vadd.f32 1.0, %v2584_v23  ;;  %v3427_v53 = vadd.f32 1.0, %v2588_v59  ;;  %v3430_v37 = vadd.f32 %v1590_v10, %v3244_v36  ;;  %v507_v6 = vsub.f32 1.0, %v506_v51 }
  0xd0   :  { %v3397_v26 = vpop.permute.xlu1 %284  ;;  %v413_v28 = vmul.f32 %v3325_v42, %v412_v25  ;;  %v827_v25 = vmul.f32 %v3107_v46, %v3377_v58  ;;  %v1081_v51 = vmul.f32 %v3112_v48, %v3377_v58  ;;  %v448_v54 = vsel %vm3444_vm10, %v3299_v57, %v444_v50  ;;  %vm3582_vm10 = vmor %vm400_vm15, %vm401_vm13 }
  0xd1   :  { %v3413_v23 = vpop.eup %2589  ;;  %5259 = vst [vmem:[#allocation49_spill] sm:$0xff] %v3430_v37  ;;  %2591 = vrcp.f32 %v3395_v62  ;;  %v1589_v22 = vmul.f32 %v3154_v2, %v3377_v58  ;;  %v508_v57 = vmul.f32 %v3359_v35, %v507_v6  ;;  %v1337_v50 = vmul.f32 %v3128_v55, %v3212_v21 }
  0xd2   :  { %v3421_v19 = vpop.permute.xlu2 %216  ;;  %v521_v31 = vmul.f32 %v3413_v23, %v3336_v52  ;;  %2593 = vrcp.f32 %v3427_v53  ;;  %v1591_v59 = vmul.f32 %v3154_v2, %v3212_v21  ;;  %vm511_vm0 = vweird.f32 %v3359_v35 }
  0xd3   :  { %v370_v32 = vpop.f32.mrf.mxu1  ;;  %v3435_v45 = vadd.f32 %v573_v34, %v3421_v19  ;;  %v3462_v37 = vadd.f32 %v827_v25, %v3421_v19  ;;  %v3465_v48 = vadd.f32 %v1081_v51, %v3421_v19  ;;  %v3482_v6 = vadd.f32 %v1589_v22, %v3421_v19  ;;  %vm3532_vm3 = vmor %vm510_vm14, %vm511_vm0 }
  0xd4   :  { %v371_v41 = vadd.f32 %v370_v32, %v3312_v43  ;;  %v522_v10 = vsub.f32 1.0, %v521_v31  ;;  %v1335_v32 = vmul.f32 %v3128_v55, %v3377_v58  ;;  %v514_v22 = vand.u32 2147483647, %v3304_v49 }
  0xd5   :  { %5262 = vst [vmem:[#allocation50_spill] sm:$0xff] %v3465_v48  ;;  %v516_v55 = vand.u32 2147483648, %v3304_v49  ;;  %vm526_vm2 = vweird.f32 %v3413_v23  ;;  %vm525_vm5 = vweird.f32 %v3336_v52  ;;  %v529_v49 = vand.u32 2147483647, %v3336_v52 }
  0xd6   :  { %v537_v34 = vmul.f32 %v438_v30, %v371_v41  ;;  %v3469_v31 = vadd.f32 %v1335_v32, %v3421_v19  ;;  %v3476_v30 = vadd.f32 %v3325_v42, %v413_v28  ;;  %v237_v41 = vadd.f32 %v3244_v36, %v177_v60  ;;  %5264 = vst [vmem:[#allocation52_spill] sm:$0xff] %v3482_v6  ;;  %vm3558_vm6 = vmor %vm525_vm5, %vm526_vm2 }
  0xd7   :  { %v3484_v25 = vpop.eup %2591  ;;  %v453_v32 = vsel %vm3403_vm8, %v452_v18, %v448_v54  ;;  %v523_v2 = vmul.f32 %v3413_v23, %v522_v10  ;;  %v176_v28 = vmul.f32 %v3160_v5, %v3377_v58  ;;  %v1844_v60 = vmul.f32 %v3206_v13, %v3327_v7 }
  0xd8   :  { %5263 = vst [vmem:[#allocation51_spill] sm:$0xff] %v3469_v31  ;;  %v541_v31 = vadd.f32 %v537_v34, %v237_v41  ;;  %v509_v18 = vadd.f32 %v3359_v35, %v508_v57  ;;  %v3509_v34 = vpop.eup %2593  ;;  %vm515_vm7 = vcmp.eq.f32.partialorder %v514_v22, 8.507059e+37  ;;  %vm530_vm9 = vcmp.eq.f32.partialorder %v529_v49, 8.507059e+37 }
  0xd9   :  { %v3486_v51 = vpop.permute.xlu1 %224  ;;  %v524_v57 = vadd.f32 %v3413_v23, %v523_v2  ;;  %v531_v2 = vand.u32 2147483648, %v3336_v52  ;;  %v368_v52 = vadd.f32 %v3353_v15, %v3338_v47  ;;  %vm496_vm12 = vweird.f32 %v3484_v25 }
  0xda   :  { %v3499_v6 = vadd.f32 %v575_v40, %v3486_v51  ;;  %v3504_v54 = vadd.f32 %v829_v0, %v3486_v51  ;;  %v3507_v10 = vadd.f32 %v1083_v11, %v3486_v51  ;;  %v491_v40 = vmul.f32 %v3484_v25, %v3395_v62 }
  0xdb   :  { %v372_v9 = vpop.f32.mrf.mxu1  ;;  %v3516_v48 = vadd.f32 %v1337_v50, %v3486_v51  ;;  %v3521_v0 = vadd.f32 %v1591_v59, %v3486_v51  ;;  %v3524_v11 = vadd.f32 %v1844_v60, %v3244_v36  ;;  %2595 = vtanh.f32 %v541_v31 }
  0xdc   :  { %5265 = vst [vmem:[#allocation53_spill] sm:$0xff] %v3507_v10  ;;  %v373_v41 = vadd.f32 %v372_v9, %v3397_v26  ;;  %v238_v9 = vadd.f32 %v3486_v51, %v3401_v38  ;;  %v513_v38 = vsel %vm3532_vm3, %v3359_v35, %v509_v18  ;;  %v476_v59 = vmul.f32 %v3509_v34, %v3427_v53 }
  0xdd   :  { %5266 = vst [vmem:[#allocation54_spill] sm:$0xff] %v3516_v48  ;;  %v1843_v35 = vmul.f32 %v3206_v13, %v3377_v58  ;;  %v528_v18 = vsel %vm3558_vm6, %v3413_v23, %v524_v57  ;;  %v5276_v50 = vand.u32 2147483647, %v3278_v63  ;;  %v5277_v31 = vand.u32 2147483648, %v3278_v63 }
  0xde   :  { %5267 = vst [vmem:[#allocation55_spill] sm:$0xff] %v3521_v0  ;;  %v538_v10 = vmul.f32 %v453_v32, %v373_v41  ;;  %v418_v32 = vsel %vm3541_vm4, %v3325_v42, %v3476_v30  ;;  %v517_v41 = vor.u32 1.1754944e-38, %v516_v55  ;;  %v492_v42 = vsub.f32 1.0, %v491_v40 }
  0xdf   :  { %5268 = vst [vmem:[#allocation56_spill] sm:$0xff] %v3524_v11  ;;  %vm420_vm8 = vcmp.eq.f32.partialorder %v5276_v50, 8.507059e+37  ;;  %v422_v15 = vor.u32 1.1754944e-38, %v5277_v31  ;;  %v477_v22 = vsub.f32 1.0, %v476_v59  ;;  %v236_v11 = vadd.f32 %v3421_v19, %v176_v28 }
  0xe0   :  { %v542_v60 = vadd.f32 %v538_v10, %v238_v9  ;;  %v518_v30 = vsel %vm515_vm7, %v517_v41, %v513_v38  ;;  %v532_v10 = vor.u32 1.1754944e-38, %v531_v2  ;;  %v3572_v9 = vadd.f32 %v1843_v35, %v3421_v19 }
  0xe1   :  { %v2596_v40 = vpop.eup %2595  ;;  %v403_v63 = vsel %vm3582_vm10, %v3284_v4, %v3388_v44  ;;  %v2093_v2 = vmul.f32 %v3233_v8, %v3235_v16  ;;  %v423_v38 = vsel %vm420_vm8, %v422_v15, %v418_v32  ;;  %v549_v49 = vsub.f32 1.0, %v518_v30 }
  0xe2   :  { %2597 = vtanh.f32 %v542_v60  ;;  %v3569_v55 = vpop.permute.xlu1 %272  ;;  %5275 = vst [vmem:[#allocation57_spill] sm:$0xff] %v3572_v9  ;;  %v533_v57 = vsel %vm530_vm9, %v532_v10, %v528_v18  ;;  %v5280_v60 = vand.u32 2147483648, %v3228_v61  ;;  %v493_v35 = vmul.f32 %v3484_v25, %v492_v42 }
  0xe3   :  { %v536_v59 = vmul.f32 %v423_v38, %v368_v52  ;;  %v5281_v18 = vand.u32 2147483647, %v3228_v61  ;;  %v1845_v28 = vmul.f32 %v3206_v13, %v3212_v21  ;;  %v3601_v10 = vadd.f32 %v2093_v2, %v3242_v27 }
  0xe4   :  { %v407_v41 = vor.u32 1.1754944e-38, %v5280_v60  ;;  %v550_v4 = vsub.f32 1.0, %v533_v57  ;;  %v553_v44 = vmul.f32 %v2596_v40, %v549_v49  ;;  %v478_v32 = vmul.f32 %v3509_v34, %v477_v22 }
  0xe5   :  { %vm405_vm11 = vcmp.eq.f32.partialorder %v5281_v18, 8.507059e+37  ;;  %5282 = vst [vmem:[#allocation58_spill] sm:$0xff] %v3601_v10  ;;  %v366_v31 = vadd.f32 %v3310_v1, %v3569_v55  ;;  %v540_v52 = vadd.f32 %v536_v59, %v236_v11  ;;  %v3608_v61 = vadd.f32 %v1845_v28, %v3486_v51 }
  0xe6   :  { %v408_v16 = vsel %vm405_vm11, %v407_v41, %v403_v63  ;;  %v557_v15 = vmul.f32 0.0, %v518_v30  ;;  %v558_v23 = vmul.f32 0.0, %v533_v57  ;;  %v494_v27 = vadd.f32 %v3484_v25, %v493_v35 }
  0xe7   :  { %5283 = vst [vmem:[#allocation59_spill] sm:$0xff] %v3608_v61  ;;  %v175_v40 = vmul.f32 %v3160_v5, %v3301_v39  ;;  %vm495_vm13 = vweird.f32 %v3395_v62  ;;  %v499_v22 = vand.u32 2147483647, %v3395_v62  ;;  %v501_v1 = vand.u32 2147483648, %v3395_v62 }
  0xe8   :  { %v2598_v50 = vpop.eup %2597  ;;  %v3618_v11 = vadd.f32 %v557_v15, %v553_v44  ;;  %v479_v30 = vadd.f32 %v3509_v34, %v478_v32  ;;  %vm481_vm14 = vweird.f32 %v3509_v34  ;;  %v486_v5 = vand.u32 2147483648, %v3427_v53  ;;  %vm497_vm15 = vmor %vm495_vm13, %vm496_vm12 }
  0xe9   :  { %v554_v42 = vmul.f32 %v2598_v50, %v550_v4  ;;  %v535_v38 = vmul.f32 %v408_v16, %v366_v31  ;;  %2599 = vtanh.f32 %v540_v52  ;;  %vm480_vm0 = vweird.f32 %v3427_v53 }
  0xea   :  { %v484_v49 = vand.u32 2147483647, %v3427_v53  ;;  %v498_v60 = vsel %vm497_vm15, %v3484_v25, %v494_v27  ;;  %vm482_vm2 = vmor %vm480_vm0, %vm481_vm14  ;;  %v502_v41 = vor.u32 1.1754944e-38, %v501_v1  ;;  %vm500_vm3 = vcmp.eq.f32.partialorder %v499_v22, 8.507059e+37 }
  0xeb   :  { %v3616_v63 = vpop.permute.xlu1 %212  ;;  %v3620_v2 = vadd.f32 %v558_v23, %v554_v42  ;;  %v483_v59 = vsel %vm482_vm2, %v3509_v34, %v479_v30  ;;  %v487_v18 = vor.u32 1.1754944e-38, %v486_v5  ;;  %v2098_v53 = vmul.f32 %v3233_v8, %v3327_v7  ;;  %v5290_v30 = vld [vmem:[#allocation21_spill] sm:$0xff]  ;;  %v5291_v5 = vld [vmem:[#allocation6_spill] sm:$0xff] }
  0xec   :  { %5284 = vst [vmem:[#allocation60_spill] sm:$0xff] %v3616_v63  ;;  %v235_v57 = vadd.f32 %v3616_v63, %v175_v40  ;;  %v503_v28 = vsel %vm500_vm3, %v502_v41, %v498_v60  ;;  %vm485_vm4 = vcmp.eq.f32.partialorder %v484_v49, 8.507059e+37  ;;  %v2097_v7 = vmul.f32 %v3233_v8, %v3377_v58  ;;  %v5292_v49 = vld [vmem:[#allocation3_spill] sm:$0xff] }
  0xed   :  { %v589_v62 = vpack.c.bf16 %v3620_v2, %v3618_v11  ;;  %v488_v44 = vsel %vm485_vm4, %v487_v18, %v483_v59  ;;  %v548_v16 = vsub.f32 1.0, %v503_v28  ;;  %v556_v42 = vmul.f32 0.0, %v503_v28  ;;  %v5294_v28 = vld [vmem:[#allocation5_spill] sm:$0xff] }
  0xee   :  { %v539_v35 = vadd.f32 %v535_v38, %v235_v57  ;;  %v547_v32 = vsub.f32 1.0, %v488_v44  ;;  %v555_v52 = vmul.f32 0.0, %v488_v44  ;;  %v3637_v15 = vadd.f32 %v2098_v53, %v3244_v36 }
  0xef   :  { %596 = vmatpush.bf16.msrb.mxu2 %v589_v62  ;;  %v2600_v4 = vpop.eup %2599  ;;  %v3650_v40 = vadd.f32 %v2097_v7, %v3421_v19  ;;  %v2099_v36 = vmul.f32 %v3233_v8, %v3212_v21 }
  0xf0   :  { %2601 = vtanh.f32 %v539_v35  ;;  %v552_v50 = vmul.f32 %v2600_v4, %v548_v16  ;;  %5285 = vst [vmem:[#allocation61_spill] sm:$0xff] %v3637_v15  ;;  %v5293_v35 = vld [vmem:[#allocation12_spill] sm:$0xff] }
  0xf1   :  { %5286 = vst [vmem:[#allocation62_spill] sm:$0xff] %v3650_v40  ;;  %v3655_v22 = vadd.f32 %v2099_v36, %v3486_v51  ;;  %v5295_v16 = vld [vmem:[#allocation4_spill] sm:$0xff]  ;;  %v5298_v36 = vld [vmem:[#allocation35_spill] sm:$0xff] }
  0xf2   :  { %v3641_v23 = vadd.f32 %v556_v42, %v552_v50 }
  0xf3   :  { %5287 = vst [vmem:[#allocation63_spill] sm:$0xff] %v3655_v22 }
  0xf6   :  { %v2602_v31 = vpop.eup %2601 }
  0xf7   :  { %v551_v25 = vmul.f32 %v2602_v31, %v547_v32  ;;  %v5296_v31 = vld [vmem:[#allocation2_spill] sm:$0xff] }
  0xf9   :  { %v3639_v34 = vadd.f32 %v555_v52, %v551_v25 }
  0xfb   :  { %v588_v27 = vpack.c.bf16 %v3641_v23, %v3639_v34 }
  0xfd   :  { %597 = vmatpush.bf16.msrb.mxu2 %v588_v27  ;;  %v5297_v27 = vld [vmem:[#allocation27_spill] sm:$0xff] }
 0x100   :  { %2419 = vmatmul.msk.bf16.vlgmr.msrb.gmra.mxu2 %vm317_vm1, %v2951_v3  ;;  %v3667_v3 = vpop.f32.mrf.mxu2 }
 0x101   :  { %5288 = vst [vmem:[#allocation64_spill] sm:$0xff] %v3667_v3 }
 0x110   :  { %2420 = vmatmul.msk.bf16.gmra.mxu2 %vm317_vm1, %v2984_v12 }
 0x120   :  { %2421 = vmatmul.msk.bf16.gmra.mxu2 %vm317_vm1, %v2999_v14  ;;  %v5289_v14 = vld [vmem:[#allocation10_spill] sm:$0xff] }
 0x121   :  { %v565_v1 = vmul.f32 %v5289_v14, %v3077_v29  ;;  %v567_v4 = vmul.f32 %v5289_v14, %v5294_v28 }
 0x123   :  { %v579_v53 = vadd.f32 %v567_v4, %v5296_v31  ;;  %v5303_v4 = vld [vmem:[#allocation26_spill] sm:$0xff] }
 0x130   :  { %2422 = vmatmul.msk.bf16.gmra.mxu2 %vm317_vm1, %v3016_v17 }
 0x140   :  { %2423 = vmatmul.msk.bf16.gmra.mxu2 %vm317_vm1, %v3035_v20  ;;  %v577_v20 = vadd.f32 %v565_v1, %v5291_v5 }
 0x150   :  { %2424 = vmatmul.msk.bf16.gmra.mxu2 %vm317_vm1, %v3055_v24 }
 0x183   :  { %v599_v58 = vpop.f32.mrf.mxu2 }
 0x184   :  { %v600_v21 = vadd.f32 %v599_v58, %v3087_v33 }
 0x186   :  { %v629_v12 = vadd.f32 %v600_v21, %v3131_v56  ;;  %v5299_v21 = vld [vmem:[#allocation31_spill] sm:$0xff] }
 0x188   :  { %v2425_v57 = vmul.f32 -1.442695, %v629_v12 }
 0x18a   :  { %2603 = vpow2.f32 %v2425_v57  ;;  %v5300_v57 = vld [vmem:[#allocation39_spill] sm:$0xff] }
 0x18b   :  { %v601_v19 = vpop.f32.mrf.mxu2 }
 0x18c   :  { %v602_v17 = vadd.f32 %v601_v19, %v5290_v30 }
 0x18e   :  { %v630_v38 = vadd.f32 %v602_v17, %v577_v20 }
 0x190   :  { %v2426_v24 = vmul.f32 -1.442695, %v630_v38  ;;  %v2604_v41 = vpop.eup %2603  ;;  %v5301_v38 = vld [vmem:[#allocation7_spill] sm:$0xff] }
 0x191   :  { %v3677_v56 = vadd.f32 1.0, %v2604_v41 }
 0x192   :  { %2605 = vpow2.f32 %v2426_v24 }
 0x193   :  { %v604_v51 = vpop.f32.mrf.mxu2  ;;  %2607 = vrcp.f32 %v3677_v56  ;;  %vm654_vm6 = vweird.f32 %v3677_v56 }
 0x194   :  { %v605_v60 = vadd.f32 %v604_v51, %v5292_v49  ;;  %v568_v51 = vmul.f32 %v5289_v14, %v5299_v21 }
 0x196   :  { %v631_v59 = vadd.f32 %v605_v60, %v5293_v35  ;;  %v5302_v60 = vld [vmem:[#allocation22_spill] sm:$0xff] }
 0x197   :  { %v580_v41 = vadd.f32 %v568_v51, %v5302_v60 }
 0x198   :  { %v2427_v44 = vmul.f32 -1.442695, %v631_v59  ;;  %v2606_v50 = vpop.eup %2605 }
 0x199   :  { %v3684_v52 = vadd.f32 1.0, %v2606_v50  ;;  %v3688_v19 = vpop.eup %2607 }
 0x19a   :  { %2609 = vpow2.f32 %v2427_v44  ;;  %v650_v24 = vmul.f32 %v3688_v19, %v3677_v56  ;;  %vm655_vm5 = vweird.f32 %v3688_v19 }
 0x19b   :  { %v606_v62 = vpop.f32.mrf.mxu2  ;;  %2611 = vrcp.f32 %v3684_v52  ;;  %vm656_vm7 = vmor %vm654_vm6, %vm655_vm5  ;;  %vm669_vm10 = vweird.f32 %v3684_v52 }
 0x19c   :  { %v607_v32 = vadd.f32 %v606_v62, %v5295_v16  ;;  %v570_v62 = vmul.f32 %v5289_v14, %v5301_v38 }
 0x19e   :  { %v632_v42 = vadd.f32 %v607_v32, %v579_v53  ;;  %v582_v44 = vadd.f32 %v570_v62, %v5303_v4  ;;  %v5304_v32 = vld [vmem:[#allocation30_spill] sm:$0xff] }
 0x1a0   :  { %v2428_v12 = vmul.f32 -1.442695, %v632_v42  ;;  %v2610_v17 = vpop.eup %2609  ;;  %v651_v42 = vsub.f32 1.0, %v650_v24 }
 0x1a1   :  { %v3699_v59 = vadd.f32 1.0, %v2610_v17 }
 0x1a3   :  { %v609_v18 = vpop.f32.mrf.mxu2  ;;  %vm684_vm15 = vweird.f32 %v3699_v59 }
 0x1a4   :  { %v610_v20 = vadd.f32 %v609_v18, %v5300_v57 }
 0x1a6   :  { %v709_v53 = vadd.f32 %v610_v20, %v580_v41  ;;  %v652_v20 = vmul.f32 %v3688_v19, %v651_v42  ;;  %v5306_v41 = vld [vmem:[#allocation9_spill] sm:$0xff]  ;;  %v660_v42 = vand.u32 2147483648, %v3677_v56 }
 0x1a8   :  { %v653_v22 = vadd.f32 %v3688_v19, %v652_v20 }
 0x1aa   :  { %v657_v20 = vsel %vm656_vm7, %v3688_v19, %v653_v22 }
 0x1ab   :  { %v611_v25 = vpop.f32.mrf.mxu2 }
 0x1ac   :  { %v612_v7 = vadd.f32 %v611_v25, %v5297_v27  ;;  %v3703_v25 = vpop.eup %2611 }
 0x1ad   :  { %vm670_vm9 = vweird.f32 %v3703_v25 }
 0x1ae   :  { %v710_v58 = vadd.f32 %v612_v7, %v5298_v36  ;;  %vm671_vm11 = vmor %vm669_vm10, %vm670_vm9 }
 0x1b0   :  { %v2430_v1 = vmul.f32 -1.442695, %v710_v58  ;;  %v5305_v58 = vld [vmem:[#allocation25_spill] sm:$0xff] }
 0x1b1   :  { %v571_v51 = vmul.f32 %v5289_v14, %v5305_v58 }
 0x1b2   :  { %2613 = vpow2.f32 %v2430_v1  ;;  %v2429_v1 = vmul.f32 -1.442695, %v709_v53 }
 0x1b3   :  { %v614_v35 = vpop.f32.mrf.mxu2  ;;  %2615 = vpow2.f32 %v2428_v12  ;;  %v665_v12 = vmul.f32 %v3703_v25, %v3684_v52 }
 0x1b4   :  { %v615_v50 = vadd.f32 %v614_v35, %v5304_v32  ;;  %2617 = vrcp.f32 %v3699_v59  ;;  %v583_v35 = vadd.f32 %v571_v51, %v5306_v41  ;;  %v658_v51 = vand.u32 2147483647, %v3677_v56 }
 0x1b5   :  { %v666_v53 = vsub.f32 1.0, %v665_v12 }
 0x1b6   :  { %v711_v18 = vadd.f32 %v615_v50, %v582_v44  ;;  %v5307_v44 = vld [vmem:[#allocation15_spill] sm:$0xff]  ;;  %vm659_vm8 = vcmp.eq.f32.partialorder %v658_v51, 8.507059e+37 }
 0x1b7   :  { %v667_v12 = vmul.f32 %v3703_v25, %v666_v53 }
 0x1b8   :  { %v2614_v7 = vpop.eup %2613  ;;  %v2431_v36 = vmul.f32 -1.442695, %v711_v18 }
 0x1b9   :  { %v3708_v17 = vadd.f32 1.0, %v2614_v7  ;;  %v2616_v62 = vpop.eup %2615 }
 0x1ba   :  { %2619 = vpow2.f32 %v2431_v36  ;;  %v3716_v18 = vadd.f32 1.0, %v2616_v62  ;;  %v3718_v7 = vpop.eup %2617 }
 0x1bb   :  { %2621 = vrcp.f32 %v3708_v17  ;;  %v616_v24 = vpop.f32.mrf.mxu2  ;;  %v680_v62 = vmul.f32 %v3718_v7, %v3699_v59  ;;  %vm685_vm13 = vweird.f32 %v3718_v7  ;;  %vm749_vm2 = vweird.f32 %v3708_v17 }
 0x1bc   :  { %v617_v50 = vadd.f32 %v616_v24, %v5307_v44  ;;  %2623 = vpow2.f32 %v2429_v1  ;;  %vm3772_vm0 = vmor %vm684_vm15, %vm685_vm13  ;;  %vm699_vm9 = vweird.f32 %v3716_v18 }
 0x1bd   :  { %2625 = vrcp.f32 %v3716_v18  ;;  %v681_v22 = vsub.f32 1.0, %v680_v62 }
 0x1be   :  { %v712_v3 = vadd.f32 %v617_v50, %v583_v35  ;;  %v661_v50 = vor.u32 1.1754944e-38, %v660_v42  ;;  %v675_v42 = vand.u32 2147483648, %v3684_v52 }
 0x1c0   :  { %v2620_v36 = vpop.eup %2619  ;;  %v2432_v15 = vmul.f32 -1.442695, %v712_v3  ;;  %v662_v53 = vsel %vm659_vm8, %v661_v50, %v657_v20 }
 0x1c1   :  { %v3725_v24 = vpop.eup %2621  ;;  %v3728_v1 = vadd.f32 1.0, %v2620_v36  ;;  %v572_v36 = vmul.f32 %v5289_v14, %v3301_v39  ;;  %v673_v14 = vand.u32 2147483647, %v3684_v52 }
 0x1c2   :  { %2627 = vpow2.f32 %v2432_v15  ;;  %v745_v3 = vmul.f32 %v3725_v24, %v3708_v17  ;;  %v2624_v35 = vpop.eup %2623  ;;  %v668_v15 = vadd.f32 %v3703_v25, %v667_v12  ;;  %vm750_vm14 = vweird.f32 %v3725_v24 }
 0x1c3   :  { %2629 = vrcp.f32 %v3728_v1  ;;  %v619_v56 = vpop.f32.mrf.mxu2  ;;  %v3742_v10 = vadd.f32 1.0, %v2624_v35  ;;  %v584_v8 = vadd.f32 %v572_v36, %v3616_v63  ;;  %v3746_v9 = vpop.eup %2625  ;;  %v676_v35 = vor.u32 1.1754944e-38, %v675_v42  ;;  %vm3783_vm3 = vmor %vm749_vm2, %vm750_vm14 }
 0x1c4   :  { %v620_v40 = vadd.f32 %v619_v56, %v3569_v55  ;;  %v746_v19 = vsub.f32 1.0, %v745_v3  ;;  %v672_v20 = vsel %vm671_vm11, %v3703_v25, %v668_v15  ;;  %v695_v52 = vmul.f32 %v3746_v9, %v3716_v18 }
 0x1c5   :  { %2631 = vrcp.f32 %v3742_v10  ;;  %vm674_vm12 = vcmp.eq.f32.partialorder %v673_v14, 8.507059e+37  ;;  %v755_v42 = vand.u32 2147483648, %v3708_v17  ;;  %vm700_vm7 = vweird.f32 %v3746_v9 }
 0x1c6   :  { %v789_v61 = vmul.f32 %v662_v53, %v620_v40  ;;  %v682_v40 = vmul.f32 %v3718_v7, %v681_v22  ;;  %v747_v3 = vmul.f32 %v3725_v24, %v746_v19  ;;  %v677_v25 = vsel %vm674_vm12, %v676_v35, %v672_v20  ;;  %vm3817_vm11 = vmor %vm699_vm9, %vm700_vm7 }
 0x1c7   :  { %v696_v19 = vsub.f32 1.0, %v695_v52  ;;  %v753_v20 = vand.u32 2147483647, %v3708_v17  ;;  %v688_v35 = vand.u32 2147483647, %v3699_v59  ;;  %vm764_vm8 = vweird.f32 %v3728_v1 }
 0x1c8   :  { %v2628_v51 = vpop.eup %2627  ;;  %v3750_v56 = vadd.f32 %v789_v61, %v584_v8  ;;  %v683_v36 = vadd.f32 %v3718_v7, %v682_v40  ;;  %v748_v15 = vadd.f32 %v3725_v24, %v747_v3 }
 0x1c9   :  { %v3752_v12 = vpop.eup %2629  ;;  %v3754_v62 = vadd.f32 1.0, %v2628_v51  ;;  %v690_v51 = vand.u32 2147483648, %v3699_v59  ;;  %vm754_vm4 = vcmp.eq.f32.partialorder %v753_v20, 8.507059e+37  ;;  %vm689_vm5 = vcmp.eq.f32.partialorder %v688_v35, 8.507059e+37 }
 0x1ca   :  { %v760_v8 = vmul.f32 %v3752_v12, %v3728_v1  ;;  %v752_v17 = vsel %vm3783_vm3, %v3725_v24, %v748_v15  ;;  %vm765_vm6 = vweird.f32 %v3752_v12  ;;  %v768_v20 = vand.u32 2147483647, %v3728_v1 }
 0x1cb   :  { %2633 = vrcp.f32 %v3754_v62  ;;  %v621_v61 = vpop.f32.mrf.mxu2  ;;  %v3779_v40 = vpop.eup %2631  ;;  %v691_v13 = vor.u32 1.1754944e-38, %v690_v51  ;;  %v770_v51 = vand.u32 2147483648, %v3728_v1  ;;  %vm3813_vm10 = vmor %vm764_vm8, %vm765_vm6  ;;  %vm734_vm3 = vweird.f32 %v3742_v10 }
 0x1cc   :  { %v622_v50 = vadd.f32 %v621_v61, %v3338_v47  ;;  %v761_v53 = vsub.f32 1.0, %v760_v8  ;;  %v687_v61 = vsel %vm3772_vm0, %v3718_v7, %v683_v36  ;;  %v730_v0 = vmul.f32 %v3779_v40, %v3742_v10 }
 0x1cd   :  { %v705_v36 = vand.u32 2147483648, %v3716_v18  ;;  %v692_v24 = vsel %vm689_vm5, %v691_v13, %v687_v61  ;;  %v5312_v13 = vld [vmem:[#allocation45_spill] sm:$0xff]  ;;  %vm769_vm12 = vcmp.eq.f32.partialorder %v768_v20, 8.507059e+37  ;;  %vm735_vm15 = vweird.f32 %v3779_v40 }
 0x1ce   :  { %v790_v22 = vmul.f32 %v677_v25, %v622_v50  ;;  %v762_v50 = vmul.f32 %v3752_v12, %v761_v53  ;;  %v756_v25 = vor.u32 1.1754944e-38, %v755_v42  ;;  %vm779_vm0 = vweird.f32 %v3754_v62 }
 0x1d0   :  { %v794_v3 = vadd.f32 %v790_v22, %v3435_v45  ;;  %v697_v45 = vmul.f32 %v3746_v9, %v696_v19  ;;  %v757_v53 = vsel %vm754_vm4, %v756_v25, %v752_v17  ;;  %v763_v15 = vadd.f32 %v3752_v12, %v762_v50  ;;  %vm736_vm4 = vmor %vm734_vm3, %vm735_vm15 }
 0x1d1   :  { %v3787_v8 = vpop.eup %2633  ;;  %v802_v35 = vsub.f32 1.0, %v757_v53  ;;  %v703_v50 = vand.u32 2147483647, %v3716_v18  ;;  %v810_v25 = vmul.f32 %v757_v53, %v3641_v23 }
 0x1d2   :  { %2635 = vtanh.f32 %v794_v3  ;;  %v775_v59 = vmul.f32 %v3787_v8, %v3754_v62  ;;  %v698_v42 = vadd.f32 %v3746_v9, %v697_v45  ;;  %v731_v3 = vsub.f32 1.0, %v730_v0 }
 0x1d3   :  { %v624_v22 = vpop.f32.mrf.mxu2  ;;  %v767_v0 = vsel %vm3813_vm10, %v3752_v12, %v763_v15  ;;  %vm704_vm13 = vcmp.eq.f32.partialorder %v703_v50, 8.507059e+37  ;;  %vm780_vm14 = vweird.f32 %v3787_v8 }
 0x1d4   :  { %v625_v7 = vadd.f32 %v624_v22, %v3312_v43  ;;  %v776_v19 = vsub.f32 1.0, %v775_v59  ;;  %v702_v18 = vsel %vm3817_vm11, %v3746_v9, %v698_v42  ;;  %v771_v22 = vor.u32 1.1754944e-38, %v770_v51  ;;  %vm781_vm2 = vmor %vm779_vm0, %vm780_vm14 }
 0x1d5   :  { %v785_v9 = vand.u32 2147483648, %v3754_v62 }
 0x1d6   :  { %v791_v14 = vmul.f32 %v692_v24, %v625_v7  ;;  %v777_v1 = vmul.f32 %v3787_v8, %v776_v19  ;;  %v706_v24 = vor.u32 1.1754944e-38, %v705_v36  ;;  %v772_v15 = vsel %vm769_vm12, %v771_v22, %v767_v0 }
 0x1d7   :  { %v783_v36 = vand.u32 2147483647, %v3754_v62  ;;  %v803_v42 = vsub.f32 1.0, %v772_v15  ;;  %v811_v62 = vmul.f32 %v772_v15, %v3618_v11  ;;  %v786_v17 = vor.u32 1.1754944e-38, %v785_v9  ;;  %v3872_v15 = vld [vmem:[%s5148_s4 + $0x8] sm:$0xff] }
 0x1d8   :  { %v2636_v52 = vpop.eup %2635  ;;  %v795_v61 = vadd.f32 %v791_v14, %v5312_v13  ;;  %v732_v14 = vmul.f32 %v3779_v40, %v731_v3  ;;  %v707_v19 = vsel %vm704_vm13, %v706_v24, %v702_v18  ;;  %v778_v23 = vadd.f32 %v3787_v8, %v777_v1 }
 0x1d9   :  { %v806_v59 = vmul.f32 %v2636_v52, %v802_v35  ;;  %v738_v35 = vand.u32 2147483647, %v3742_v10  ;;  %v740_v52 = vand.u32 2147483648, %v3742_v10  ;;  %vm784_vm5 = vcmp.eq.f32.partialorder %v783_v36, 8.507059e+37 }
 0x1da   :  { %2637 = vtanh.f32 %v795_v61  ;;  %v733_v51 = vadd.f32 %v3779_v40, %v732_v14  ;;  %v782_v61 = vsel %vm781_vm2, %v3787_v8, %v778_v23  ;;  %v3893_v23 = vld [vmem:[%s5148_s4 + $0x20] sm:$0xff] }
 0x1db   :  { %v626_v7 = vpop.f32.mrf.mxu2  ;;  %v3830_v13 = vadd.f32 %v810_v25, %v806_v59  ;;  %2639 = vtanh.f32 %v3750_v56  ;;  %v787_v0 = vsel %vm784_vm5, %v786_v17, %v782_v61  ;;  %v741_v1 = vor.u32 1.1754944e-38, %v740_v52 }
 0x1dc   :  { %v627_v12 = vadd.f32 %v626_v7, %v3397_v26  ;;  %v737_v45 = vsel %vm736_vm4, %v3779_v40, %v733_v51  ;;  %vm739_vm6 = vcmp.eq.f32.partialorder %v738_v35, 8.507059e+37  ;;  %v804_v59 = vsub.f32 1.0, %v787_v0 }
 0x1dd   :  { %v742_v10 = vsel %vm739_vm6, %v741_v1, %v737_v45  ;;  %v812_v11 = vmul.f32 %v787_v0, %v3620_v2  ;;  %v3865_v2 = vld [vmem:[%s5148_s4] sm:$0xff]  ;;  %v819_v35 = vmul.f32 %v3107_v46, %v3077_v29 }
 0x1de   :  { %v792_v53 = vmul.f32 %v707_v19, %v627_v12  ;;  %v801_v18 = vsub.f32 1.0, %v742_v10  ;;  %v809_v14 = vmul.f32 %v742_v10, %v3639_v34  ;;  %v3879_v34 = vld [vmem:[%s5148_s4 + $0x10] sm:$0xff]  ;;  %v3886_v19 = vld [vmem:[%s5148_s4 + $0x18] sm:$0xff] }
 0x1df   :  { %v5318_v10 = vld [vmem:[#allocation16_spill] sm:$0xff] }
 0x1e0   :  { %v2638_v20 = vpop.eup %2637  ;;  %v796_v3 = vadd.f32 %v792_v53, %v3499_v6  ;;  %v3900_v53 = vld [vmem:[%s5148_s4 + $0x28] sm:$0xff] }
 0x1e1   :  { %v807_v50 = vmul.f32 %v2638_v20, %v803_v42  ;;  %v2640_v56 = vpop.eup %2639  ;;  %v5317_v20 = vld [vmem:[#allocation14_spill] sm:$0xff] }
 0x1e2   :  { %2641 = vtanh.f32 %v796_v3  ;;  %v805_v7 = vmul.f32 %v2640_v56, %v801_v18 }
 0x1e3   :  { %v3849_v6 = vadd.f32 %v811_v62, %v807_v50  ;;  %v831_v50 = vadd.f32 %v819_v35, %v5291_v5 }
 0x1e4   :  { %v3858_v40 = vadd.f32 %v809_v14, %v805_v7 }
 0x1e6   :  { %v842_v12 = vpack.c.bf16 %v3830_v13, %v3858_v40 }
 0x1e8   :  { %v2642_v8 = vpop.eup %2641 }
 0x1e9   :  { %v808_v25 = vmul.f32 %v2642_v8, %v804_v59 }
 0x1eb   :  { %v3853_v22 = vadd.f32 %v812_v11, %v808_v25  ;;  %v821_v25 = vmul.f32 %v3107_v46, %v5294_v28 }
 0x1ed   :  { %v843_v24 = vpack.c.bf16 %v3853_v22, %v3849_v6 }
 0x1ef   :  { %850 = vmatpush.bf16.msra.mxu3 %v843_v24  ;;  %v833_v24 = vadd.f32 %v821_v25, %v5296_v31 }
 0x1f3   :  { %851 = vmatpush.bf16.msra.mxu3 %v842_v12 }
 0x1f6   :  { %2433 = vmatmul.msk.bf16.vlgmr.msra.gmra.mxu3 %vm317_vm1, %v3865_v2 }
 0x206   :  { %2434 = vmatmul.msk.bf16.gmra.mxu3 %vm317_vm1, %v3872_v15 }
 0x216   :  { %2435 = vmatmul.msk.bf16.gmra.mxu3 %vm317_vm1, %v3879_v34 }
 0x226   :  { %2436 = vmatmul.msk.bf16.gmra.mxu3 %vm317_vm1, %v3886_v19 }
 0x236   :  { %2437 = vmatmul.msk.bf16.gmra.mxu3 %vm317_vm1, %v3893_v23 }
 0x246   :  { %2438 = vmatmul.msk.bf16.gmra.mxu3 %vm317_vm1, %v3900_v53 }
 0x279   :  { %v853_v9 = vpop.f32.mrf.mxu3 }
 0x27a   :  { %v854_v42 = vadd.f32 %v853_v9, %v3087_v33 }
 0x27c   :  { %v883_v3 = vadd.f32 %v854_v42, %v5317_v20  ;;  %v5319_v42 = vld [vmem:[#allocation36_spill] sm:$0xff] }
 0x27e   :  { %v2439_v61 = vmul.f32 -1.442695, %v883_v3  ;;  %v822_v3 = vmul.f32 %v3107_v46, %v5299_v21 }
 0x280   :  { %2643 = vpow2.f32 %v2439_v61 }
 0x281   :  { %v855_v36 = vpop.f32.mrf.mxu3 }
 0x282   :  { %v856_v52 = vadd.f32 %v855_v36, %v5290_v30 }
 0x284   :  { %v884_v62 = vadd.f32 %v856_v52, %v831_v50 }
 0x286   :  { %v2440_v45 = vmul.f32 -1.442695, %v884_v62  ;;  %v2644_v1 = vpop.eup %2643  ;;  %v824_v62 = vmul.f32 %v3107_v46, %v5301_v38 }
 0x287   :  { %v3912_v8 = vadd.f32 1.0, %v2644_v1 }
 0x288   :  { %2645 = vpow2.f32 %v2440_v45  ;;  %v834_v45 = vadd.f32 %v822_v3, %v5302_v60 }
 0x289   :  { %v858_v51 = vpop.f32.mrf.mxu3  ;;  %2647 = vrcp.f32 %v3912_v8  ;;  %vm908_vm8 = vweird.f32 %v3912_v8 }
 0x28a   :  { %v859_v0 = vadd.f32 %v858_v51, %v5292_v49 }
 0x28c   :  { %v885_v56 = vadd.f32 %v859_v0, %v5318_v10  ;;  %v836_v10 = vadd.f32 %v824_v62, %v5303_v4 }
 0x28e   :  { %v2441_v11 = vmul.f32 -1.442695, %v885_v56  ;;  %v2646_v7 = vpop.eup %2645 }
 0x28f   :  { %v3919_v12 = vadd.f32 1.0, %v2646_v7  ;;  %v3923_v20 = vpop.eup %2647 }
 0x290   :  { %2649 = vpow2.f32 %v2441_v11  ;;  %vm909_vm7 = vweird.f32 %v3923_v20 }
 0x291   :  { %v860_v17 = vpop.f32.mrf.mxu3  ;;  %2651 = vrcp.f32 %v3919_v12  ;;  %vm910_vm9 = vmor %vm908_vm8, %vm909_vm7  ;;  %vm923_vm12 = vweird.f32 %v3919_v12 }
 0x292   :  { %v861_v18 = vadd.f32 %v860_v17, %v5295_v16  ;;  %v904_v17 = vmul.f32 %v3923_v20, %v3912_v8 }
 0x294   :  { %v886_v9 = vadd.f32 %v861_v18, %v833_v24  ;;  %v905_v18 = vsub.f32 1.0, %v904_v17 }
 0x296   :  { %v2442_v35 = vmul.f32 -1.442695, %v886_v9  ;;  %v2650_v61 = vpop.eup %2649  ;;  %v906_v3 = vmul.f32 %v3923_v20, %v905_v18 }
 0x297   :  { %v3934_v1 = vadd.f32 1.0, %v2650_v61  ;;  %v3938_v11 = vpop.eup %2651 }
 0x298   :  { %vm924_vm11 = vweird.f32 %v3938_v11 }
 0x299   :  { %v863_v59 = vpop.f32.mrf.mxu3  ;;  %vm925_vm13 = vmor %vm923_vm12, %vm924_vm11  ;;  %vm938_vm2 = vweird.f32 %v3934_v1 }
 0x29a   :  { %v864_v50 = vadd.f32 %v863_v59, %v5300_v57 }
 0x29c   :  { %v963_v25 = vadd.f32 %v864_v50, %v834_v45 }
 0x29e   :  { %v2443_v9 = vmul.f32 -1.442695, %v963_v25 }
 0x2a1   :  { %v865_v14 = vpop.f32.mrf.mxu3 }
 0x2a2   :  { %v866_v36 = vadd.f32 %v865_v14, %v5297_v27  ;;  %v825_v14 = vmul.f32 %v3107_v46, %v5305_v58 }
 0x2a4   :  { %v964_v51 = vadd.f32 %v866_v36, %v5319_v42  ;;  %v919_v42 = vmul.f32 %v3938_v11, %v3919_v12 }
 0x2a6   :  { %v2444_v52 = vmul.f32 -1.442695, %v964_v51  ;;  %v920_v62 = vsub.f32 1.0, %v919_v42 }
 0x2a8   :  { %2653 = vpow2.f32 %v2444_v52  ;;  %v837_v52 = vadd.f32 %v825_v14, %v5306_v41 }
 0x2a9   :  { %v868_v0 = vpop.f32.mrf.mxu3  ;;  %2655 = vpow2.f32 %v2442_v35 }
 0x2aa   :  { %v869_v56 = vadd.f32 %v868_v0, %v5304_v32  ;;  %2657 = vrcp.f32 %v3934_v1  ;;  %v907_v0 = vadd.f32 %v3923_v20, %v906_v3 }
 0x2ac   :  { %v965_v59 = vadd.f32 %v869_v56, %v836_v10  ;;  %v914_v10 = vand.u32 2147483648, %v3912_v8 }
 0x2ae   :  { %v2654_v7 = vpop.eup %2653  ;;  %v2445_v24 = vmul.f32 -1.442695, %v965_v59  ;;  %v912_v59 = vand.u32 2147483647, %v3912_v8  ;;  %v915_v3 = vor.u32 1.1754944e-38, %v914_v10  ;;  %v929_v10 = vand.u32 2147483648, %v3919_v12 }
 0x2af   :  { %v3943_v36 = vadd.f32 1.0, %v2654_v7  ;;  %v2656_v51 = vpop.eup %2655 }
 0x2b0   :  { %2659 = vpow2.f32 %v2445_v24  ;;  %v3951_v50 = vadd.f32 1.0, %v2656_v51  ;;  %v3953_v17 = vpop.eup %2657  ;;  %v921_v24 = vmul.f32 %v3938_v11, %v920_v62  ;;  %vm913_vm10 = vcmp.eq.f32.partialorder %v912_v59, 8.507059e+37 }
 0x2b1   :  { %2661 = vrcp.f32 %v3943_v36  ;;  %v870_v35 = vpop.f32.mrf.mxu3  ;;  %v934_v14 = vmul.f32 %v3953_v17, %v3934_v1  ;;  %vm939_vm15 = vweird.f32 %v3953_v17  ;;  %vm1003_vm4 = vweird.f32 %v3943_v36 }
 0x2b2   :  { %v871_v61 = vadd.f32 %v870_v35, %v5307_v44  ;;  %2663 = vpow2.f32 %v2443_v9  ;;  %v911_v9 = vsel %vm910_vm9, %v3923_v20, %v907_v0  ;;  %v826_v35 = vmul.f32 %v3107_v46, %v3301_v39  ;;  %vm4007_vm3 = vmor %vm938_vm2, %vm939_vm15 }
 0x2b3   :  { %2665 = vrcp.f32 %v3951_v50  ;;  %v922_v62 = vadd.f32 %v3938_v11, %v921_v24  ;;  %v935_v20 = vsub.f32 1.0, %v934_v14  ;;  %v927_v46 = vand.u32 2147483647, %v3919_v12 }
 0x2b4   :  { %v966_v45 = vadd.f32 %v871_v61, %v837_v52  ;;  %v916_v61 = vsel %vm913_vm10, %v915_v3, %v911_v9  ;;  %v930_v3 = vor.u32 1.1754944e-38, %v929_v10  ;;  %v1009_v10 = vand.u32 2147483648, %v3943_v36 }
 0x2b5   :  { %v926_v9 = vsel %vm925_vm13, %v3938_v11, %v922_v62  ;;  %vm928_vm14 = vcmp.eq.f32.partialorder %v927_v46, 8.507059e+37  ;;  %vm953_vm11 = vweird.f32 %v3951_v50 }
 0x2b6   :  { %v2660_v56 = vpop.eup %2659  ;;  %v2446_v25 = vmul.f32 -1.442695, %v966_v45  ;;  %v931_v11 = vsel %vm928_vm14, %v930_v3, %v926_v9  ;;  %v1007_v9 = vand.u32 2147483647, %v3943_v36  ;;  %v942_v3 = vand.u32 2147483647, %v3934_v1 }
 0x2b7   :  { %v3960_v18 = vpop.eup %2661  ;;  %v3963_v7 = vadd.f32 1.0, %v2660_v56  ;;  %v838_v56 = vadd.f32 %v826_v35, %v3616_v63 }
 0x2b8   :  { %2667 = vpow2.f32 %v2446_v25  ;;  %v999_v42 = vmul.f32 %v3960_v18, %v3943_v36  ;;  %v2664_v51 = vpop.eup %2663  ;;  %vm1004_vm0 = vweird.f32 %v3960_v18  ;;  %vm1008_vm6 = vcmp.eq.f32.partialorder %v1007_v9, 8.507059e+37 }
 0x2b9   :  { %2669 = vrcp.f32 %v3963_v7  ;;  %v873_v8 = vpop.f32.mrf.mxu3  ;;  %v3977_v0 = vadd.f32 1.0, %v2664_v51  ;;  %v3981_v48 = vpop.eup %2665  ;;  %vm4018_vm5 = vmor %vm1003_vm4, %vm1004_vm0  ;;  %vm943_vm7 = vcmp.eq.f32.partialorder %v942_v3, 8.507059e+37  ;;  %vm1018_vm10 = vweird.f32 %v3963_v7 }
 0x2ba   :  { %v874_v52 = vadd.f32 %v873_v8, %v3569_v55  ;;  %v1000_v45 = vsub.f32 1.0, %v999_v42  ;;  %v936_v42 = vmul.f32 %v3953_v17, %v935_v20  ;;  %v949_v12 = vmul.f32 %v3981_v48, %v3951_v50 }
 0x2bb   :  { %2671 = vrcp.f32 %v3977_v0  ;;  %vm954_vm9 = vweird.f32 %v3981_v48  ;;  %v1022_v9 = vand.u32 2147483647, %v3963_v7 }
 0x2bc   :  { %v1043_v25 = vmul.f32 %v916_v61, %v874_v52  ;;  %v1001_v51 = vmul.f32 %v3960_v18, %v1000_v45  ;;  %v937_v62 = vadd.f32 %v3953_v17, %v936_v42  ;;  %vm4052_vm13 = vmor %vm953_vm11, %vm954_vm9 }
 0x2bd   :  { %vm1023_vm14 = vcmp.eq.f32.partialorder %v1022_v9, 8.507059e+37 }
 0x2be   :  { %v2668_v59 = vpop.eup %2667  ;;  %v3985_v8 = vadd.f32 %v1043_v25, %v838_v56  ;;  %v1002_v45 = vadd.f32 %v3960_v18, %v1001_v51  ;;  %v950_v25 = vsub.f32 1.0, %v949_v12 }
 0x2bf   :  { %v3987_v24 = vpop.eup %2669  ;;  %v3989_v14 = vadd.f32 1.0, %v2668_v59  ;;  %v944_v59 = vand.u32 2147483648, %v3934_v1 }
 0x2c0   :  { %v1014_v35 = vmul.f32 %v3987_v24, %v3963_v7  ;;  %v1006_v36 = vsel %vm4018_vm5, %v3960_v18, %v1002_v45  ;;  %vm1019_vm8 = vweird.f32 %v3987_v24  ;;  %vm988_vm5 = vweird.f32 %v3977_v0 }
 0x2c1   :  { %2673 = vrcp.f32 %v3989_v14  ;;  %v875_v52 = vpop.f32.mrf.mxu3  ;;  %v4014_v42 = vpop.eup %2671  ;;  %vm4048_vm12 = vmor %vm1018_vm10, %vm1019_vm8 }
 0x2c2   :  { %v876_v61 = vadd.f32 %v875_v52, %v3338_v47  ;;  %v1015_v20 = vsub.f32 1.0, %v1014_v35  ;;  %v941_v52 = vsel %vm4007_vm3, %v3953_v17, %v937_v62  ;;  %v945_v47 = vor.u32 1.1754944e-38, %v944_v59 }
 0x2c3   :  { %v984_v63 = vmul.f32 %v4014_v42, %v3977_v0  ;;  %v959_v62 = vand.u32 2147483648, %v3951_v50  ;;  %v1024_v59 = vand.u32 2147483648, %v3963_v7  ;;  %vm989_vm2 = vweird.f32 %v4014_v42 }
 0x2c4   :  { %v1044_v56 = vmul.f32 %v931_v11, %v876_v61  ;;  %v1016_v61 = vmul.f32 %v3987_v24, %v1015_v20  ;;  %v1010_v11 = vor.u32 1.1754944e-38, %v1009_v10  ;;  %v946_v18 = vsel %vm943_vm7, %v945_v47, %v941_v52  ;;  %v5324_v47 = vld [vmem:[#allocation46_spill] sm:$0xff] }
 0x2c5   :  { %vm1033_vm3 = vweird.f32 %v3989_v14 }
 0x2c6   :  { %v1048_v51 = vadd.f32 %v1044_v56, %v3462_v37  ;;  %v951_v37 = vmul.f32 %v3981_v48, %v950_v25  ;;  %v1011_v20 = vsel %vm1008_vm6, %v1010_v11, %v1006_v36  ;;  %v1017_v45 = vadd.f32 %v3987_v24, %v1016_v61  ;;  %vm990_vm6 = vmor %vm988_vm5, %vm989_vm2 }
 0x2c7   :  { %v4022_v35 = vpop.eup %2673  ;;  %v1056_v3 = vsub.f32 1.0, %v1011_v20  ;;  %v957_v61 = vand.u32 2147483647, %v3951_v50  ;;  %v1064_v11 = vmul.f32 %v1011_v20, %v3830_v13 }
 0x2c8   :  { %2675 = vtanh.f32 %v1048_v51  ;;  %v1029_v1 = vmul.f32 %v4022_v35, %v3989_v14  ;;  %v952_v10 = vadd.f32 %v3981_v48, %v951_v37  ;;  %v985_v51 = vsub.f32 1.0, %v984_v63 }
 0x2c9   :  { %v878_v56 = vpop.f32.mrf.mxu3  ;;  %v1021_v63 = vsel %vm4048_vm12, %v3987_v24, %v1017_v45  ;;  %vm958_vm15 = vcmp.eq.f32.partialorder %v957_v61, 8.507059e+37  ;;  %vm1034_vm0 = vweird.f32 %v4022_v35 }
 0x2ca   :  { %v879_v17 = vadd.f32 %v878_v56, %v3312_v43  ;;  %v1030_v25 = vsub.f32 1.0, %v1029_v1  ;;  %v956_v50 = vsel %vm4052_vm13, %v3981_v48, %v952_v10  ;;  %v1025_v56 = vor.u32 1.1754944e-38, %v1024_v59  ;;  %vm1035_vm4 = vmor %vm1033_vm3, %vm1034_vm0 }
 0x2cb   :  { %v1039_v48 = vand.u32 2147483648, %v3989_v14 }
 0x2cc   :  { %v1045_v46 = vmul.f32 %v946_v18, %v879_v17  ;;  %v1031_v7 = vmul.f32 %v4022_v35, %v1030_v25  ;;  %v960_v18 = vor.u32 1.1754944e-38, %v959_v62  ;;  %v1026_v45 = vsel %vm1023_vm14, %v1025_v56, %v1021_v63 }
 0x2cd   :  { %v1037_v62 = vand.u32 2147483647, %v3989_v14  ;;  %v1057_v10 = vsub.f32 1.0, %v1026_v45  ;;  %v1065_v14 = vmul.f32 %v1026_v45, %v3849_v6  ;;  %v1040_v36 = vor.u32 1.1754944e-38, %v1039_v48  ;;  %v5330_v48 = vld [vmem:[#allocation11_spill] sm:$0xff] }
 0x2ce   :  { %v2676_v12 = vpop.eup %2675  ;;  %v1049_v52 = vadd.f32 %v1045_v46, %v5324_v47  ;;  %v986_v46 = vmul.f32 %v4014_v42, %v985_v51  ;;  %v961_v25 = vsel %vm958_vm15, %v960_v18, %v956_v50  ;;  %v1032_v13 = vadd.f32 %v4022_v35, %v1031_v7 }
 0x2cf   :  { %v1060_v1 = vmul.f32 %v2676_v12, %v1056_v3  ;;  %v992_v3 = vand.u32 2147483647, %v3977_v0  ;;  %v994_v12 = vand.u32 2147483648, %v3977_v0  ;;  %vm1038_vm7 = vcmp.eq.f32.partialorder %v1037_v62, 8.507059e+37 }
 0x2d0   :  { %2677 = vtanh.f32 %v1049_v52  ;;  %v987_v59 = vadd.f32 %v4014_v42, %v986_v46  ;;  %v1036_v52 = vsel %vm1035_vm4, %v4022_v35, %v1032_v13  ;;  %v5329_v13 = vld [vmem:[#allocation17_spill] sm:$0xff]  ;;  %v1073_v62 = vmul.f32 %v5330_v48, %v3077_v29 }
 0x2d1   :  { %v880_v17 = vpop.f32.mrf.mxu3  ;;  %v4065_v47 = vadd.f32 %v1064_v11, %v1060_v1  ;;  %2679 = vtanh.f32 %v3985_v8  ;;  %v1041_v63 = vsel %vm1038_vm7, %v1040_v36, %v1036_v52  ;;  %v995_v7 = vor.u32 1.1754944e-38, %v994_v12 }
 0x2d2   :  { %v881_v24 = vadd.f32 %v880_v17, %v3397_v26  ;;  %v991_v37 = vsel %vm990_vm6, %v4014_v42, %v987_v59  ;;  %vm993_vm8 = vcmp.eq.f32.partialorder %v992_v3, 8.507059e+37  ;;  %v1058_v1 = vsub.f32 1.0, %v1041_v63 }
 0x2d3   :  { %v996_v0 = vsel %vm993_vm8, %v995_v7, %v991_v37  ;;  %v1066_v6 = vmul.f32 %v1041_v63, %v3853_v22  ;;  %v1075_v7 = vmul.f32 %v5330_v48, %v5294_v28 }
 0x2d4   :  { %v1046_v20 = vmul.f32 %v961_v25, %v881_v24  ;;  %v1055_v50 = vsub.f32 1.0, %v996_v0  ;;  %v1063_v46 = vmul.f32 %v996_v0, %v3858_v40 }
 0x2d6   :  { %v2678_v9 = vpop.eup %2677  ;;  %v1050_v51 = vadd.f32 %v1046_v20, %v3504_v54 }
 0x2d7   :  { %v1061_v61 = vmul.f32 %v2678_v9, %v1057_v10  ;;  %v2680_v8 = vpop.eup %2679  ;;  %v1085_v9 = vadd.f32 %v1073_v62, %v5291_v5 }
 0x2d8   :  { %2681 = vtanh.f32 %v1050_v51  ;;  %v1059_v17 = vmul.f32 %v2680_v8, %v1055_v50 }
 0x2d9   :  { %v4084_v54 = vadd.f32 %v1065_v14, %v1061_v61  ;;  %v5331_v14 = vld [vmem:[#allocation18_spill] sm:$0xff] }
 0x2da   :  { %v4093_v42 = vadd.f32 %v1063_v46, %v1059_v17 }
 0x2dc   :  { %v1096_v24 = vpack.c.bf16 %v4065_v47, %v4093_v42 }
 0x2de   :  { %v2682_v35 = vpop.eup %2681 }
 0x2df   :  { %v1062_v11 = vmul.f32 %v2682_v35, %v1058_v1  ;;  %v1087_v35 = vadd.f32 %v1075_v7, %v5296_v31  ;;  %v1079_v7 = vmul.f32 %v5330_v48, %v5305_v58 }
 0x2e1   :  { %v4088_v56 = vadd.f32 %v1066_v6, %v1062_v11 }
 0x2e3   :  { %v1097_v18 = vpack.c.bf16 %v4088_v56, %v4084_v54 }
 0x2e5   :  { %1104 = vmatpush.bf16.msrb.mxu0 %v1097_v18  ;;  %v5332_v18 = vld [vmem:[#allocation37_spill] sm:$0xff] }
 0x2e9   :  { %1105 = vmatpush.bf16.msrb.mxu0 %v1096_v24 }
 0x2ec   :  { %2447 = vmatmul.msk.bf16.vlgmr.msrb.gmra.mxu0 %vm317_vm1, %v3865_v2 }
 0x2fc   :  { %2448 = vmatmul.msk.bf16.gmra.mxu0 %vm317_vm1, %v3872_v15 }
 0x30c   :  { %2449 = vmatmul.msk.bf16.gmra.mxu0 %vm317_vm1, %v3879_v34 }
 0x31c   :  { %2450 = vmatmul.msk.bf16.gmra.mxu0 %vm317_vm1, %v3886_v19 }
 0x32c   :  { %2451 = vmatmul.msk.bf16.gmra.mxu0 %vm317_vm1, %v3893_v23 }
 0x33c   :  { %2452 = vmatmul.msk.bf16.gmra.mxu0 %vm317_vm1, %v3900_v53 }
 0x369   :  { %v1107_v22 = vpop.f32.mrf.mxu0 }
 0x36a   :  { %v1108_v45 = vadd.f32 %v1107_v22, %v3087_v33  ;;  %v1076_v22 = vmul.f32 %v5330_v48, %v5299_v21 }
 0x36c   :  { %v1137_v20 = vadd.f32 %v1108_v45, %v5329_v13 }
 0x36e   :  { %v2453_v59 = vmul.f32 -1.442695, %v1137_v20  ;;  %v1078_v20 = vmul.f32 %v5330_v48, %v5301_v38 }
 0x370   :  { %2683 = vpow2.f32 %v2453_v59 }
 0x371   :  { %v1109_v40 = vpop.f32.mrf.mxu0 }
 0x372   :  { %v1110_v10 = vadd.f32 %v1109_v40, %v5290_v30 }
 0x374   :  { %v1138_v51 = vadd.f32 %v1110_v10, %v1085_v9  ;;  %v1088_v10 = vadd.f32 %v1076_v22, %v5302_v60 }
 0x376   :  { %v2454_v12 = vmul.f32 -1.442695, %v1138_v51  ;;  %v2684_v61 = vpop.eup %2683  ;;  %v1090_v51 = vadd.f32 %v1078_v20, %v5303_v4 }
 0x377   :  { %v4117_v63 = vadd.f32 1.0, %v2684_v61 }
 0x378   :  { %2685 = vpow2.f32 %v2454_v12 }
 0x379   :  { %v1112_v25 = vpop.f32.mrf.mxu0  ;;  %2687 = vrcp.f32 %v4117_v63  ;;  %vm1162_vm10 = vweird.f32 %v4117_v63 }
 0x37a   :  { %v1113_v52 = vadd.f32 %v1112_v25, %v5292_v49 }
 0x37c   :  { %v1139_v36 = vadd.f32 %v1113_v52, %v5331_v14 }
 0x37e   :  { %v2455_v0 = vmul.f32 -1.442695, %v1139_v36  ;;  %v2686_v1 = vpop.eup %2685 }
 0x37f   :  { %v4124_v6 = vadd.f32 1.0, %v2686_v1  ;;  %v4128_v24 = vpop.eup %2687 }
 0x380   :  { %2689 = vpow2.f32 %v2455_v0  ;;  %v1158_v62 = vmul.f32 %v4128_v24, %v4117_v63  ;;  %vm1163_vm9 = vweird.f32 %v4128_v24 }
 0x381   :  { %v1114_v3 = vpop.f32.mrf.mxu0  ;;  %2691 = vrcp.f32 %v4124_v6  ;;  %vm1164_vm11 = vmor %vm1162_vm10, %vm1163_vm9  ;;  %vm1177_vm14 = vweird.f32 %v4124_v6 }
 0x382   :  { %v1115_v8 = vadd.f32 %v1114_v3, %v5295_v16  ;;  %v1159_v14 = vsub.f32 1.0, %v1158_v62 }
 0x384   :  { %v1140_v50 = vadd.f32 %v1115_v8, %v1087_v35 }
 0x386   :  { %v2456_v40 = vmul.f32 -1.442695, %v1140_v50  ;;  %v2690_v25 = vpop.eup %2689 }
 0x387   :  { %v4139_v9 = vadd.f32 1.0, %v2690_v25  ;;  %v4143_v52 = vpop.eup %2691 }
 0x388   :  { %v1173_v1 = vmul.f32 %v4143_v52, %v4124_v6  ;;  %vm1178_vm13 = vweird.f32 %v4143_v52 }
 0x389   :  { %v1117_v37 = vpop.f32.mrf.mxu0  ;;  %vm1179_vm15 = vmor %vm1177_vm14, %vm1178_vm13  ;;  %vm1192_vm4 = vweird.f32 %v4139_v9 }
 0x38a   :  { %v1118_v13 = vadd.f32 %v1117_v37, %v5300_v57  ;;  %v1174_v22 = vsub.f32 1.0, %v1173_v1 }
 0x38c   :  { %v1217_v12 = vadd.f32 %v1118_v13, %v1088_v10  ;;  %v1168_v13 = vand.u32 2147483648, %v4117_v63  ;;  %v1166_v10 = vand.u32 2147483647, %v4117_v63 }
 0x38e   :  { %v2457_v0 = vmul.f32 -1.442695, %v1217_v12  ;;  %vm1167_vm12 = vcmp.eq.f32.partialorder %v1166_v10, 8.507059e+37 }
 0x391   :  { %v1119_v11 = vpop.f32.mrf.mxu0 }
 0x392   :  { %v1120_v17 = vadd.f32 %v1119_v11, %v5297_v27  ;;  %v1160_v11 = vmul.f32 %v4128_v24, %v1159_v14 }
 0x394   :  { %v1218_v46 = vadd.f32 %v1120_v17, %v5332_v18  ;;  %v1091_v17 = vadd.f32 %v1079_v7, %v5306_v41  ;;  %v1161_v25 = vadd.f32 %v4128_v24, %v1160_v11  ;;  %v1080_v7 = vmul.f32 %v5330_v48, %v3301_v39 }
 0x395   :  { %v1181_v48 = vand.u32 2147483647, %v4124_v6 }
 0x396   :  { %v2458_v45 = vmul.f32 -1.442695, %v1218_v46 }
 0x397   :  { %vm1182_vm0 = vcmp.eq.f32.partialorder %v1181_v48, 8.507059e+37 }
 0x398   :  { %2693 = vpow2.f32 %v2458_v45 }
 0x399   :  { %v1122_v59 = vpop.f32.mrf.mxu0  ;;  %2695 = vpow2.f32 %v2456_v40 }
 0x39a   :  { %v1123_v3 = vadd.f32 %v1122_v59, %v5304_v32  ;;  %2697 = vrcp.f32 %v4139_v9 }
 0x39c   :  { %v1219_v61 = vadd.f32 %v1123_v3, %v1090_v51  ;;  %v1175_v3 = vmul.f32 %v4143_v52, %v1174_v22 }
 0x39e   :  { %v2694_v36 = vpop.eup %2693  ;;  %v2459_v37 = vmul.f32 -1.442695, %v1219_v61  ;;  %v1165_v61 = vsel %vm1164_vm11, %v4128_v24, %v1161_v25 }
 0x39f   :  { %v4148_v8 = vadd.f32 1.0, %v2694_v36  ;;  %v2696_v35 = vpop.eup %2695 }
 0x3a0   :  { %2699 = vpow2.f32 %v2459_v37  ;;  %v4156_v46 = vadd.f32 1.0, %v2696_v35  ;;  %v4158_v40 = vpop.eup %2697  ;;  %v1169_v37 = vor.u32 1.1754944e-38, %v1168_v13  ;;  %v1176_v35 = vadd.f32 %v4143_v52, %v1175_v3 }
 0x3a1   :  { %2701 = vrcp.f32 %v4148_v8  ;;  %v1124_v50 = vpop.f32.mrf.mxu0  ;;  %v1188_v12 = vmul.f32 %v4158_v40, %v4139_v9  ;;  %vm1193_vm2 = vweird.f32 %v4158_v40  ;;  %vm1257_vm6 = vweird.f32 %v4148_v8 }
 0x3a2   :  { %v1125_v18 = vadd.f32 %v1124_v50, %v5307_v44  ;;  %2703 = vpow2.f32 %v2457_v0  ;;  %v1170_v1 = vsel %vm1167_vm12, %v1169_v37, %v1165_v61  ;;  %v1180_v3 = vsel %vm1179_vm15, %v4143_v52, %v1176_v35  ;;  %v5334_v37 = vld [vmem:[#allocation44_spill] sm:$0xff]  ;;  %vm4212_vm5 = vmor %vm1192_vm4, %vm1193_vm2 }
 0x3a3   :  { %2705 = vrcp.f32 %v4156_v46  ;;  %v1189_v24 = vsub.f32 1.0, %v1188_v12  ;;  %v1261_v48 = vand.u32 2147483647, %v4148_v8  ;;  %vm1207_vm13 = vweird.f32 %v4156_v46 }
 0x3a4   :  { %v1220_v45 = vadd.f32 %v1125_v18, %v1091_v17  ;;  %v5333_v17 = vld [vmem:[#allocation60_spill] sm:$0xff] }
 0x3a5   :  { %v1092_v18 = vadd.f32 %v1080_v7, %v5333_v17  ;;  %v1190_v12 = vmul.f32 %v4158_v40, %v1189_v24  ;;  %vm1262_vm8 = vcmp.eq.f32.partialorder %v1261_v48, 8.507059e+37 }
 0x3a6   :  { %v2700_v20 = vpop.eup %2699  ;;  %v2460_v62 = vmul.f32 -1.442695, %v1220_v45  ;;  %v1183_v45 = vand.u32 2147483648, %v4124_v6 }
 0x3a7   :  { %v4165_v59 = vpop.eup %2701  ;;  %v4168_v51 = vadd.f32 1.0, %v2700_v20 }
 0x3a8   :  { %2707 = vpow2.f32 %v2460_v62  ;;  %v1253_v14 = vmul.f32 %v4165_v59, %v4148_v8  ;;  %v2704_v36 = vpop.eup %2703  ;;  %vm1258_vm3 = vweird.f32 %v4165_v59 }
 0x3a9   :  { %2709 = vrcp.f32 %v4168_v51  ;;  %v1127_v63 = vpop.f32.mrf.mxu0  ;;  %v4182_v50 = vadd.f32 1.0, %v2704_v36  ;;  %v4186_v25 = vpop.eup %2705  ;;  %vm4223_vm7 = vmor %vm1257_vm6, %vm1258_vm3  ;;  %vm1272_vm12 = vweird.f32 %v4168_v51  ;;  %v1276_v48 = vand.u32 2147483647, %v4168_v51 }
 0x3aa   :  { %v1128_v0 = vadd.f32 %v1127_v63, %v3569_v55  ;;  %v1254_v11 = vsub.f32 1.0, %v1253_v14  ;;  %v1184_v14 = vor.u32 1.1754944e-38, %v1183_v45  ;;  %v1203_v6 = vmul.f32 %v4186_v25, %v4156_v46 }
 0x3ab   :  { %2711 = vrcp.f32 %v4182_v50  ;;  %v1198_v45 = vand.u32 2147483648, %v4139_v9  ;;  %vm1208_vm11 = vweird.f32 %v4186_v25 }
 0x3ac   :  { %v1297_v22 = vmul.f32 %v1170_v1, %v1128_v0  ;;  %v1255_v61 = vmul.f32 %v4165_v59, %v1254_v11  ;;  %v1185_v52 = vsel %vm1182_vm0, %v1184_v14, %v1180_v3  ;;  %v1191_v0 = vadd.f32 %v4158_v40, %v1190_v12  ;;  %v5337_v3 = vld [vmem:[#allocation50_spill] sm:$0xff]  ;;  %vm4257_vm15 = vmor %vm1207_vm13, %vm1208_vm11 }
 0x3ad   :  { %v1204_v11 = vsub.f32 1.0, %v1203_v6  ;;  %vm1277_vm0 = vcmp.eq.f32.partialorder %v1276_v48, 8.507059e+37 }
 0x3ae   :  { %v2708_v13 = vpop.eup %2707  ;;  %v4190_v20 = vadd.f32 %v1297_v22, %v1092_v18  ;;  %v1256_v35 = vadd.f32 %v4165_v59, %v1255_v61  ;;  %v1263_v18 = vand.u32 2147483648, %v4148_v8  ;;  %v1196_v61 = vand.u32 2147483647, %v4139_v9 }
 0x3af   :  { %v4192_v62 = vpop.eup %2709  ;;  %v4194_v10 = vadd.f32 1.0, %v2708_v13 }
 0x3b0   :  { %v1268_v36 = vmul.f32 %v4192_v62, %v4168_v51  ;;  %v1260_v8 = vsel %vm4223_vm7, %v4165_v59, %v1256_v35  ;;  %vm1197_vm9 = vcmp.eq.f32.partialorder %v1196_v61, 8.507059e+37  ;;  %vm1273_vm10 = vweird.f32 %v4192_v62 }
 0x3b1   :  { %2713 = vrcp.f32 %v4194_v10  ;;  %v1129_v63 = vpop.f32.mrf.mxu0  ;;  %v4219_v13 = vpop.eup %2711  ;;  %vm4253_vm14 = vmor %vm1272_vm12, %vm1273_vm10  ;;  %vm1242_vm7 = vweird.f32 %v4182_v50 }
 0x3b2   :  { %v1130_v7 = vadd.f32 %v1129_v63, %v5334_v37  ;;  %v1269_v1 = vsub.f32 1.0, %v1268_v36  ;;  %v1195_v36 = vsel %vm4212_vm5, %v4158_v40, %v1191_v0  ;;  %v1238_v37 = vmul.f32 %v4219_v13, %v4182_v50 }
 0x3b3   :  { %v1213_v0 = vand.u32 2147483648, %v4156_v46  ;;  %vm1243_vm4 = vweird.f32 %v4219_v13  ;;  %vm1287_vm5 = vweird.f32 %v4194_v10 }
 0x3b4   :  { %v1298_v24 = vmul.f32 %v1185_v52, %v1130_v7  ;;  %v1270_v63 = vmul.f32 %v4192_v62, %v1269_v1  ;;  %v1205_v7 = vmul.f32 %v4186_v25, %v1204_v11  ;;  %v1264_v52 = vor.u32 1.1754944e-38, %v1263_v18 }
 0x3b6   :  { %v1302_v12 = vadd.f32 %v1298_v24, %v5337_v3  ;;  %v1199_v3 = vor.u32 1.1754944e-38, %v1198_v45  ;;  %v1265_v1 = vsel %vm1262_vm8, %v1264_v52, %v1260_v8  ;;  %v1271_v35 = vadd.f32 %v4192_v62, %v1270_v63  ;;  %vm1244_vm8 = vmor %vm1242_vm7, %vm1243_vm4 }
 0x3b7   :  { %v4227_v6 = vpop.eup %2713  ;;  %v1206_v18 = vadd.f32 %v4186_v25, %v1205_v7  ;;  %v1278_v45 = vand.u32 2147483648, %v4168_v51  ;;  %v1310_v61 = vsub.f32 1.0, %v1265_v1  ;;  %v1211_v63 = vand.u32 2147483647, %v4156_v46 }
 0x3b8   :  { %2715 = vtanh.f32 %v1302_v12  ;;  %v1283_v9 = vmul.f32 %v4227_v6, %v4194_v10  ;;  %v1200_v59 = vsel %vm1197_vm9, %v1199_v3, %v1195_v36  ;;  %v1239_v12 = vsub.f32 1.0, %v1238_v37  ;;  %v5340_v36 = vld [vmem:[#allocation47_spill] sm:$0xff] }
 0x3b9   :  { %v1132_v24 = vpop.f32.mrf.mxu0  ;;  %v1275_v51 = vsel %vm4253_vm14, %v4192_v62, %v1271_v35  ;;  %v1210_v46 = vsel %vm4257_vm15, %v4186_v25, %v1206_v18  ;;  %v1279_v3 = vor.u32 1.1754944e-38, %v1278_v45  ;;  %vm1212_vm2 = vcmp.eq.f32.partialorder %v1211_v63, 8.507059e+37 }
 0x3ba   :  { %v1133_v40 = vadd.f32 %v1132_v24, %v3312_v43  ;;  %v1284_v11 = vsub.f32 1.0, %v1283_v9  ;;  %v1318_v24 = vmul.f32 %v1265_v1, %v4065_v47  ;;  %vm1288_vm3 = vweird.f32 %v4227_v6 }
 0x3bb   :  { %v1280_v35 = vsel %vm1277_vm0, %v1279_v3, %v1275_v51  ;;  %v1293_v25 = vand.u32 2147483648, %v4194_v10  ;;  %vm1289_vm6 = vmor %vm1287_vm5, %vm1288_vm3 }
 0x3bc   :  { %v1299_v22 = vmul.f32 %v1200_v59, %v1133_v40  ;;  %v1285_v37 = vmul.f32 %v4227_v6, %v1284_v11  ;;  %v1214_v59 = vor.u32 1.1754944e-38, %v1213_v0  ;;  %v1291_v0 = vand.u32 2147483647, %v4194_v10 }
 0x3bd   :  { %v1311_v18 = vsub.f32 1.0, %v1280_v35  ;;  %v1319_v10 = vmul.f32 %v1280_v35, %v4084_v54  ;;  %v1294_v7 = vor.u32 1.1754944e-38, %v1293_v25  ;;  %v5347_v25 = vld [vmem:[#allocation20_spill] sm:$0xff] }
 0x3be   :  { %v2716_v14 = vpop.eup %2715  ;;  %v1303_v8 = vadd.f32 %v1299_v22, %v5340_v36  ;;  %v1240_v22 = vmul.f32 %v4219_v13, %v1239_v12  ;;  %v1215_v11 = vsel %vm1212_vm2, %v1214_v59, %v1210_v46  ;;  %v1286_v47 = vadd.f32 %v4227_v6, %v1285_v37  ;;  %v5345_v12 = vld [vmem:[#allocation53_spill] sm:$0xff] }
 0x3bf   :  { %v1314_v52 = vmul.f32 %v2716_v14, %v1310_v61  ;;  %v1246_v14 = vand.u32 2147483647, %v4182_v50  ;;  %vm1292_vm9 = vcmp.eq.f32.partialorder %v1291_v0, 8.507059e+37 }
 0x3c0   :  { %2717 = vtanh.f32 %v1303_v8  ;;  %v1241_v45 = vadd.f32 %v4219_v13, %v1240_v22  ;;  %v1248_v8 = vand.u32 2147483648, %v4182_v50  ;;  %v1290_v63 = vsel %vm1289_vm6, %v4227_v6, %v1286_v47  ;;  %v5346_v47 = vld [vmem:[#allocation8_spill] sm:$0xff] }
 0x3c1   :  { %v1134_v40 = vpop.f32.mrf.mxu0  ;;  %v4270_v36 = vadd.f32 %v1318_v24, %v1314_v52  ;;  %2719 = vtanh.f32 %v4190_v20  ;;  %v1295_v52 = vsel %vm1292_vm9, %v1294_v7, %v1290_v63  ;;  %vm1247_vm10 = vcmp.eq.f32.partialorder %v1246_v14, 8.507059e+37  ;;  %v5349_v14 = vld [vmem:[#allocation23_spill] sm:$0xff] }
 0x3c2   :  { %v1135_v62 = vadd.f32 %v1134_v40, %v3397_v26  ;;  %v1245_v37 = vsel %vm1244_vm8, %v4219_v13, %v1241_v45  ;;  %v1249_v24 = vor.u32 1.1754944e-38, %v1248_v8  ;;  %v1312_v46 = vsub.f32 1.0, %v1295_v52 }
 0x3c3   :  { %v1320_v54 = vmul.f32 %v1295_v52, %v4088_v56 }
 0x3c4   :  { %v1300_v1 = vmul.f32 %v1215_v11, %v1135_v62  ;;  %v1250_v50 = vsel %vm1247_vm10, %v1249_v24, %v1245_v37 }
 0x3c5   :  { %v1309_v40 = vsub.f32 1.0, %v1250_v50  ;;  %v1317_v35 = vmul.f32 %v1250_v50, %v4093_v42 }
 0x3c6   :  { %v2718_v48 = vpop.eup %2717  ;;  %v1304_v61 = vadd.f32 %v1300_v1, %v5345_v12 }
 0x3c7   :  { %v1315_v9 = vmul.f32 %v2718_v48, %v1311_v18  ;;  %v2720_v20 = vpop.eup %2719 }
 0x3c8   :  { %2721 = vtanh.f32 %v1304_v61  ;;  %v1313_v22 = vmul.f32 %v2720_v20, %v1309_v40 }
 0x3c9   :  { %v4289_v51 = vadd.f32 %v1319_v10, %v1315_v9 }
 0x3ca   :  { %v4298_v13 = vadd.f32 %v1317_v35, %v1313_v22 }
 0x3cc   :  { %v1350_v11 = vpack.c.bf16 %v4270_v36, %v4298_v13 }
 0x3ce   :  { %v2722_v6 = vpop.eup %2721 }
 0x3cf   :  { %v1316_v3 = vmul.f32 %v2722_v6, %v1312_v46 }
 0x3d1   :  { %v4293_v59 = vadd.f32 %v1320_v54, %v1316_v3  ;;  %v5350_v3 = vld [vmem:[#allocation38_spill] sm:$0xff] }
 0x3d3   :  { %v1351_v62 = vpack.c.bf16 %v4293_v59, %v4289_v51 }
 0x3d5   :  { %1358 = vmatpush.bf16.msrb.mxu1 %v1351_v62 }
 0x3d9   :  { %1359 = vmatpush.bf16.msrb.mxu1 %v1350_v11 }
 0x3dc   :  { %2461 = vmatmul.msk.bf16.vlgmr.msrb.gmra.mxu1 %vm317_vm1, %v3865_v2 }
 0x3dd   :  { %2363 = vmatpush.msra.mxu1 %v5346_v47 }
 0x3ec   :  { %2462 = vmatmul.msk.bf16.gmra.mxu1 %vm317_vm1, %v3872_v15  ;;  %v5348_v15 = vld [vmem:[#allocation13_spill] sm:$0xff] }
 0x3ed   :  { %v1327_v18 = vmul.f32 %v5348_v15, %v3077_v29  ;;  %v1329_v10 = vmul.f32 %v5348_v15, %v5294_v28  ;;  %v1330_v22 = vmul.f32 %v5348_v15, %v5299_v21 }
 0x3ef   :  { %v1341_v24 = vadd.f32 %v1329_v10, %v5296_v31 }
 0x3fc   :  { %2463 = vmatmul.msk.bf16.gmra.mxu1 %vm317_vm1, %v3879_v34 }
 0x40c   :  { %2464 = vmatmul.msk.bf16.gmra.mxu1 %vm317_vm1, %v3886_v19  ;;  %v1339_v19 = vadd.f32 %v1327_v18, %v5291_v5 }
 0x41c   :  { %2465 = vmatmul.msk.bf16.gmra.mxu1 %vm317_vm1, %v3893_v23 }
 0x42c   :  { %2466 = vmatmul.msk.bf16.gmra.mxu1 %vm317_vm1, %v3900_v53 }
 0x459   :  { %v1361_v56 = vpop.f32.mrf.mxu1 }
 0x45a   :  { %v1362_v1 = vadd.f32 %v1361_v56, %v3087_v33  ;;  %v1332_v56 = vmul.f32 %v5348_v15, %v5301_v38 }
 0x45c   :  { %v1391_v0 = vadd.f32 %v1362_v1, %v5347_v25  ;;  %v1342_v1 = vadd.f32 %v1330_v22, %v5302_v60 }
 0x45e   :  { %v2467_v45 = vmul.f32 -1.442695, %v1391_v0  ;;  %v1344_v0 = vadd.f32 %v1332_v56, %v5303_v4 }
 0x460   :  { %2723 = vpow2.f32 %v2467_v45 }
 0x461   :  { %v1363_v42 = vpop.f32.mrf.mxu1 }
 0x462   :  { %v1364_v34 = vadd.f32 %v1363_v42, %v5290_v30 }
 0x464   :  { %v1392_v48 = vadd.f32 %v1364_v34, %v1339_v19 }
 0x466   :  { %v2468_v12 = vmul.f32 -1.442695, %v1392_v48  ;;  %v2724_v61 = vpop.eup %2723 }
 0x467   :  { %v4323_v9 = vadd.f32 1.0, %v2724_v61 }
 0x468   :  { %2725 = vpow2.f32 %v2468_v12 }
 0x469   :  { %v1366_v2 = vpop.f32.mrf.mxu1  ;;  %2727 = vrcp.f32 %v4323_v9  ;;  %vm1416_vm12 = vweird.f32 %v4323_v9 }
 0x46a   :  { %v1367_v53 = vadd.f32 %v1366_v2, %v5292_v49 }
 0x46c   :  { %v1393_v8 = vadd.f32 %v1367_v53, %v5349_v14  ;;  %v1333_v53 = vmul.f32 %v5348_v15, %v5305_v58 }
 0x46e   :  { %v2469_v7 = vmul.f32 -1.442695, %v1393_v8  ;;  %v2726_v52 = vpop.eup %2725 }
 0x46f   :  { %v4330_v20 = vadd.f32 1.0, %v2726_v52  ;;  %v4334_v40 = vpop.eup %2727 }
 0x470   :  { %2729 = vpow2.f32 %v2469_v7  ;;  %v1412_v42 = vmul.f32 %v4334_v40, %v4323_v9  ;;  %vm1417_vm11 = vweird.f32 %v4334_v40 }
 0x471   :  { %v1368_v23 = vpop.f32.mrf.mxu1  ;;  %2731 = vrcp.f32 %v4330_v20  ;;  %vm4376_vm13 = vmor %vm1416_vm12, %vm1417_vm11  ;;  %vm1431_vm0 = vweird.f32 %v4330_v20 }
 0x472   :  { %v1369_v37 = vadd.f32 %v1368_v23, %v5295_v16  ;;  %v1413_v48 = vsub.f32 1.0, %v1412_v42 }
 0x474   :  { %v1394_v46 = vadd.f32 %v1369_v37, %v1341_v24  ;;  %v1414_v10 = vmul.f32 %v4334_v40, %v1413_v48  ;;  %v1345_v37 = vadd.f32 %v1333_v53, %v5306_v41 }
 0x476   :  { %v2470_v62 = vmul.f32 -1.442695, %v1394_v46  ;;  %v2730_v11 = vpop.eup %2729 }
 0x477   :  { %v4345_v25 = vadd.f32 1.0, %v2730_v11  ;;  %v4349_v45 = vpop.eup %2731 }
 0x478   :  { %v1427_v8 = vmul.f32 %v4349_v45, %v4330_v20  ;;  %vm1432_vm15 = vweird.f32 %v4349_v45 }
 0x479   :  { %v1371_v63 = vpop.f32.mrf.mxu1  ;;  %vm1433_vm2 = vmor %vm1431_vm0, %vm1432_vm15  ;;  %vm1446_vm6 = vweird.f32 %v4345_v25 }
 0x47a   :  { %v1372_v47 = vadd.f32 %v1371_v63, %v5300_v57 }
 0x47c   :  { %v1471_v34 = vadd.f32 %v1372_v47, %v1342_v1 }
 0x47e   :  { %v2471_v61 = vmul.f32 -1.442695, %v1471_v34 }
 0x481   :  { %v1373_v50 = vpop.f32.mrf.mxu1 }
 0x482   :  { %v1374_v6 = vadd.f32 %v1373_v50, %v5297_v27  ;;  %v1428_v50 = vsub.f32 1.0, %v1427_v8 }
 0x484   :  { %v1472_v54 = vadd.f32 %v1374_v6, %v5350_v3  ;;  %v1415_v3 = vadd.f32 %v4334_v40, %v1414_v10  ;;  %v1429_v42 = vmul.f32 %v4349_v45, %v1428_v50  ;;  %v1437_v10 = vand.u32 2147483648, %v4330_v20 }
 0x486   :  { %v2472_v35 = vmul.f32 -1.442695, %v1472_v54  ;;  %v1422_v54 = vand.u32 2147483648, %v4323_v9  ;;  %v1430_v53 = vadd.f32 %v4349_v45, %v1429_v42  ;;  %v5353_v42 = vld [vmem:[#allocation44_spill] sm:$0xff] }
 0x488   :  { %2733 = vpow2.f32 %v2472_v35  ;;  %v1420_v35 = vand.u32 2147483647, %v4323_v9  ;;  %v1419_v9 = vsel %vm4376_vm13, %v4334_v40, %v1415_v3  ;;  %v1423_v34 = vor.u32 1.1754944e-38, %v1422_v54 }
 0x489   :  { %v1376_v2 = vpop.f32.mrf.mxu1  ;;  %2735 = vpow2.f32 %v2470_v62  ;;  %v1434_v3 = vsel %vm1433_vm2, %v4349_v45, %v1430_v53 }
 0x48a   :  { %v1377_v18 = vadd.f32 %v1376_v2, %v5304_v32  ;;  %2737 = vrcp.f32 %v4345_v25  ;;  %vm1421_vm14 = vcmp.eq.f32.partialorder %v1420_v35, 8.507059e+37 }
 0x48c   :  { %v1473_v19 = vadd.f32 %v1377_v18, %v1344_v0 }
 0x48e   :  { %v2734_v23 = vpop.eup %2733  ;;  %v2473_v12 = vmul.f32 -1.442695, %v1473_v19  ;;  %v1334_v19 = vmul.f32 %v5348_v15, %v3301_v39  ;;  %v1435_v15 = vand.u32 2147483647, %v4330_v20  ;;  %v1438_v20 = vor.u32 1.1754944e-38, %v1437_v10 }
 0x48f   :  { %v4354_v14 = vadd.f32 1.0, %v2734_v23  ;;  %v2736_v63 = vpop.eup %2735 }
 0x490   :  { %2739 = vpow2.f32 %v2473_v12  ;;  %v4362_v24 = vadd.f32 1.0, %v2736_v63  ;;  %v4364_v46 = vpop.eup %2737  ;;  %v1424_v12 = vsel %vm1421_vm14, %v1423_v34, %v1419_v9  ;;  %v1346_v40 = vadd.f32 %v1334_v19, %v5333_v17 }
 0x491   :  { %2741 = vrcp.f32 %v4354_v14  ;;  %v1378_v7 = vpop.f32.mrf.mxu1  ;;  %v1442_v1 = vmul.f32 %v4364_v46, %v4345_v25  ;;  %vm1436_vm3 = vcmp.eq.f32.partialorder %v1435_v15, 8.507059e+37  ;;  %vm1447_vm4 = vweird.f32 %v4364_v46 }
 0x492   :  { %v1379_v52 = vadd.f32 %v1378_v7, %v5307_v44  ;;  %2743 = vpow2.f32 %v2471_v61  ;;  %v1439_v45 = vsel %vm1436_vm3, %v1438_v20, %v1434_v3  ;;  %v1517_v19 = vand.u32 2147483648, %v4354_v14  ;;  %vm4424_vm7 = vmor %vm1446_vm6, %vm1447_vm4 }
 0x493   :  { %2745 = vrcp.f32 %v4362_v24  ;;  %v1443_v61 = vsub.f32 1.0, %v1442_v1  ;;  %vm1511_vm8 = vweird.f32 %v4354_v14  ;;  %vm1461_vm15 = vweird.f32 %v4362_v24 }
 0x494   :  { %v1474_v6 = vadd.f32 %v1379_v52, %v1345_v37 }
 0x495   :  { %v1444_v54 = vmul.f32 %v4364_v46, %v1443_v61  ;;  %v5356_v61 = vld [vmem:[#allocation51_spill] sm:$0xff] }
 0x496   :  { %v2740_v22 = vpop.eup %2739  ;;  %v2474_v62 = vmul.f32 -1.442695, %v1474_v6 }
 0x497   :  { %v4371_v11 = vpop.eup %2741  ;;  %v4374_v47 = vadd.f32 1.0, %v2740_v22  ;;  %v1445_v9 = vadd.f32 %v4364_v46, %v1444_v54 }
 0x498   :  { %v1507_v2 = vmul.f32 %v4371_v11, %v4354_v14  ;;  %2747 = vpow2.f32 %v2474_v62  ;;  %v2744_v0 = vpop.eup %2743  ;;  %vm1512_vm5 = vweird.f32 %v4371_v11 }
 0x499   :  { %2749 = vrcp.f32 %v4374_v47  ;;  %v1381_v18 = vpop.f32.mrf.mxu1  ;;  %v4394_v8 = vadd.f32 1.0, %v2744_v0  ;;  %v4398_v7 = vpop.eup %2745  ;;  %vm4435_vm9 = vmor %vm1511_vm8, %vm1512_vm5  ;;  %v1449_v3 = vsel %vm4424_vm7, %v4364_v46, %v1445_v9  ;;  %v1467_v46 = vand.u32 2147483648, %v4362_v24 }
 0x49a   :  { %v1382_v48 = vadd.f32 %v1381_v18, %v3569_v55  ;;  %v1508_v23 = vsub.f32 1.0, %v1507_v2  ;;  %v1457_v35 = vmul.f32 %v4398_v7, %v4362_v24  ;;  %vm1462_vm13 = vweird.f32 %v4398_v7 }
 0x49b   :  { %2751 = vrcp.f32 %v4394_v8  ;;  %vm1526_vm14 = vweird.f32 %v4374_v47  ;;  %vm4470_vm2 = vmor %vm1461_vm15, %vm1462_vm13 }
 0x49c   :  { %v1551_v63 = vmul.f32 %v1424_v12, %v1382_v48  ;;  %v1509_v22 = vmul.f32 %v4371_v11, %v1508_v23  ;;  %v1458_v34 = vsub.f32 1.0, %v1457_v35  ;;  %v1452_v23 = vand.u32 2147483648, %v4345_v25 }
 0x49d   :  { %v1515_v12 = vand.u32 2147483647, %v4354_v14 }
 0x49e   :  { %v2748_v37 = vpop.eup %2747  ;;  %v4402_v52 = vadd.f32 %v1551_v63, %v1346_v40  ;;  %v1510_v0 = vadd.f32 %v4371_v11, %v1509_v22  ;;  %v1450_v63 = vand.u32 2147483647, %v4345_v25  ;;  %v1459_v25 = vmul.f32 %v4398_v7, %v1458_v34 }
 0x49f   :  { %v4404_v50 = vpop.eup %2749  ;;  %v4406_v6 = vadd.f32 1.0, %v2748_v37  ;;  %v1518_v22 = vor.u32 1.1754944e-38, %v1517_v19  ;;  %v1453_v35 = vor.u32 1.1754944e-38, %v1452_v23  ;;  %vm1516_vm10 = vcmp.eq.f32.partialorder %v1515_v12, 8.507059e+37  ;;  %v5359_v12 = vld [vmem:[#allocation48_spill] sm:$0xff] }
 0x4a0   :  { %v1522_v62 = vmul.f32 %v4404_v50, %v4374_v47  ;;  %v1514_v14 = vsel %vm4435_vm9, %v4371_v11, %v1510_v0  ;;  %vm1451_vm11 = vcmp.eq.f32.partialorder %v1450_v63, 8.507059e+37  ;;  %vm1527_vm12 = vweird.f32 %v4404_v50 }
 0x4a1   :  { %2753 = vrcp.f32 %v4406_v6  ;;  %v1383_v56 = vpop.f32.mrf.mxu1  ;;  %v4431_v53 = vpop.eup %2751  ;;  %v1460_v0 = vadd.f32 %v4398_v7, %v1459_v25  ;;  %v1530_v19 = vand.u32 2147483647, %v4374_v47  ;;  %vm4465_vm0 = vmor %vm1526_vm14, %vm1527_vm12  ;;  %vm1541_vm7 = vweird.f32 %v4406_v6 }
 0x4a2   :  { %v1384_v1 = vadd.f32 %v1383_v56, %v5353_v42  ;;  %v1523_v2 = vsub.f32 1.0, %v1522_v62  ;;  %v1492_v62 = vmul.f32 %v4431_v53, %v4394_v8  ;;  %vm1497_vm6 = vweird.f32 %v4431_v53 }
 0x4a3   :  { %vm1531_vm3 = vcmp.eq.f32.partialorder %v1530_v19, 8.507059e+37  ;;  %vm1496_vm9 = vweird.f32 %v4394_v8 }
 0x4a4   :  { %v1552_v18 = vmul.f32 %v1439_v45, %v1384_v1  ;;  %v1524_v37 = vmul.f32 %v4404_v50, %v1523_v2  ;;  %v1519_v1 = vsel %vm1516_vm10, %v1518_v22, %v1514_v14  ;;  %v1454_v45 = vsel %vm1451_vm11, %v1453_v35, %v1449_v3  ;;  %vm1498_vm10 = vmor %vm1496_vm9, %vm1497_vm6 }
 0x4a5   :  { %v1493_v34 = vsub.f32 1.0, %v1492_v62  ;;  %v1564_v48 = vsub.f32 1.0, %v1519_v1  ;;  %v1572_v14 = vmul.f32 %v1519_v1, %v4270_v36  ;;  %v1468_v22 = vor.u32 1.1754944e-38, %v1467_v46 }
 0x4a6   :  { %v1556_v40 = vadd.f32 %v1552_v18, %v5356_v61  ;;  %v1525_v2 = vadd.f32 %v4404_v50, %v1524_v37  ;;  %v1532_v18 = vand.u32 2147483648, %v4374_v47  ;;  %v1545_v46 = vand.u32 2147483647, %v4406_v6 }
 0x4a7   :  { %v4439_v15 = vpop.eup %2753  ;;  %v1494_v62 = vmul.f32 %v4431_v53, %v1493_v34  ;;  %v1502_v34 = vand.u32 2147483648, %v4394_v8 }
 0x4a8   :  { %v1537_v54 = vmul.f32 %v4439_v15, %v4406_v6  ;;  %2755 = vtanh.f32 %v1556_v40  ;;  %v1465_v40 = vand.u32 2147483647, %v4362_v24  ;;  %v1529_v47 = vsel %vm4465_vm0, %v4404_v50, %v1525_v2 }
 0x4a9   :  { %v1386_v20 = vpop.f32.mrf.mxu1  ;;  %v1464_v24 = vsel %vm4470_vm2, %v4398_v7, %v1460_v0  ;;  %vm1542_vm5 = vweird.f32 %v4439_v15  ;;  %v1547_v7 = vand.u32 2147483648, %v4406_v6  ;;  %vm1546_vm11 = vcmp.eq.f32.partialorder %v1545_v46, 8.507059e+37  ;;  %v5365_v46 = vld [vmem:[#allocation24_spill] sm:$0xff] }
 0x4aa   :  { %v1387_v56 = vadd.f32 %v1386_v20, %v3312_v43  ;;  %v1538_v11 = vsub.f32 1.0, %v1537_v54  ;;  %v1533_v54 = vor.u32 1.1754944e-38, %v1532_v18  ;;  %vm1466_vm4 = vcmp.eq.f32.partialorder %v1465_v40, 8.507059e+37  ;;  %vm1543_vm8 = vmor %vm1541_vm7, %vm1542_vm5 }
 0x4ab   :  { %v1500_v18 = vand.u32 2147483647, %v4394_v8  ;;  %v1503_v63 = vor.u32 1.1754944e-38, %v1502_v34 }
 0x4ac   :  { %v1553_v9 = vmul.f32 %v1454_v45, %v1387_v56  ;;  %v1539_v10 = vmul.f32 %v4439_v15, %v1538_v11  ;;  %v1534_v50 = vsel %vm1531_vm3, %v1533_v54, %v1529_v47  ;;  %v1469_v56 = vsel %vm1466_vm4, %v1468_v22, %v1464_v24  ;;  %v4524_v22 = vld [vmem:[%s5148_s4 + $0x8] sm:$0xff] }
 0x4ad   :  { %v1565_v11 = vsub.f32 1.0, %v1534_v50  ;;  %v1495_v45 = vadd.f32 %v4431_v53, %v1494_v62  ;;  %v1573_v6 = vmul.f32 %v1534_v50, %v4289_v51  ;;  %vm1501_vm12 = vcmp.eq.f32.partialorder %v1500_v18, 8.507059e+37  ;;  %v4538_v62 = vld [vmem:[%s5148_s4 + $0x18] sm:$0xff]  ;;  %v4552_v50 = vld [vmem:[%s5148_s4 + $0x28] sm:$0xff] }
 0x4ae   :  { %v2756_v23 = vpop.eup %2755  ;;  %v1557_v61 = vadd.f32 %v1553_v9, %v5359_v12  ;;  %v1540_v36 = vadd.f32 %v4439_v15, %v1539_v10  ;;  %v5364_v9 = vld [vmem:[#allocation54_spill] sm:$0xff] }
 0x4af   :  { %v1568_v3 = vmul.f32 %v2756_v23, %v1564_v48  ;;  %v1548_v23 = vor.u32 1.1754944e-38, %v1547_v7 }
 0x4b0   :  { %2757 = vtanh.f32 %v1557_v61  ;;  %v1544_v19 = vsel %vm1543_vm8, %v4439_v15, %v1540_v36  ;;  %v1499_v61 = vsel %vm1498_vm10, %v4431_v53, %v1495_v45  ;;  %v5366_v45 = vld [vmem:[#allocation19_spill] sm:$0xff] }
 0x4b1   :  { %v1388_v25 = vpop.f32.mrf.mxu1  ;;  %v4482_v20 = vadd.f32 %v1572_v14, %v1568_v3  ;;  %2759 = vtanh.f32 %v4402_v52  ;;  %v1549_v40 = vsel %vm1546_vm11, %v1548_v23, %v1544_v19  ;;  %v1504_v8 = vsel %vm1501_vm12, %v1503_v63, %v1499_v61  ;;  %v5367_v61 = vld [vmem:[#allocation28_spill] sm:$0xff] }
 0x4b2   :  { %v1389_v35 = vadd.f32 %v1388_v25, %v3397_v26  ;;  %v1566_v10 = vsub.f32 1.0, %v1549_v40  ;;  %v1574_v51 = vmul.f32 %v1549_v40, %v4293_v59  ;;  %v1563_v47 = vsub.f32 1.0, %v1504_v8  ;;  %v4517_v59 = vld [vmem:[%s5148_s4] sm:$0xff] }
 0x4b3   :  { %v1571_v54 = vmul.f32 %v1504_v8, %v4298_v13  ;;  %v4531_v13 = vld [vmem:[%s5148_s4 + $0x10] sm:$0xff] }
 0x4b4   :  { %v1554_v1 = vmul.f32 %v1469_v56, %v1389_v35  ;;  %v4545_v35 = vld [vmem:[%s5148_s4 + $0x20] sm:$0xff] }
 0x4b6   :  { %v2758_v2 = vpop.eup %2757  ;;  %v1558_v0 = vadd.f32 %v1554_v1, %v5364_v9 }
 0x4b7   :  { %v1569_v48 = vmul.f32 %v2758_v2, %v1565_v11  ;;  %v2760_v52 = vpop.eup %2759  ;;  %v1581_v2 = vmul.f32 %v5366_v45, %v3077_v29 }
 0x4b8   :  { %2761 = vtanh.f32 %v1558_v0  ;;  %v1567_v14 = vmul.f32 %v2760_v52, %v1563_v47  ;;  %v1583_v52 = vmul.f32 %v5366_v45, %v5294_v28 }
 0x4b9   :  { %v4501_v12 = vadd.f32 %v1573_v6, %v1569_v48  ;;  %v1593_v18 = vadd.f32 %v1581_v2, %v5291_v5 }
 0x4ba   :  { %v4510_v53 = vadd.f32 %v1571_v54, %v1567_v14 }
 0x4bc   :  { %v1604_v25 = vpack.c.bf16 %v4482_v20, %v4510_v53 }
 0x4be   :  { %v2762_v15 = vpop.eup %2761 }
 0x4bf   :  { %v1570_v37 = vmul.f32 %v2762_v15, %v1566_v10 }
 0x4c1   :  { %v4505_v3 = vadd.f32 %v1574_v51, %v1570_v37  ;;  %v1595_v51 = vadd.f32 %v1583_v52, %v5296_v31 }
 0x4c3   :  { %v1605_v24 = vpack.c.bf16 %v4505_v3, %v4501_v12 }
 0x4c5   :  { %1612 = vmatpush.bf16.msra.mxu2 %v1605_v24 }
 0x4c9   :  { %1613 = vmatpush.bf16.msra.mxu2 %v1604_v25  ;;  %v5368_v25 = vld [vmem:[#allocation40_spill] sm:$0xff] }
 0x4cc   :  { %2475 = vmatmul.msk.bf16.vlgmr.msra.gmra.mxu2 %vm317_vm1, %v4517_v59 }
 0x4dc   :  { %2476 = vmatmul.msk.bf16.gmra.mxu2 %vm317_vm1, %v4524_v22 }
 0x4ec   :  { %2477 = vmatmul.msk.bf16.gmra.mxu2 %vm317_vm1, %v4531_v13 }
 0x4fc   :  { %2478 = vmatmul.msk.bf16.gmra.mxu2 %vm317_vm1, %v4538_v62 }
 0x50c   :  { %2479 = vmatmul.msk.bf16.gmra.mxu2 %vm317_vm1, %v4545_v35 }
 0x51c   :  { %2480 = vmatmul.msk.bf16.gmra.mxu2 %vm317_vm1, %v4552_v50 }
 0x54f   :  { %v1615_v56 = vpop.f32.mrf.mxu2 }
 0x550   :  { %v1616_v1 = vadd.f32 %v1615_v56, %v3087_v33 }
 0x552   :  { %v1645_v11 = vadd.f32 %v1616_v1, %v5365_v46  ;;  %v1584_v1 = vmul.f32 %v5366_v45, %v5299_v21 }
 0x554   :  { %v2481_v0 = vmul.f32 -1.442695, %v1645_v11 }
 0x556   :  { %2763 = vpow2.f32 %v2481_v0 }
 0x557   :  { %v1617_v36 = vpop.f32.mrf.mxu2 }
 0x558   :  { %v1618_v9 = vadd.f32 %v1617_v36, %v5290_v30 }
 0x55a   :  { %v1646_v34 = vadd.f32 %v1618_v9, %v1593_v18  ;;  %v1586_v9 = vmul.f32 %v5366_v45, %v5301_v38  ;;  %v1596_v18 = vadd.f32 %v1584_v1, %v5302_v60 }
 0x55c   :  { %v2482_v48 = vmul.f32 -1.442695, %v1646_v34  ;;  %v2764_v23 = vpop.eup %2763 }
 0x55d   :  { %v4564_v8 = vadd.f32 1.0, %v2764_v23 }
 0x55e   :  { %2765 = vpow2.f32 %v2482_v48  ;;  %v1598_v48 = vadd.f32 %v1586_v9, %v5303_v4 }
 0x55f   :  { %v1620_v7 = vpop.f32.mrf.mxu2  ;;  %2767 = vrcp.f32 %v4564_v8  ;;  %vm1670_vm14 = vweird.f32 %v4564_v8 }
 0x560   :  { %v1621_v6 = vadd.f32 %v1620_v7, %v5292_v49 }
 0x562   :  { %v1647_v40 = vadd.f32 %v1621_v6, %v5367_v61 }
 0x564   :  { %v2483_v10 = vmul.f32 -1.442695, %v1647_v40  ;;  %v2766_v37 = vpop.eup %2765 }
 0x565   :  { %v4571_v14 = vadd.f32 1.0, %v2766_v37  ;;  %v4575_v36 = vpop.eup %2767 }
 0x566   :  { %2769 = vpow2.f32 %v2483_v10  ;;  %v1666_v0 = vmul.f32 %v4575_v36, %v4564_v8  ;;  %vm1671_vm13 = vweird.f32 %v4575_v36 }
 0x567   :  { %v1622_v19 = vpop.f32.mrf.mxu2  ;;  %2771 = vrcp.f32 %v4571_v14  ;;  %vm1672_vm15 = vmor %vm1670_vm14, %vm1671_vm13  ;;  %vm1685_vm3 = vweird.f32 %v4571_v14 }
 0x568   :  { %v1623_v15 = vadd.f32 %v1622_v19, %v5295_v16 }
 0x56a   :  { %v1648_v24 = vadd.f32 %v1623_v15, %v1595_v51  ;;  %v1587_v15 = vmul.f32 %v5366_v45, %v5305_v58 }
 0x56c   :  { %v2484_v7 = vmul.f32 -1.442695, %v1648_v24  ;;  %v2770_v11 = vpop.eup %2769 }
 0x56d   :  { %v4586_v19 = vadd.f32 1.0, %v2770_v11  ;;  %v4590_v61 = vpop.eup %2771 }
 0x56e   :  { %vm1686_vm2 = vweird.f32 %v4590_v61 }
 0x56f   :  { %v1625_v63 = vpop.f32.mrf.mxu2  ;;  %vm1687_vm4 = vmor %vm1685_vm3, %vm1686_vm2  ;;  %vm1700_vm8 = vweird.f32 %v4586_v19 }
 0x570   :  { %v1626_v2 = vadd.f32 %v1625_v63, %v5300_v57  ;;  %v1667_v63 = vsub.f32 1.0, %v1666_v0  ;;  %v1676_v0 = vand.u32 2147483648, %v4564_v8 }
 0x572   :  { %v1725_v23 = vadd.f32 %v1626_v2, %v1596_v18 }
 0x574   :  { %v2485_v37 = vmul.f32 -1.442695, %v1725_v23 }
 0x577   :  { %v1627_v47 = vpop.f32.mrf.mxu2 }
 0x578   :  { %v1628_v54 = vadd.f32 %v1627_v47, %v5297_v27  ;;  %v1681_v47 = vmul.f32 %v4590_v61, %v4571_v14 }
 0x57a   :  { %v1726_v56 = vadd.f32 %v1628_v54, %v5368_v25  ;;  %v1668_v54 = vmul.f32 %v4575_v36, %v1667_v63 }
 0x57c   :  { %v2486_v46 = vmul.f32 -1.442695, %v1726_v56  ;;  %v1599_v56 = vadd.f32 %v1587_v15, %v5306_v41  ;;  %v1669_v9 = vadd.f32 %v4575_v36, %v1668_v54 }
 0x57e   :  { %2773 = vpow2.f32 %v2486_v46  ;;  %v1682_v46 = vsub.f32 1.0, %v1681_v47  ;;  %v1588_v47 = vmul.f32 %v5366_v45, %v3301_v39  ;;  %v1689_v45 = vand.u32 2147483647, %v4571_v14 }
 0x57f   :  { %v1630_v34 = vpop.f32.mrf.mxu2  ;;  %2775 = vpow2.f32 %v2484_v7 }
 0x580   :  { %v1631_v6 = vadd.f32 %v1630_v34, %v5304_v32  ;;  %2777 = vrcp.f32 %v4586_v19  ;;  %vm1690_vm5 = vcmp.eq.f32.partialorder %v1689_v45, 8.507059e+37 }
 0x582   :  { %v1727_v40 = vadd.f32 %v1631_v6, %v1598_v48  ;;  %v1674_v48 = vand.u32 2147483647, %v4564_v8 }
 0x584   :  { %v2774_v52 = vpop.eup %2773  ;;  %v2487_v10 = vmul.f32 -1.442695, %v1727_v40  ;;  %v1683_v40 = vmul.f32 %v4590_v61, %v1682_v46  ;;  %vm1675_vm0 = vcmp.eq.f32.partialorder %v1674_v48, 8.507059e+37  ;;  %v1600_v46 = vadd.f32 %v1588_v47, %v5333_v17 }
 0x585   :  { %v4595_v51 = vadd.f32 1.0, %v2774_v52  ;;  %v2776_v24 = vpop.eup %2775  ;;  %v1673_v52 = vsel %vm1672_vm15, %v4575_v36, %v1669_v9  ;;  %v1691_v9 = vand.u32 2147483648, %v4571_v14 }
 0x586   :  { %2779 = vpow2.f32 %v2487_v10  ;;  %v4603_v7 = vadd.f32 1.0, %v2776_v24  ;;  %v4605_v11 = vpop.eup %2777 }
 0x587   :  { %2781 = vrcp.f32 %v4595_v51  ;;  %v1632_v25 = vpop.f32.mrf.mxu2  ;;  %v1696_v63 = vmul.f32 %v4605_v11, %v4586_v19  ;;  %vm1701_vm6 = vweird.f32 %v4605_v11  ;;  %vm1765_vm10 = vweird.f32 %v4595_v51 }
 0x588   :  { %v1633_v1 = vadd.f32 %v1632_v25, %v5307_v44  ;;  %2783 = vpow2.f32 %v2485_v37  ;;  %v1677_v37 = vor.u32 1.1754944e-38, %v1676_v0  ;;  %v1684_v25 = vadd.f32 %v4590_v61, %v1683_v40  ;;  %vm4659_vm9 = vmor %vm1700_vm8, %vm1701_vm6 }
 0x589   :  { %2785 = vrcp.f32 %v4603_v7  ;;  %v1697_v36 = vsub.f32 1.0, %v1696_v63  ;;  %v1769_v45 = vand.u32 2147483647, %v4595_v51  ;;  %vm1715_vm2 = vweird.f32 %v4603_v7 }
 0x58a   :  { %v1728_v2 = vadd.f32 %v1633_v1, %v1599_v56  ;;  %v1678_v54 = vsel %vm1675_vm0, %v1677_v37, %v1673_v52  ;;  %v1688_v63 = vsel %vm1687_vm4, %v4590_v61, %v1684_v25 }
 0x58b   :  { %v1698_v52 = vmul.f32 %v4605_v11, %v1697_v36  ;;  %vm1770_vm12 = vcmp.eq.f32.partialorder %v1769_v45, 8.507059e+37 }
 0x58c   :  { %v2780_v18 = vpop.eup %2779  ;;  %v2488_v34 = vmul.f32 -1.442695, %v1728_v2 }
 0x58d   :  { %v4612_v6 = vpop.eup %2781  ;;  %v4615_v23 = vadd.f32 1.0, %v2780_v18 }
 0x58e   :  { %2787 = vpow2.f32 %v2488_v34  ;;  %v1761_v10 = vmul.f32 %v4612_v6, %v4595_v51  ;;  %v2784_v15 = vpop.eup %2783  ;;  %vm1766_vm7 = vweird.f32 %v4612_v6 }
 0x58f   :  { %2789 = vrcp.f32 %v4615_v23  ;;  %v1635_v8 = vpop.f32.mrf.mxu2  ;;  %v4629_v1 = vadd.f32 1.0, %v2784_v15  ;;  %v4633_v0 = vpop.eup %2785  ;;  %v1692_v15 = vor.u32 1.1754944e-38, %v1691_v9  ;;  %v1706_v9 = vand.u32 2147483648, %v4586_v19  ;;  %vm4670_vm11 = vmor %vm1765_vm10, %vm1766_vm7 }
 0x590   :  { %v1636_v24 = vadd.f32 %v1635_v8, %v3569_v55  ;;  %v1762_v56 = vsub.f32 1.0, %v1761_v10  ;;  %v1711_v14 = vmul.f32 %v4633_v0, %v4603_v7  ;;  %vm1716_vm15 = vweird.f32 %v4633_v0 }
 0x591   :  { %2791 = vrcp.f32 %v4629_v1  ;;  %v1693_v61 = vsel %vm1690_vm5, %v1692_v15, %v1688_v63  ;;  %v5371_v63 = vld [vmem:[#allocation52_spill] sm:$0xff]  ;;  %vm1780_vm0 = vweird.f32 %v4615_v23  ;;  %v1784_v45 = vand.u32 2147483647, %v4615_v23  ;;  %vm4704_vm4 = vmor %vm1715_vm2, %vm1716_vm15 }
 0x592   :  { %v1805_v2 = vmul.f32 %v1678_v54, %v1636_v24  ;;  %v1763_v10 = vmul.f32 %v4612_v6, %v1762_v56  ;;  %v1699_v24 = vadd.f32 %v4605_v11, %v1698_v52  ;;  %v1712_v56 = vsub.f32 1.0, %v1711_v14 }
 0x593   :  { %vm1785_vm5 = vcmp.eq.f32.partialorder %v1784_v45, 8.507059e+37 }
 0x594   :  { %v2788_v18 = vpop.eup %2787  ;;  %v4637_v34 = vadd.f32 %v1805_v2, %v1600_v46  ;;  %v1764_v25 = vadd.f32 %v4612_v6, %v1763_v10  ;;  %v1771_v46 = vand.u32 2147483648, %v4595_v51  ;;  %v1704_v10 = vand.u32 2147483647, %v4586_v19 }
 0x595   :  { %v4639_v48 = vpop.eup %2789  ;;  %v4641_v40 = vadd.f32 1.0, %v2788_v18 }
 0x596   :  { %v1776_v8 = vmul.f32 %v4639_v48, %v4615_v23  ;;  %v1768_v51 = vsel %vm4670_vm11, %v4612_v6, %v1764_v25  ;;  %vm1705_vm13 = vcmp.eq.f32.partialorder %v1704_v10, 8.507059e+37  ;;  %vm1781_vm14 = vweird.f32 %v4639_v48 }
 0x597   :  { %2793 = vrcp.f32 %v4641_v40  ;;  %v1637_v37 = vpop.f32.mrf.mxu2  ;;  %v4666_v18 = vpop.eup %2791  ;;  %vm4700_vm3 = vmor %vm1780_vm0, %vm1781_vm14  ;;  %vm1750_vm11 = vweird.f32 %v4629_v1 }
 0x598   :  { %v1638_v47 = vadd.f32 %v1637_v37, %v5353_v42  ;;  %v1777_v54 = vsub.f32 1.0, %v1776_v8  ;;  %v1703_v8 = vsel %vm4659_vm9, %v4605_v11, %v1699_v24  ;;  %v1746_v42 = vmul.f32 %v4666_v18, %v4629_v1 }
 0x599   :  { %v1721_v24 = vand.u32 2147483648, %v4603_v7  ;;  %vm1751_vm8 = vweird.f32 %v4666_v18  ;;  %vm1795_vm9 = vweird.f32 %v4641_v40 }
 0x59a   :  { %v1806_v36 = vmul.f32 %v1693_v61, %v1638_v47  ;;  %v1778_v37 = vmul.f32 %v4639_v48, %v1777_v54  ;;  %v1713_v47 = vmul.f32 %v4633_v0, %v1712_v56  ;;  %v1772_v61 = vor.u32 1.1754944e-38, %v1771_v46 }
 0x59c   :  { %v1810_v52 = vadd.f32 %v1806_v36, %v5371_v63  ;;  %v1707_v63 = vor.u32 1.1754944e-38, %v1706_v9  ;;  %v1773_v54 = vsel %vm1770_vm12, %v1772_v61, %v1768_v51  ;;  %v1779_v25 = vadd.f32 %v4639_v48, %v1778_v37  ;;  %vm1752_vm12 = vmor %vm1750_vm11, %vm1751_vm8 }
 0x59d   :  { %v4674_v14 = vpop.eup %2793  ;;  %v1714_v46 = vadd.f32 %v4633_v0, %v1713_v47  ;;  %v1786_v9 = vand.u32 2147483648, %v4615_v23  ;;  %v1818_v10 = vsub.f32 1.0, %v1773_v54  ;;  %v1719_v37 = vand.u32 2147483647, %v4603_v7 }
 0x59e   :  { %2795 = vtanh.f32 %v1810_v52  ;;  %v1791_v19 = vmul.f32 %v4674_v14, %v4641_v40  ;;  %v1708_v6 = vsel %vm1705_vm13, %v1707_v63, %v1703_v8  ;;  %v1747_v52 = vsub.f32 1.0, %v1746_v42  ;;  %v5374_v8 = vld [vmem:[#allocation49_spill] sm:$0xff] }
 0x59f   :  { %v1640_v36 = vpop.f32.mrf.mxu2  ;;  %v1783_v42 = vsel %vm4700_vm3, %v4639_v48, %v1779_v25  ;;  %v1718_v7 = vsel %vm4704_vm4, %v4633_v0, %v1714_v46  ;;  %v1787_v63 = vor.u32 1.1754944e-38, %v1786_v9  ;;  %vm1720_vm6 = vcmp.eq.f32.partialorder %v1719_v37, 8.507059e+37 }
 0x5a0   :  { %v1641_v11 = vadd.f32 %v1640_v36, %v3312_v43  ;;  %v1792_v56 = vsub.f32 1.0, %v1791_v19  ;;  %v1826_v36 = vmul.f32 %v1773_v54, %v4482_v20  ;;  %vm1796_vm7 = vweird.f32 %v4674_v14 }
 0x5a1   :  { %v1788_v25 = vsel %vm1785_vm5, %v1787_v63, %v1783_v42  ;;  %v1801_v0 = vand.u32 2147483648, %v4641_v40  ;;  %vm1797_vm10 = vmor %vm1795_vm9, %vm1796_vm7 }
 0x5a2   :  { %v1807_v2 = vmul.f32 %v1708_v6, %v1641_v11  ;;  %v1793_v23 = vmul.f32 %v4674_v14, %v1792_v56  ;;  %v1722_v6 = vor.u32 1.1754944e-38, %v1721_v24  ;;  %v1799_v24 = vand.u32 2147483647, %v4641_v40 }
 0x5a3   :  { %v1819_v46 = vsub.f32 1.0, %v1788_v25  ;;  %v1827_v40 = vmul.f32 %v1788_v25, %v4501_v12  ;;  %v1802_v47 = vor.u32 1.1754944e-38, %v1801_v0  ;;  %v5380_v0 = vld [vmem:[#allocation32_spill] sm:$0xff] }
 0x5a4   :  { %v2796_v15 = vpop.eup %2795  ;;  %v1811_v51 = vadd.f32 %v1807_v2, %v5374_v8  ;;  %v1748_v2 = vmul.f32 %v4666_v18, %v1747_v52  ;;  %v1723_v56 = vsel %vm1720_vm6, %v1722_v6, %v1718_v7  ;;  %v1794_v20 = vadd.f32 %v4674_v14, %v1793_v23  ;;  %v5379_v52 = vld [vmem:[#allocation55_spill] sm:$0xff] }
 0x5a5   :  { %v1822_v61 = vmul.f32 %v2796_v15, %v1818_v10  ;;  %v1754_v15 = vand.u32 2147483647, %v4629_v1  ;;  %vm1800_vm13 = vcmp.eq.f32.partialorder %v1799_v24, 8.507059e+37 }
 0x5a6   :  { %2797 = vtanh.f32 %v1811_v51  ;;  %v1749_v9 = vadd.f32 %v4666_v18, %v1748_v2  ;;  %v1756_v51 = vand.u32 2147483648, %v4629_v1  ;;  %v1798_v37 = vsel %vm1797_vm10, %v4674_v14, %v1794_v20 }
 0x5a7   :  { %v1642_v11 = vpop.f32.mrf.mxu2  ;;  %v4717_v8 = vadd.f32 %v1826_v36, %v1822_v61  ;;  %2799 = vtanh.f32 %v4637_v34  ;;  %v1803_v61 = vsel %vm1800_vm13, %v1802_v47, %v1798_v37  ;;  %vm1755_vm14 = vcmp.eq.f32.partialorder %v1754_v15, 8.507059e+37  ;;  %v5382_v47 = vld [vmem:[#allocation33_spill] sm:$0xff] }
 0x5a8   :  { %v1643_v48 = vadd.f32 %v1642_v11, %v3397_v26  ;;  %v1753_v23 = vsel %vm1752_vm12, %v4666_v18, %v1749_v9  ;;  %v1757_v36 = vor.u32 1.1754944e-38, %v1756_v51  ;;  %v1820_v7 = vsub.f32 1.0, %v1803_v61 }
 0x5a9   :  { %v1828_v12 = vmul.f32 %v1803_v61, %v4505_v3 }
 0x5aa   :  { %v1808_v54 = vmul.f32 %v1723_v56, %v1643_v48  ;;  %v1758_v1 = vsel %vm1755_vm14, %v1757_v36, %v1753_v23 }
 0x5ab   :  { %v1817_v11 = vsub.f32 1.0, %v1758_v1  ;;  %v1825_v25 = vmul.f32 %v1758_v1, %v4510_v53 }
 0x5ac   :  { %v2798_v45 = vpop.eup %2797  ;;  %v1812_v10 = vadd.f32 %v1808_v54, %v5379_v52 }
 0x5ad   :  { %v1823_v19 = vmul.f32 %v2798_v45, %v1819_v46  ;;  %v2800_v34 = vpop.eup %2799  ;;  %v5381_v46 = vld [vmem:[#allocation29_spill] sm:$0xff] }
 0x5ae   :  { %2801 = vtanh.f32 %v1812_v10  ;;  %v1821_v2 = vmul.f32 %v2800_v34, %v1817_v11  ;;  %v1835_v9 = vmul.f32 %v5381_v46, %v3077_v29  ;;  %v1837_v1 = vmul.f32 %v5381_v46, %v5294_v28 }
 0x5af   :  { %v4736_v42 = vadd.f32 %v1827_v40, %v1823_v19 }
 0x5b0   :  { %v4745_v18 = vadd.f32 %v1825_v25, %v1821_v2  ;;  %v1847_v10 = vadd.f32 %v1835_v9, %v5291_v5  ;;  %v5383_v25 = vld [vmem:[#allocation42_spill] sm:$0xff]  ;;  %v1840_v9 = vmul.f32 %v5381_v46, %v5301_v38 }
 0x5b2   :  { %v1858_v56 = vpack.c.bf16 %v4717_v8, %v4745_v18 }
 0x5b4   :  { %v2802_v14 = vpop.eup %2801 }
 0x5b5   :  { %v1824_v63 = vmul.f32 %v2802_v14, %v1820_v7 }
 0x5b7   :  { %v4740_v6 = vadd.f32 %v1828_v12, %v1824_v63  ;;  %v1849_v63 = vadd.f32 %v1837_v1, %v5296_v31 }
 0x5b9   :  { %v1859_v48 = vpack.c.bf16 %v4740_v6, %v4736_v42 }
 0x5bb   :  { %1866 = vmatpush.bf16.msrb.mxu3 %v1859_v48 }
 0x5bf   :  { %1867 = vmatpush.bf16.msrb.mxu3 %v1858_v56 }
 0x5c2   :  { %2489 = vmatmul.msk.bf16.vlgmr.msrb.gmra.mxu3 %vm317_vm1, %v4517_v59 }
 0x5d2   :  { %2490 = vmatmul.msk.bf16.gmra.mxu3 %vm317_vm1, %v4524_v22 }
 0x5e2   :  { %2491 = vmatmul.msk.bf16.gmra.mxu3 %vm317_vm1, %v4531_v13 }
 0x5f2   :  { %2492 = vmatmul.msk.bf16.gmra.mxu3 %vm317_vm1, %v4538_v62 }
 0x602   :  { %2493 = vmatmul.msk.bf16.gmra.mxu3 %vm317_vm1, %v4545_v35 }
 0x612   :  { %2494 = vmatmul.msk.bf16.gmra.mxu3 %vm317_vm1, %v4552_v50 }
 0x645   :  { %v1869_v3 = vpop.f32.mrf.mxu3 }
 0x646   :  { %v1870_v20 = vadd.f32 %v1869_v3, %v3087_v33 }
 0x648   :  { %v1899_v24 = vadd.f32 %v1870_v20, %v5380_v0 }
 0x64a   :  { %v2495_v45 = vmul.f32 -1.442695, %v1899_v24 }
 0x64c   :  { %2803 = vpow2.f32 %v2495_v45 }
 0x64d   :  { %v1871_v53 = vpop.f32.mrf.mxu3 }
 0x64e   :  { %v1872_v52 = vadd.f32 %v1871_v53, %v5290_v30  ;;  %v1838_v53 = vmul.f32 %v5381_v46, %v5299_v21 }
 0x650   :  { %v1900_v51 = vadd.f32 %v1872_v52, %v1847_v10  ;;  %v1850_v52 = vadd.f32 %v1838_v53, %v5302_v60 }
 0x652   :  { %v2496_v19 = vmul.f32 -1.442695, %v1900_v51  ;;  %v2804_v40 = vpop.eup %2803  ;;  %v1852_v51 = vadd.f32 %v1840_v9, %v5303_v4 }
 0x653   :  { %v4769_v36 = vadd.f32 1.0, %v2804_v40 }
 0x654   :  { %2805 = vpow2.f32 %v2496_v19 }
 0x655   :  { %v1874_v54 = vpop.f32.mrf.mxu3  ;;  %2807 = vrcp.f32 %v4769_v36  ;;  %v1930_v9 = vand.u32 2147483648, %v4769_v36  ;;  %vm1924_vm0 = vweird.f32 %v4769_v36 }
 0x656   :  { %v1875_v37 = vadd.f32 %v1874_v54, %v5292_v49 }
 0x658   :  { %v1901_v23 = vadd.f32 %v1875_v37, %v5382_v47 }
 0x65a   :  { %v2497_v34 = vmul.f32 -1.442695, %v1901_v23  ;;  %v2806_v14 = vpop.eup %2805 }
 0x65b   :  { %v4777_v48 = vadd.f32 1.0, %v2806_v14  ;;  %v4780_v3 = vpop.eup %2807 }
 0x65c   :  { %2809 = vpow2.f32 %v2497_v34  ;;  %v1920_v45 = vmul.f32 %v4780_v3, %v4769_v36  ;;  %v1841_v34 = vmul.f32 %v5381_v46, %v5305_v58  ;;  %vm1925_vm15 = vweird.f32 %v4780_v3 }
 0x65d   :  { %v1876_v15 = vpop.f32.mrf.mxu3  ;;  %2811 = vrcp.f32 %v4777_v48  ;;  %vm1926_vm2 = vmor %vm1924_vm0, %vm1925_vm15  ;;  %vm1939_vm5 = vweird.f32 %v4777_v48 }
 0x65e   :  { %v1877_v7 = vadd.f32 %v1876_v15, %v5295_v16  ;;  %v1921_v47 = vsub.f32 1.0, %v1920_v45 }
 0x660   :  { %v1902_v11 = vadd.f32 %v1877_v7, %v1849_v63 }
 0x662   :  { %v2498_v20 = vmul.f32 -1.442695, %v1902_v11  ;;  %v2810_v0 = vpop.eup %2809 }
 0x663   :  { %v4791_v15 = vadd.f32 1.0, %v2810_v0  ;;  %v4795_v23 = vpop.eup %2811 }
 0x664   :  { %v1935_v11 = vmul.f32 %v4795_v23, %v4777_v48  ;;  %vm1940_vm4 = vweird.f32 %v4795_v23 }
 0x665   :  { %v1879_v61 = vpop.f32.mrf.mxu3  ;;  %vm1941_vm6 = vmor %vm1939_vm5, %vm1940_vm4  ;;  %vm1954_vm9 = vweird.f32 %v4791_v15 }
 0x666   :  { %v1880_v24 = vadd.f32 %v1879_v61, %v5300_v57 }
 0x668   :  { %v1979_v19 = vadd.f32 %v1880_v24, %v1850_v52  ;;  %v1936_v24 = vsub.f32 1.0, %v1935_v11 }
 0x66a   :  { %v2499_v7 = vmul.f32 -1.442695, %v1979_v19 }
 0x66d   :  { %v1881_v12 = vpop.f32.mrf.mxu3 }
 0x66e   :  { %v1882_v2 = vadd.f32 %v1881_v12, %v5297_v27  ;;  %v1922_v12 = vmul.f32 %v4780_v3, %v1921_v47 }
 0x670   :  { %v1980_v56 = vadd.f32 %v1882_v2, %v5383_v25  ;;  %v1853_v25 = vadd.f32 %v1841_v34, %v5306_v41  ;;  %v1923_v0 = vadd.f32 %v4780_v3, %v1922_v12 }
 0x672   :  { %v2500_v54 = vmul.f32 -1.442695, %v1980_v56  ;;  %v1927_v19 = vsel %vm1926_vm2, %v4780_v3, %v1923_v0 }
 0x674   :  { %2813 = vpow2.f32 %v2500_v54 }
 0x675   :  { %v1884_v10 = vpop.f32.mrf.mxu3  ;;  %2815 = vpow2.f32 %v2498_v20 }
 0x676   :  { %v1885_v37 = vadd.f32 %v1884_v10, %v5304_v32  ;;  %2817 = vrcp.f32 %v4791_v15  ;;  %v1928_v10 = vand.u32 2147483647, %v4769_v36 }
 0x678   :  { %v1981_v40 = vadd.f32 %v1885_v37, %v1852_v51  ;;  %vm1929_vm3 = vcmp.eq.f32.partialorder %v1928_v10, 8.507059e+37 }
 0x67a   :  { %v2814_v61 = vpop.eup %2813  ;;  %v2501_v1 = vmul.f32 -1.442695, %v1981_v40  ;;  %v1937_v40 = vmul.f32 %v4795_v23, %v1936_v24 }
 0x67b   :  { %v2816_v14 = vpop.eup %2815  ;;  %v4800_v63 = vadd.f32 1.0, %v2814_v61  ;;  %v1842_v61 = vmul.f32 %v5381_v46, %v3301_v39 }
 0x67c   :  { %2819 = vpow2.f32 %v2501_v1  ;;  %v4807_v53 = vadd.f32 1.0, %v2816_v14  ;;  %v4810_v20 = vpop.eup %2817  ;;  %v1931_v1 = vor.u32 1.1754944e-38, %v1930_v9  ;;  %v1943_v9 = vand.u32 2147483647, %v4777_v48 }
 0x67d   :  { %v1886_v2 = vpop.f32.mrf.mxu3  ;;  %2821 = vpow2.f32 %v2499_v7  ;;  %v1950_v37 = vmul.f32 %v4810_v20, %v4791_v15  ;;  %v1854_v14 = vadd.f32 %v1842_v61, %v5333_v17  ;;  %vm1955_vm8 = vweird.f32 %v4810_v20 }
 0x67e   :  { %v1887_v56 = vadd.f32 %v1886_v2, %v5307_v44  ;;  %2823 = vrcp.f32 %v4800_v63  ;;  %v1932_v12 = vsel %vm1929_vm3, %v1931_v1, %v1927_v19  ;;  %vm1944_vm7 = vcmp.eq.f32.partialorder %v1943_v9, 8.507059e+37  ;;  %v5385_v9 = vld [vmem:[#allocation57_spill] sm:$0xff]  ;;  %vm4868_vm11 = vmor %vm1954_vm9, %vm1955_vm8 }
 0x67f   :  { %2825 = vrcp.f32 %v4807_v53  ;;  %v1951_v11 = vsub.f32 1.0, %v1950_v37  ;;  %vm2019_vm12 = vweird.f32 %v4800_v63  ;;  %vm1969_vm4 = vweird.f32 %v4807_v53 }
 0x680   :  { %v1982_v54 = vadd.f32 %v1887_v56, %v1853_v25  ;;  %v1938_v25 = vadd.f32 %v4795_v23, %v1937_v40 }
 0x681   :  { %v1952_v10 = vmul.f32 %v4810_v20, %v1951_v11 }
 0x682   :  { %v2820_v45 = vpop.eup %2819  ;;  %v2502_v52 = vmul.f32 -1.442695, %v1982_v54  ;;  %v1945_v54 = vand.u32 2147483648, %v4777_v48  ;;  %v1942_v19 = vsel %vm1941_vm6, %v4795_v23, %v1938_v25  ;;  %v1960_v23 = vand.u32 2147483648, %v4791_v15 }
 0x683   :  { %v4818_v51 = vadd.f32 1.0, %v2820_v45  ;;  %v2822_v47 = vpop.eup %2821  ;;  %v1958_v25 = vand.u32 2147483647, %v4791_v15 }
 0x684   :  { %2827 = vpow2.f32 %v2502_v52  ;;  %v4827_v34 = vpop.eup %2823  ;;  %v4831_v3 = vadd.f32 1.0, %v2822_v47  ;;  %v1946_v61 = vor.u32 1.1754944e-38, %v1945_v54  ;;  %v2025_v54 = vand.u32 2147483648, %v4800_v63 }
 0x685   :  { %2829 = vrcp.f32 %v4818_v51  ;;  %v1889_v36 = vpop.f32.mrf.mxu3  ;;  %v4835_v56 = vpop.eup %2825  ;;  %v2015_v46 = vmul.f32 %v4827_v34, %v4800_v63  ;;  %vm2020_vm10 = vweird.f32 %v4827_v34  ;;  %vm1959_vm14 = vcmp.eq.f32.partialorder %v1958_v25, 8.507059e+37 }
 0x686   :  { %v1890_v7 = vadd.f32 %v1889_v36, %v3569_v55  ;;  %2831 = vrcp.f32 %v4831_v3  ;;  %v1965_v40 = vmul.f32 %v4835_v56, %v4807_v53  ;;  %v5384_v36 = vld [vmem:[#allocation44_spill] sm:$0xff]  ;;  %vm2021_vm13 = vmor %vm2019_vm12, %vm2020_vm10  ;;  %vm1970_vm2 = vweird.f32 %v4835_v56 }
 0x687   :  { %v2016_v47 = vsub.f32 1.0, %v2015_v46  ;;  %vm2034_vm3 = vweird.f32 %v4818_v51  ;;  %vm4906_vm6 = vmor %vm1969_vm4, %vm1970_vm2 }
 0x688   :  { %v2059_v2 = vmul.f32 %v1932_v12, %v1890_v7  ;;  %v1953_v12 = vadd.f32 %v4810_v20, %v1952_v10 }
 0x689   :  { %v2017_v46 = vmul.f32 %v4827_v34, %v2016_v47 }
 0x68a   :  { %v2828_v0 = vpop.eup %2827  ;;  %v4840_v24 = vadd.f32 %v2059_v2, %v1854_v14  ;;  %v1947_v14 = vsel %vm1944_vm7, %v1946_v61, %v1942_v19  ;;  %v1966_v2 = vsub.f32 1.0, %v1965_v40  ;;  %v2023_v19 = vand.u32 2147483647, %v4800_v63 }
 0x68b   :  { %v4844_v45 = vpop.eup %2829  ;;  %v4846_v52 = vadd.f32 1.0, %v2828_v0  ;;  %v1957_v40 = vsel %vm4868_vm11, %v4810_v20, %v1953_v12  ;;  %v2018_v47 = vadd.f32 %v4827_v34, %v2017_v46  ;;  %v2026_v12 = vor.u32 1.1754944e-38, %v2025_v54 }
 0x68c   :  { %v2030_v37 = vmul.f32 %v4844_v45, %v4818_v51  ;;  %v4865_v0 = vpop.eup %2831  ;;  %vm2024_vm15 = vcmp.eq.f32.partialorder %v2023_v19, 8.507059e+37  ;;  %vm2035_vm0 = vweird.f32 %v4844_v45  ;;  %v2038_v54 = vand.u32 2147483647, %v4818_v51 }
 0x68d   :  { %2833 = vrcp.f32 %v4846_v52  ;;  %v1891_v48 = vpop.f32.mrf.mxu3  ;;  %v2022_v20 = vsel %vm2021_vm13, %v4827_v34, %v2018_v47  ;;  %v2040_v34 = vand.u32 2147483648, %v4818_v51  ;;  %v5388_v47 = vld [vmem:[#allocation56_spill] sm:$0xff]  ;;  %vm4901_vm5 = vmor %vm2034_vm3, %vm2035_vm0  ;;  %vm2005_vm10 = vweird.f32 %v4865_v0 }
 0x68e   :  { %v1892_v1 = vadd.f32 %v1891_v48, %v5384_v36  ;;  %v2031_v7 = vsub.f32 1.0, %v2030_v37  ;;  %vm2039_vm7 = vcmp.eq.f32.partialorder %v2038_v54, 8.507059e+37  ;;  %vm2049_vm11 = vweird.f32 %v4846_v52  ;;  %v5393_v54 = vld [vmem:[#allocation59_spill] sm:$0xff] }
 0x68f   :  { %vm2004_vm13 = vweird.f32 %v4831_v3 }
 0x690   :  { %v2060_v11 = vmul.f32 %v1947_v14, %v1892_v1  ;;  %v2032_v15 = vmul.f32 %v4844_v45, %v2031_v7  ;;  %v1961_v1 = vor.u32 1.1754944e-38, %v1960_v23  ;;  %v1967_v14 = vmul.f32 %v4835_v56, %v1966_v2 }
 0x691   :  { %v2000_v7 = vmul.f32 %v4865_v0, %v4831_v3 }
 0x692   :  { %v2064_v10 = vadd.f32 %v2060_v11, %v5385_v9  ;;  %v1962_v46 = vsel %vm1959_vm14, %v1961_v1, %v1957_v40  ;;  %v1975_v9 = vand.u32 2147483648, %v4807_v53  ;;  %v2033_v2 = vadd.f32 %v4844_v45, %v2032_v15  ;;  %vm2006_vm14 = vmor %vm2004_vm13, %vm2005_vm10 }
 0x693   :  { %v4873_v48 = vpop.eup %2833  ;;  %v1968_v36 = vadd.f32 %v4835_v56, %v1967_v14  ;;  %v2001_v25 = vsub.f32 1.0, %v2000_v7  ;;  %v1973_v15 = vand.u32 2147483647, %v4807_v53 }
 0x694   :  { %v2045_v61 = vmul.f32 %v4873_v48, %v4846_v52  ;;  %2835 = vtanh.f32 %v2064_v10  ;;  %v2027_v10 = vsel %vm2024_vm15, %v2026_v12, %v2022_v20  ;;  %v2037_v51 = vsel %vm4901_vm5, %v4844_v45, %v2033_v2 }
 0x695   :  { %v1894_v11 = vpop.f32.mrf.mxu3  ;;  %v2072_v40 = vsub.f32 1.0, %v2027_v10  ;;  %v2080_v20 = vmul.f32 %v2027_v10, %v4717_v8  ;;  %v1972_v53 = vsel %vm4906_vm6, %v4835_v56, %v1968_v36  ;;  %v2041_v12 = vor.u32 1.1754944e-38, %v2040_v34 }
 0x696   :  { %v1895_v63 = vadd.f32 %v1894_v11, %v3312_v43  ;;  %v2046_v23 = vsub.f32 1.0, %v2045_v61  ;;  %vm1974_vm8 = vcmp.eq.f32.partialorder %v1973_v15, 8.507059e+37  ;;  %vm2050_vm9 = vweird.f32 %v4873_v48 }
 0x697   :  { %v2042_v45 = vsel %vm2039_vm7, %v2041_v12, %v2037_v51  ;;  %v2055_v56 = vand.u32 2147483648, %v4846_v52  ;;  %v2053_v36 = vand.u32 2147483647, %v4846_v52  ;;  %vm2051_vm12 = vmor %vm2049_vm11, %vm2050_vm9 }
 0x698   :  { %v2061_v37 = vmul.f32 %v1962_v46, %v1895_v63  ;;  %v2047_v14 = vmul.f32 %v4873_v48, %v2046_v23  ;;  %v1976_v46 = vor.u32 1.1754944e-38, %v1975_v9  ;;  %v2002_v23 = vmul.f32 %v4865_v0, %v2001_v25 }
 0x699   :  { %v2073_v9 = vsub.f32 1.0, %v2042_v45  ;;  %v2081_v52 = vmul.f32 %v2042_v45, %v4736_v42  ;;  %vm2054_vm15 = vcmp.eq.f32.partialorder %v2053_v36, 8.507059e+37 }
 0x69a   :  { %v2836_v19 = vpop.eup %2835  ;;  %v2065_v61 = vadd.f32 %v2061_v37, %v5388_v47  ;;  %v1977_v2 = vsel %vm1974_vm8, %v1976_v46, %v1972_v53  ;;  %v2048_v8 = vadd.f32 %v4873_v48, %v2047_v14  ;;  %v2003_v34 = vadd.f32 %v4865_v0, %v2002_v23 }
 0x69b   :  { %v2076_v11 = vmul.f32 %v2836_v19, %v2072_v40  ;;  %v2008_v19 = vand.u32 2147483647, %v4831_v3  ;;  %v2056_v14 = vor.u32 1.1754944e-38, %v2055_v56 }
 0x69c   :  { %2837 = vtanh.f32 %v2065_v61  ;;  %v2010_v61 = vand.u32 2147483648, %v4831_v3  ;;  %v2052_v15 = vsel %vm2051_vm12, %v4873_v48, %v2048_v8  ;;  %v2007_v51 = vsel %vm2006_vm14, %v4865_v0, %v2003_v34  ;;  %v5394_v8 = vld [vmem:[#allocation41_spill] sm:$0xff] }
 0x69d   :  { %v1896_v63 = vpop.f32.mrf.mxu3  ;;  %v4918_v37 = vadd.f32 %v2080_v20, %v2076_v11  ;;  %2839 = vtanh.f32 %v4840_v24  ;;  %v2057_v11 = vsel %vm2054_vm15, %v2056_v14, %v2052_v15  ;;  %vm2009_vm0 = vcmp.eq.f32.partialorder %v2008_v19, 8.507059e+37 }
 0x69e   :  { %v1897_v47 = vadd.f32 %v1896_v63, %v3397_v26  ;;  %v2011_v20 = vor.u32 1.1754944e-38, %v2010_v61  ;;  %v2074_v53 = vsub.f32 1.0, %v2057_v11  ;;  %v2082_v42 = vmul.f32 %v2057_v11, %v4740_v6 }
 0x6a0   :  { %v2062_v10 = vmul.f32 %v1977_v2, %v1897_v47  ;;  %v2012_v3 = vsel %vm2009_vm0, %v2011_v20, %v2007_v51 }
 0x6a1   :  { %v2071_v63 = vsub.f32 1.0, %v2012_v3  ;;  %v2079_v45 = vmul.f32 %v2012_v3, %v4745_v18  ;;  %v5397_v3 = vld [vmem:[#allocation58_spill] sm:$0xff] }
 0x6a2   :  { %v2838_v25 = vpop.eup %2837  ;;  %v2066_v40 = vadd.f32 %v2062_v10, %v5393_v54 }
 0x6a3   :  { %v2077_v1 = vmul.f32 %v2838_v25, %v2073_v9  ;;  %v2840_v24 = vpop.eup %2839 }
 0x6a4   :  { %2841 = vtanh.f32 %v2066_v40  ;;  %v2075_v23 = vmul.f32 %v2840_v24, %v2071_v63 }
 0x6a5   :  { %v4937_v7 = vadd.f32 %v2081_v52, %v2077_v1 }
 0x6a6   :  { %v4946_v0 = vadd.f32 %v2079_v45, %v2075_v23 }
 0x6a8   :  { %v2112_v2 = vpack.c.bf16 %v4918_v37, %v4946_v0 }
 0x6aa   :  { %v2842_v48 = vpop.eup %2841 }
 0x6ab   :  { %v2078_v12 = vmul.f32 %v2842_v48, %v2074_v53 }
 0x6ad   :  { %v4941_v46 = vadd.f32 %v2082_v42, %v2078_v12 }
 0x6af   :  { %v2113_v47 = vpack.c.bf16 %v4941_v46, %v4937_v7 }
 0x6b1   :  { %2120 = vmatpush.bf16.msra.mxu0 %v2113_v47 }
 0x6b5   :  { %2121 = vmatpush.bf16.msra.mxu0 %v2112_v2 }
 0x6b8   :  { %2503 = vmatmul.msk.bf16.vlgmr.msra.gmra.mxu0 %vm317_vm1, %v4517_v59 }
 0x6c8   :  { %2504 = vmatmul.msk.bf16.gmra.mxu0 %vm317_vm1, %v4524_v22  ;;  %v5395_v22 = vld [vmem:[#allocation34_spill] sm:$0xff] }
 0x6c9   :  { %v2089_v36 = vmul.f32 %v5395_v22, %v3077_v29  ;;  %v2091_v61 = vmul.f32 %v5395_v22, %v5294_v28  ;;  %v2092_v52 = vmul.f32 %v5395_v22, %v5299_v21  ;;  %v2094_v21 = vmul.f32 %v5395_v22, %v5301_v38 }
 0x6ca   :  { %v2095_v38 = vmul.f32 %v5395_v22, %v5305_v58 }
 0x6cb   :  { %v2106_v63 = vadd.f32 %v2094_v21, %v5303_v4 }
 0x6d8   :  { %2505 = vmatmul.msk.bf16.gmra.mxu0 %vm317_vm1, %v4531_v13 }
 0x6e8   :  { %2506 = vmatmul.msk.bf16.gmra.mxu0 %vm317_vm1, %v4538_v62  ;;  %v2101_v62 = vadd.f32 %v2089_v36, %v5291_v5  ;;  %v2103_v5 = vadd.f32 %v2091_v61, %v5296_v31  ;;  %v2104_v31 = vadd.f32 %v2092_v52, %v5302_v60 }
 0x6f8   :  { %2507 = vmatmul.msk.bf16.gmra.mxu0 %vm317_vm1, %v4545_v35 }
 0x708   :  { %2508 = vmatmul.msk.bf16.gmra.mxu0 %vm317_vm1, %v4552_v50 }
 0x735   :  { %v2123_v6 = vpop.f32.mrf.mxu0 }
 0x736   :  { %v2124_v18 = vadd.f32 %v2123_v6, %v3087_v33  ;;  %v5396_v33 = vld [vmem:[#allocation43_spill] sm:$0xff] }
 0x738   :  { %v2153_v59 = vadd.f32 %v2124_v18, %v5394_v8 }
 0x73a   :  { %v2509_v13 = vmul.f32 -1.442695, %v2153_v59 }
 0x73c   :  { %2843 = vpow2.f32 %v2509_v13 }
 0x73d   :  { %v2125_v10 = vpop.f32.mrf.mxu0 }
 0x73e   :  { %v2126_v9 = vadd.f32 %v2125_v10, %v5290_v30 }
 0x740   :  { %v2154_v35 = vadd.f32 %v2126_v9, %v2101_v62 }
 0x742   :  { %v2510_v25 = vmul.f32 -1.442695, %v2154_v35  ;;  %v2844_v54 = vpop.eup %2843 }
 0x743   :  { %v4972_v29 = vadd.f32 1.0, %v2844_v54 }
 0x744   :  { %2845 = vpow2.f32 %v2510_v25 }
 0x745   :  { %v2128_v56 = vpop.f32.mrf.mxu0  ;;  %2847 = vrcp.f32 %v4972_v29  ;;  %vm2178_vm2 = vweird.f32 %v4972_v29 }
 0x746   :  { %v2129_v50 = vadd.f32 %v2128_v56, %v5292_v49  ;;  %v2107_v56 = vadd.f32 %v2095_v38, %v5306_v41  ;;  %v2182_v41 = vand.u32 2147483647, %v4972_v29 }
 0x748   :  { %v2155_v40 = vadd.f32 %v2129_v50, %v5396_v33  ;;  %v2184_v50 = vand.u32 2147483648, %v4972_v29  ;;  %vm2183_vm4 = vcmp.eq.f32.partialorder %v2182_v41, 8.507059e+37 }
 0x74a   :  { %v2511_v15 = vmul.f32 -1.442695, %v2155_v40  ;;  %v2846_v1 = vpop.eup %2845 }
 0x74b   :  { %v4980_v11 = vadd.f32 1.0, %v2846_v1  ;;  %v2848_v24 = vpop.eup %2847 }
 0x74c   :  { %2849 = vpow2.f32 %v2511_v15  ;;  %vm2179_vm1 = vweird.f32 %v2848_v24 }
 0x74d   :  { %v2130_v34 = vpop.f32.mrf.mxu0  ;;  %2851 = vrcp.f32 %v4980_v11  ;;  %vm2180_vm3 = vmor %vm2178_vm2, %vm2179_vm1  ;;  %vm2193_vm6 = vweird.f32 %v4980_v11 }
 0x74e   :  { %v2131_v30 = vadd.f32 %v2130_v34, %v5295_v16 }
 0x750   :  { %v2156_v49 = vadd.f32 %v2131_v30, %v2103_v5  ;;  %v2185_v30 = vor.u32 1.1754944e-38, %v2184_v50 }
 0x752   :  { %v2512_v20 = vmul.f32 -1.442695, %v2156_v49  ;;  %v2850_v53 = vpop.eup %2849 }
 0x753   :  { %v4989_v42 = vadd.f32 1.0, %v2850_v53  ;;  %v4993_v2 = vpop.eup %2851 }
 0x754   :  { %2853 = vpow2.f32 %v2512_v20  ;;  %v2189_v4 = vmul.f32 %v4993_v2, %v4980_v11  ;;  %vm2194_vm5 = vweird.f32 %v4993_v2 }
 0x755   :  { %v2133_v19 = vpop.f32.mrf.mxu0  ;;  %vm2195_vm7 = vmor %vm2193_vm6, %vm2194_vm5  ;;  %vm2208_vm10 = vweird.f32 %v4989_v42  ;;  %v2212_v38 = vand.u32 2147483647, %v4989_v42 }
 0x756   :  { %v2134_v28 = vadd.f32 %v2133_v19, %v5300_v57  ;;  %v2190_v34 = vsub.f32 1.0, %v2189_v4  ;;  %v5401_v4 = vld [vmem:[#allocation62_spill] sm:$0xff] }
 0x757   :  { %vm2213_vm13 = vcmp.eq.f32.partialorder %v2212_v38, 8.507059e+37  ;;  %v5407_v38 = vld [vmem:[#allocation63_spill] sm:$0xff] }
 0x758   :  { %v2233_v12 = vadd.f32 %v2134_v28, %v2104_v31  ;;  %v2191_v19 = vmul.f32 %v4993_v2, %v2190_v34 }
 0x75a   :  { %v2513_v60 = vmul.f32 -1.442695, %v2233_v12  ;;  %v2854_v6 = vpop.eup %2853  ;;  %v2192_v28 = vadd.f32 %v4993_v2, %v2191_v19  ;;  %v2342_v19 = vld [vmem:[%s5153_s7] sm:$0xf] }
 0x75b   :  { %2345 = vperm.xlu1 %2562, %v2342_v19   ;;  %v45_v19 = vpop.permute.xlu0 %44 }
 0x75c   :  { %v2196_v53 = vsel %vm2195_vm7, %v4993_v2, %v2192_v28  ;;  %v2214_v2 = vand.u32 2147483648, %v4989_v42 }
 0x75d   :  { %v2135_v14 = vpop.f32.mrf.mxu0 }
 0x75e   :  { %v2136_v51 = vadd.f32 %v2135_v14, %v5297_v27  ;;  %v2174_v27 = vmul.f32 %v2848_v24, %v4972_v29  ;;  %v2096_v29 = vmul.f32 %v5395_v22, %v3301_v39  ;;  %v2199_v39 = vand.u32 2147483648, %v4980_v11 }
 0x75f   :  { %v2215_v50 = vor.u32 1.1754944e-38, %v2214_v2 }
 0x760   :  { %v2234_v16 = vadd.f32 %v2136_v51, %v5397_v3  ;;  %v2175_v45 = vsub.f32 1.0, %v2174_v27  ;;  %v2108_v14 = vadd.f32 %v2096_v29, %v5333_v17  ;;  %v2197_v3 = vand.u32 2147483647, %v4980_v11  ;;  %v5398_v27 = vld [vmem:[#allocation44_spill] sm:$0xff] }
 0x761   :  { %v2200_v21 = vor.u32 1.1754944e-38, %v2199_v39  ;;  %v5402_v39 = vld [vmem:[#allocation61_spill] sm:$0xff] }
 0x762   :  { %v2514_v48 = vmul.f32 -1.442695, %v2234_v16  ;;  %v2176_v59 = vmul.f32 %v2848_v24, %v2175_v45  ;;  %vm2198_vm8 = vcmp.eq.f32.partialorder %v2197_v3, 8.507059e+37 }
 0x764   :  { %2855 = vpow2.f32 %v2514_v48  ;;  %v2177_v58 = vadd.f32 %v2848_v24, %v2176_v59 }
 0x765   :  { %v2138_v57 = vpop.f32.mrf.mxu0  ;;  %2857 = vrcp.f32 %v4989_v42 }
 0x766   :  { %v2139_v23 = vadd.f32 %v2138_v57, %v5304_v32  ;;  %2859 = vpow2.f32 %v2513_v60  ;;  %v5000_v32 = vadd.f32 1.0, %v2854_v6  ;;  %v2181_v40 = vsel %vm2180_vm3, %v2848_v24, %v2177_v58 }
 0x767   :  { %v2186_v52 = vsel %vm2183_vm4, %v2185_v30, %v2181_v40  ;;  %v2201_v60 = vsel %vm2198_vm8, %v2200_v21, %v2196_v53 }
 0x768   :  { %v2235_v47 = vadd.f32 %v2139_v23, %v2106_v63  ;;  %vm2223_vm4 = vweird.f32 %v5000_v32 }
 0x76a   :  { %v2515_v18 = vmul.f32 -1.442695, %v2235_v47  ;;  %v2856_v8 = vpop.eup %2855 }
 0x76b   :  { %v5004_v13 = vpop.eup %2857  ;;  %v5006_v9 = vadd.f32 1.0, %v2856_v8 }
 0x76c   :  { %2861 = vpow2.f32 %v2515_v18  ;;  %v2860_v35 = vpop.eup %2859  ;;  %vm2209_vm9 = vweird.f32 %v5004_v13 }
 0x76d   :  { %v2140_v10 = vpop.f32.mrf.mxu0  ;;  %2863 = vrcp.f32 %v5000_v32  ;;  %v5018_v61 = vadd.f32 1.0, %v2860_v35  ;;  %vm5057_vm11 = vmor %vm2208_vm10, %vm2209_vm9  ;;  %v2279_v34 = vand.u32 2147483648, %v5006_v9  ;;  %vm2273_vm15 = vweird.f32 %v5006_v9 }
 0x76e   :  { %v2141_v36 = vadd.f32 %v2140_v10, %v5307_v44  ;;  %v2204_v44 = vmul.f32 %v5004_v13, %v4989_v42  ;;  %2865 = vrcp.f32 %v5006_v9  ;;  %v2277_v42 = vand.u32 2147483647, %v5006_v9 }
 0x76f   :  { %v2280_v40 = vor.u32 1.1754944e-38, %v2279_v34 }
 0x770   :  { %v2236_v62 = vadd.f32 %v2141_v36, %v2107_v56  ;;  %v2205_v1 = vsub.f32 1.0, %v2204_v44  ;;  %vm2278_vm2 = vcmp.eq.f32.partialorder %v2277_v42, 8.507059e+37 }
 0x772   :  { %v2862_v25 = vpop.eup %2861  ;;  %v2516_v54 = vmul.f32 -1.442695, %v2236_v62  ;;  %v2206_v17 = vmul.f32 %v5004_v13, %v2205_v1 }
 0x773   :  { %v5015_v33 = vadd.f32 1.0, %v2862_v25  ;;  %v5024_v49 = vpop.eup %2863 }
 0x774   :  { %2867 = vpow2.f32 %v2516_v54  ;;  %v5029_v20 = vpop.eup %2865  ;;  %v2219_v48 = vmul.f32 %v5024_v49, %v5000_v32  ;;  %v2207_v63 = vadd.f32 %v5004_v13, %v2206_v17  ;;  %vm2224_vm14 = vweird.f32 %v5024_v49 }
 0x775   :  { %2869 = vrcp.f32 %v5015_v33  ;;  %v2143_v15 = vpop.f32.mrf.mxu0  ;;  %v2269_v12 = vmul.f32 %v5029_v20, %v5006_v9  ;;  %vm2274_vm12 = vweird.f32 %v5029_v20  ;;  %vm2288_vm3 = vweird.f32 %v5015_v33  ;;  %vm5109_vm6 = vmor %vm2223_vm4, %vm2224_vm14 }
 0x776   :  { %v2144_v5 = vadd.f32 %v2143_v15, %v3569_v55  ;;  %2871 = vrcp.f32 %v5018_v61  ;;  %v2220_v6 = vsub.f32 1.0, %v2219_v48  ;;  %v2211_v56 = vsel %vm5057_vm11, %v5004_v13, %v2207_v63  ;;  %vm2275_vm1 = vmor %vm2273_vm15, %vm2274_vm12 }
 0x777   :  { %v2270_v8 = vsub.f32 1.0, %v2269_v12  ;;  %v2216_v44 = vsel %vm2213_vm13, %v2215_v50, %v2211_v56  ;;  %vm2258_vm14 = vweird.f32 %v5018_v61 }
 0x778   :  { %v2313_v51 = vmul.f32 %v2186_v52, %v2144_v5  ;;  %v2221_v25 = vmul.f32 %v5024_v49, %v2220_v6  ;;  %v2294_v5 = vand.u32 2147483648, %v5015_v33  ;;  %v2229_v52 = vand.u32 2147483648, %v5000_v32 }
 0x779   :  { %v2271_v58 = vmul.f32 %v5029_v20, %v2270_v8 }
 0x77a   :  { %v2868_v22 = vpop.eup %2867  ;;  %v5033_v55 = vadd.f32 %v2313_v51, %v2108_v14  ;;  %v2292_v14 = vand.u32 2147483647, %v5015_v33 }
 0x77b   :  { %v5038_v16 = vpop.eup %2869  ;;  %v5040_v24 = vadd.f32 1.0, %v2868_v22  ;;  %v2272_v54 = vadd.f32 %v5029_v20, %v2271_v58  ;;  %v2262_v58 = vand.u32 2147483647, %v5018_v61 }
 0x77c   :  { %v2284_v31 = vmul.f32 %v5038_v16, %v5015_v33  ;;  %v5053_v23 = vpop.eup %2871  ;;  %vm2289_vm0 = vweird.f32 %v5038_v16  ;;  %vm2293_vm7 = vcmp.eq.f32.partialorder %v2292_v14, 8.507059e+37 }
 0x77d   :  { %2873 = vrcp.f32 %v5040_v24  ;;  %v2145_v11 = vpop.f32.mrf.mxu0  ;;  %v5064_v59 = vmul.f32 %v5053_v23, %v5018_v61  ;;  %v2276_v29 = vsel %vm2275_vm1, %v5029_v20, %v2272_v54  ;;  %v2227_v20 = vand.u32 2147483647, %v5000_v32  ;;  %vm5102_vm5 = vmor %vm2288_vm3, %vm2289_vm0 }
 0x77e   :  { %v2146_v57 = vadd.f32 %v2145_v11, %v5398_v27  ;;  %v2285_v47 = vsub.f32 1.0, %v2284_v31  ;;  %v2281_v1 = vsel %vm2278_vm2, %v2280_v40, %v2276_v29  ;;  %v2295_v11 = vor.u32 1.1754944e-38, %v2294_v5 }
 0x77f   :  { %v2326_v51 = vsub.f32 1.0, %v2281_v1  ;;  %v2255_v17 = vsub.f32 1.0, %v5064_v59  ;;  %v2334_v48 = vmul.f32 %v2281_v1, %v4918_v37  ;;  %v2230_v27 = vor.u32 1.1754944e-38, %v2229_v52 }
 0x780   :  { %v2314_v45 = vmul.f32 %v2201_v60, %v2146_v57  ;;  %v2286_v36 = vmul.f32 %v5038_v16, %v2285_v47  ;;  %vm2228_vm8 = vcmp.eq.f32.partialorder %v2227_v20, 8.507059e+37  ;;  %v2309_v2 = vand.u32 2147483648, %v5040_v24 }
 0x781   :  { %v2256_v37 = vmul.f32 %v5053_v23, %v2255_v17  ;;  %vm2303_vm10 = vweird.f32 %v5040_v24  ;;  %vm2259_vm12 = vweird.f32 %v5053_v23  ;;  %vm2263_vm0 = vcmp.eq.f32.partialorder %v2262_v58, 8.507059e+37 }
 0x782   :  { %v2318_v10 = vadd.f32 %v2314_v45, %v5401_v4  ;;  %v2287_v30 = vadd.f32 %v5038_v16, %v2286_v36  ;;  %v2310_v56 = vor.u32 1.1754944e-38, %v2309_v2  ;;  %v2264_v36 = vand.u32 2147483648, %v5018_v61  ;;  %vm2260_vm15 = vmor %vm2258_vm14, %vm2259_vm12 }
 0x783   :  { %v5071_v62 = vpop.eup %2873  ;;  %vm2348_vm1 = vcmask 326656  }
 0x784   :  { %v2299_v35 = vmul.f32 %v5071_v62, %v5040_v24  ;;  %2875 = vtanh.f32 %v2318_v10  ;;  %v2291_v32 = vsel %vm5102_vm5, %v5038_v16, %v2287_v30  ;;  %vm2304_vm9 = vweird.f32 %v5071_v62  ;;  %v5408_v30 = vld [vmem:[#allocation64_spill] sm:$0xff] }
 0x785   :  { %v2148_v13 = vpop.f32.mrf.mxu0  ;;  %v2296_v60 = vsel %vm2293_vm7, %v2295_v11, %v2291_v32  ;;  %vm2305_vm11 = vmor %vm2303_vm10, %vm2304_vm9  ;;  %v2257_v10 = vadd.f32 %v5053_v23, %v2256_v37  ;;  %v2265_v42 = vor.u32 1.1754944e-38, %v2264_v36  ;;  %v79_v29 = vadd.f32 %v5408_v30, %v45_v19 }
 0x786   :  { %v2149_v41 = vadd.f32 %v2148_v13, %v3312_v43  ;;  %v2300_v15 = vsub.f32 1.0, %v2299_v35  ;;  %v2222_v43 = vadd.f32 %v5024_v49, %v2221_v25  ;;  %v2327_v6 = vsub.f32 1.0, %v2296_v60 }
 0x787   :  { %v2335_v8 = vmul.f32 %v2296_v60, %v4937_v7 }
 0x788   :  { %v2315_v9 = vmul.f32 %v2216_v44, %v2149_v41  ;;  %v2301_v31 = vmul.f32 %v5071_v62, %v2300_v15  ;;  %v2226_v12 = vsel %vm5109_vm6, %v5024_v49, %v2222_v43  ;;  %v2307_v49 = vand.u32 2147483647, %v5040_v24 }
 0x789   :  { %v2231_v47 = vsel %vm2228_vm8, %v2230_v27, %v2226_v12 }
 0x78a   :  { %v2876_v28 = vpop.eup %2875  ;;  %v2319_v22 = vadd.f32 %v2315_v9, %v5402_v39  ;;  %v2302_v16 = vadd.f32 %v5071_v62, %v2301_v31  ;;  %vm2308_vm13 = vcmp.eq.f32.partialorder %v2307_v49, 8.507059e+37 }
 0x78b   :  { %v2330_v53 = vmul.f32 %v2876_v28, %v2326_v51 }
 0x78c   :  { %2877 = vtanh.f32 %v2319_v22  ;;  %v2306_v59 = vsel %vm2305_vm11, %v5071_v62, %v2302_v16  ;;  %v2261_v62 = vsel %vm2260_vm15, %v5053_v23, %v2257_v10  ;;  %v2341_v23 = vld [vmem:[%s5154_s6] sm:$0xf] }
 0x78d   :  { %v2150_v21 = vpop.f32.mrf.mxu0  ;;  %v2338_v57 = vadd.f32 %v2334_v48, %v2330_v53  ;;  %v2311_v7 = vsel %vm2308_vm13, %v2310_v56, %v2306_v59  ;;  %v2266_v50 = vsel %vm2263_vm0, %v2265_v42, %v2261_v62 }
 0x78e   :  { %v2151_v63 = vadd.f32 %v2150_v21, %v3397_v26  ;;  %v2328_v34 = vsub.f32 1.0, %v2311_v7  ;;  %v2336_v13 = vmul.f32 %v2311_v7, %v4941_v46  ;;  %v2325_v44 = vsub.f32 1.0, %v2266_v50 }
 0x78f   :  { %v2333_v61 = vmul.f32 %v2266_v50, %v4946_v0 }
 0x790   :  { %v2316_v45 = vmul.f32 %v2231_v47, %v2151_v63 }
 0x792   :  { %v2878_v18 = vpop.eup %2877  ;;  %v2320_v26 = vadd.f32 %v2316_v45, %v5407_v38 }
 0x793   :  { %v2331_v4 = vmul.f32 %v2878_v18, %v2327_v6 }
 0x794   :  { %2879 = vtanh.f32 %v2320_v26 }
 0x795   :  { %v2339_v24 = vadd.f32 %v2335_v8, %v2331_v4  ;;  %2881 = vtanh.f32 %v5033_v55 }
 0x79a   :  { %v2880_v35 = vpop.eup %2879 }
 0x79b   :  { %v2332_v25 = vmul.f32 %v2880_v35, %v2328_v34  ;;  %v2882_v54 = vpop.eup %2881 }
 0x79c   :  { %v2329_v40 = vmul.f32 %v2882_v54, %v2325_v44 }
 0x79d   :  { %v2340_v41 = vadd.f32 %v2336_v13, %v2332_v25 }
 0x79e   :  { %v2337_v55 = vadd.f32 %v2333_v61, %v2329_v40 }
 0x79f   :  { %2364 = vmatpush.msra.mxu1 %v2340_v41 }
 0x7a1   :  { %2365 = vmatpush.msra.mxu1 %v2339_v24 }
 0x7a3   :  { %2366 = vmatpush.msra.mxu1 %v2338_v57 }
 0x7a5   :  { %2367 = vmatpush.msra.mxu1 %v2337_v55 }
 0x7a6   :  { %2517 = vmatmul.msk.f32.vlgmr.msra.gmra.mxu1 %vm2348_vm1, %v2341_v23 }
 0x7cd   :  { %v2346_v15 = vpop.permute.xlu1 %2345 }
 0x823   :  { %v2369_v46 = vpop.f32.mrf.mxu1 }
 0x824   :  { %v2370_v9 = vadd.f32 %v2369_v46, %v2346_v15 }
 0x826   :  { %v2372_v43 = vadd.f32 %v2370_v9, %v79_v29 }
 0x828   :  { %2373 = vst [vmem:[%s5155_s8] sm:$0xf] %v2372_v43 }

</bundles_post_ra>
